<compile_context>
chip_gen: v6e
topology: v6e:2x2x1
jax: 0.10.0
libtpu: 0.0.40
codegen_flags: <defaults>
</compile_context>

<pallas_src>
import jax
import jax.numpy as jnp
from jax import lax
from jax.experimental import pallas as pl
from jax.experimental.pallas import tpu as pltpu

LANE = 128


# ----------------------------------------------------------------------------
# helpers
# ----------------------------------------------------------------------------
def _round_up(n, m):
    return ((n + m - 1) // m) * m


def _pick_tile(n, candidates):
    """Largest candidate that divides n; fall back to the full extent."""
    for c in candidates:
        if c <= n and n % c == 0:
            return c
    return n


def _vmem_capacity_bytes():
    try:
        return int(pltpu.get_tpu_info().vmem_capacity_bytes)
    except Exception:
        return 64 * 1024 * 1024          # v7x per-core VMEM; conservative default


def _pick_seq_tile(S, tb, din_p, hp, budget_bytes):
    """Largest seq tile whose (double-buffered) block footprint fits the budget."""
    g = 4 * hp
    fixed = (2 * (din_p + hp) * g * 2    # double-buffered bf16 weights (W_ih + W_hh)
             + 2 * g * 4                 # bias
             + 2 * tb * hp * 4           # hn output block
             + 2 * tb * hp * 4)          # h / c scratch
    for ts in (512, 256, 128, 64, 32, 16, 8):
        if ts <= S and S % ts == 0:
            blocks = 2 * ts * tb * din_p * 2 + 2 * ts * tb * hp * 2   # x + y bf16
            if fixed + blocks <= budget_bytes:
                return ts
    for ts in (8, 4, 2, 1):
        if ts <= S and S % ts == 0:
            return ts
    return S


# ----------------------------------------------------------------------------
# Fused bidirectional LSTM layer kernel
#   grid = (direction, batch_tile, seq_tile)  with seq the 'arbitrary' carry axis.
#   direction 0 runs forward in time, direction 1 runs backward in time (the
#   seq-block index_map and the reversed inner loop implement the reversal, so both
#   read/write the natural time layout).
# ----------------------------------------------------------------------------
def _dual_lstm_kernel(x_ref, wih_ref, whh_ref, b_ref, y_ref, hn_ref, h_scr, c_scr):
    # x_ref  : (ts, tb, Din_p) bf16   layer input block
    # wih_ref: (Din_p, 4*Hp)   bf16   gate-slot-padded, pre-transposed W_ih
    # whh_ref: (Hp,    4*Hp)   bf16   gate-slot-padded, pre-transposed W_hh
    # b_ref  : (1, 4*Hp)       f32    b_ih + b_hh (gate-slot-padded)
    # y_ref  : (ts, tb, Hp)    bf16   per-timestep hidden states (natural time order)
    # hn_ref : (tb, Hp)        f32    final hidden state (written at last seq block)
    # h_scr/c_scr: (tb, Hp)    f32    recurrent state carried across seq blocks
    ts = x_ref.shape[0]
    hp = hn_ref.shape[-1]
    d = pl.program_id(0)                 # 0: forward, 1: backward in time
    s = pl.program_id(2)

    @pl.when(s == 0)
    def _():
        h_scr[...] = jnp.zeros_like(h_scr)
        c_scr[...] = jnp.zeros_like(c_scr)

    def step(i, carry):
        # forward: t = i ; reverse: t = ts - 1 - i  (block order handled by index_map)
        t = i + d * (ts - 1 - 2 * i)
        x_t = x_ref[t]                                            # (tb, Din_p) bf16
        h = h_scr[...]
        gates = (jnp.dot(x_t, wih_ref[...], preferred_element_type=jnp.float32)
                 + jnp.dot(h.astype(jnp.bfloat16), whh_ref[...],
                           preferred_element_type=jnp.float32)
                 + b_ref[...])                                    # (tb, 4*Hp) f32
        i_g = jax.nn.sigmoid(gates[:, 0 * hp:1 * hp])
        f_g = jax.nn.sigmoid(gates[:, 1 * hp:2 * hp])
        g_g = jnp.tanh(gates[:, 2 * hp:3 * hp])
        o_g = jax.nn.sigmoid(gates[:, 3 * hp:4 * hp])
        c_new = f_g * c_scr[...] + i_g * g_g
        h_new = o_g * jnp.tanh(c_new)
        c_scr[...] = c_new
        h_scr[...] = h_new
        y_ref[t] = h_new.astype(y_ref.dtype)
        return carry

    unroll = 8 if ts % 8 == 0 else (4 if ts % 4 == 0 else 1)
    lax.fori_loop(0, ts, step, 0, unroll=unroll)

    @pl.when(s == pl.num_programs(2) - 1)
    def _():
        hn_ref[...] = h_scr[...]


def _dual_lstm_layer(x, wih, whh, bias, B, S, din_p, hp):
    """Run forward+reverse LSTM layers in one pallas_call.

    x    : (S, B, din_p) bf16 (layer 0, shared by both directions) or
           (2, S, B, din_p) bf16 (stacked per-direction outputs of the previous layer)
    wih  : (2, din_p, 4*hp) bf16, whh: (2, hp, 4*hp) bf16, bias: (2, 1, 4*hp) f32
    Returns y (2, S, B, hp) bf16 and hn (2, B, hp) f32.
    """
    stacked = x.ndim == 4
    tb = _pick_tile(B, (128, 64, 32, 16, 8))
    cap = _vmem_capacity_bytes()
    ts = _pick_seq_tile(S, tb, din_p, hp, budget_bytes=cap // 3)
    ns = S // ts

    def seq_block(d, s):
        # forward visits seq blocks 0..ns-1, reverse visits ns-1..0
        return s + d * (ns - 1 - 2 * s)

    if stacked:
        x_spec = pl.BlockSpec((None, ts, tb, din_p),
                              lambda d, b, s: (d, seq_block(d, s), b, 0))
    else:
        x_spec = pl.BlockSpec((ts, tb, din_p),
                              lambda d, b, s: (seq_block(d, s), b, 0))

    y, hn = pl.pallas_call(
        _dual_lstm_kernel,
        out_shape=(jax.ShapeDtypeStruct((2, S, B, hp), jnp.bfloat16),
                   jax.ShapeDtypeStruct((2, B, hp), jnp.float32)),
        grid_spec=pltpu.PrefetchScalarGridSpec(
            num_scalar_prefetch=0,
            grid=(2, B // tb, ns),                 # carry (seq) axis last
            in_specs=[
                x_spec,
                pl.BlockSpec((None, din_p, 4 * hp), lambda d, b, s: (d, 0, 0)),
                pl.BlockSpec((None, hp, 4 * hp), lambda d, b, s: (d, 0, 0)),
                pl.BlockSpec((None, 1, 4 * hp), lambda d, b, s: (d, 0, 0)),
            ],
            out_specs=[
                pl.BlockSpec((None, ts, tb, hp),
                             lambda d, b, s: (d, seq_block(d, s), b, 0)),
                pl.BlockSpec((None, tb, hp), lambda d, b, s: (d, b, 0)),
            ],
            scratch_shapes=[
                pltpu.VMEM((tb, hp), jnp.float32),
                pltpu.VMEM((tb, hp), jnp.float32),
            ],
        ),
        compiler_params=pltpu.CompilerParams(
            dimension_semantics=("parallel", "parallel", "arbitrary"),
            vmem_limit_bytes=min(int(cap * 0.9), 128 * 1024 * 1024)),
    )(x, wih, whh, bias)
    return y, hn


# ----------------------------------------------------------------------------
# Host-side weight prep: transpose, fold biases, pad each gate to a 128-lane slot.
# Padded hidden units stay exactly zero through the recurrence (sigmoid(0)*0 etc.),
# so padding is purely a layout optimization.
# ----------------------------------------------------------------------------
def _prep_direction_weights(params, din_p, hp):
    w_ih, w_hh, b_ih, b_hh = params
    H = w_hh.shape[1]
    D = w_ih.shape[1]
    wih = jnp.zeros((din_p, 4 * hp), jnp.float32)
    whh = jnp.zeros((hp, 4 * hp), jnp.float32)
    bias = jnp.zeros((1, 4 * hp), jnp.float32)
    wih_t = w_ih.T.astype(jnp.float32)
    whh_t = w_hh.T.astype(jnp.float32)
    b = (b_ih + b_hh).astype(jnp.float32)
    for k in range(4):
        wih = wih.at[:D, k * hp:k * hp + H].set(wih_t[:, k * H:(k + 1) * H])
        whh = whh.at[:H, k * hp:k * hp + H].set(whh_t[:, k * H:(k + 1) * H])
        bias = bias.at[:, k * hp:k * hp + H].set(b[None, k * H:(k + 1) * H])
    return wih.astype(jnp.bfloat16), whh.astype(jnp.bfloat16), bias


# ----------------------------------------------------------------------------
# ProteinLSTMEncoder forward
# ----------------------------------------------------------------------------
def protein_lstm_encoder(inputs, fwd_params, rev_params):
    """inputs: (B, S, D_in) f32; *_params: list of (w_ih, w_hh, b_ih, b_hh) per layer.

    Returns (output, pooled) with output (B, S, 2H) f32 and pooled (B, H, 2L) f32.
    """
    B, S, D = inputs.shape
    H = fwd_params[0][1].shape[1]
    L = len(fwd_params)
    hp = _round_up(H, LANE)
    dp = _round_up(D, LANE)

    # Time-major, zero-padded, bf16 layer-0 input. It is shared by both directions;
    # the reverse stack's time flip happens inside the kernel via the seq index_map.
    x = jnp.transpose(inputs, (1, 0, 2))
    x = jnp.pad(x, ((0, 0), (0, 0), (0, dp - D))).astype(jnp.bfloat16)

    cur = x
    din_p = dp
    hns = []
    for l in range(L):
        fw = _prep_direction_weights(fwd_params[l], din_p, hp)
        rv = _prep_direction_weights(rev_params[l], din_p, hp)
        wih = jnp.stack([fw[0], rv[0]])        # (2, din_p, 4*hp) bf16
        whh = jnp.stack([fw[1], rv[1]])        # (2, hp, 4*hp)    bf16
        bias = jnp.stack([fw[2], rv[2]])       # (2, 1, 4*hp)     f32
        cur, hn = _dual_lstm_layer(cur, wih, whh, bias, B, S, din_p, hp)
        hns.append(hn)
        din_p = hp                             # next layer consumes the padded hidden

    fwd_out = cur[0, :, :, :H]
    rev_out = cur[1, :, :, :H]                 # already in natural time order
    output = jnp.concatenate([fwd_out, rev_out], axis=-1)          # (S, B, 2H)
    output = jnp.transpose(output, (1, 0, 2)).astype(jnp.float32)  # (B, S, 2H)

    pooled = ([hns[l][0, :, :H] for l in range(L)]
              + [hns[l][1, :, :H] for l in range(L)])
    pooled = jnp.stack(pooled, axis=2).astype(jnp.float32)         # (B, H, 2L)
    return output, pooled


# ----------------------------------------------------------------------------
# Pure-JAX f32 reference (mirrors PyTorch nn.LSTM math exactly)
# ----------------------------------------------------------------------------
def reference_lstm_layer(x, w_ih, w_hh, b_ih, b_hh):
    B, S, D = x.shape
    H = w_hh.shape[1]

    def step(carry, x_t):
        h, c = carry
        gates = x_t @ w_ih.T + b_ih + h @ w_hh.T + b_hh
        i, f, g, o = jnp.split(gates, 4, axis=-1)
        i = jax.nn.sigmoid(i)
        f = jax.nn.sigmoid(f)
        g = jnp.tanh(g)
        o = jax.nn.sigmoid(o)
        c = f * c + i * g
        h = o * jnp.tanh(c)
        return (h, c), h

    h0 = jnp.zeros((B, H), jnp.float32)
    c0 = jnp.zeros((B, H), jnp.float32)
    (hN, _), ys = lax.scan(step, (h0, c0), jnp.transpose(x, (1, 0, 2)))
    return jnp.transpose(ys, (1, 0, 2)), hN


def reference_encoder(inputs, fwd_params, rev_params):
    fwd_out = inputs
    fwd_pooled = []
    for p in fwd_params:
        fwd_out, hn = reference_lstm_layer(fwd_out, *p)
        fwd_pooled.append(hn)
    rev_out = inputs[:, ::-1, :]
    rev_pooled = []
    for p in rev_params:
        rev_out, hn = reference_lstm_layer(rev_out, *p)
        rev_pooled.append(hn)
    rev_out = rev_out[:, ::-1, :]
    output = jnp.concatenate([fwd_out, rev_out], axis=2)
    pooled = jnp.stack(fwd_pooled + rev_pooled, axis=2)
    return output, pooled


# ----------------------------------------------------------------------------
if __name__ == "__main__":
    # Small config consistent with the module: batch=2, seq=8,
    # input_size=16, hidden_size=32, num_hidden_layers=3 (-> 2L = 6).
    B, S = 2, 8
    INPUT_SIZE, HIDDEN_SIZE, NUM_LAYERS = 16, 32, 3

    key = jax.random.PRNGKey(0)
    keys = jax.random.split(key, 2 * NUM_LAYERS + 1)

    inputs = jax.random.normal(keys[0], (B, S, INPUT_SIZE), dtype=jnp.float32)

    def make_layer_params(k, d_in, h):
        k1, k2, k3, k4 = jax.random.split(k, 4)
        scale = 0.1
        return (
            jax.random.normal(k1, (4 * h, d_in), jnp.float32) * scale,  # w_ih
            jax.random.normal(k2, (4 * h, h), jnp.float32) * scale,     # w_hh
            jax.random.normal(k3, (4 * h,), jnp.float32) * scale,       # b_ih
            jax.random.normal(k4, (4 * h,), jnp.float32) * scale,       # b_hh
        )

    fwd_params, rev_params = [], []
    for layer in range(NUM_LAYERS):
        d_in = INPUT_SIZE if layer == 0 else HIDDEN_SIZE
        fwd_params.append(make_layer_params(keys[1 + layer], d_in, HIDDEN_SIZE))
        rev_params.append(
            make_layer_params(keys[1 + NUM_LAYERS + layer], d_in, HIDDEN_SIZE))

    output, pooled = protein_lstm_encoder(inputs, fwd_params, rev_params)
    output = jax.block_until_ready(output)
    pooled = jax.block_until_ready(pooled)

    ref_out, ref_pooled = reference_encoder(inputs, fwd_params, rev_params)

    assert output.shape == (B, S, 2 * HIDDEN_SIZE)
    assert pooled.shape == (B, HIDDEN_SIZE, 2 * NUM_LAYERS)
    # bf16 MXU matmuls vs f32 reference -> few-e-3 typical deviation; 3e-2 tolerance.
    assert jnp.allclose(output, ref_out, atol=3e-2, rtol=3e-2), "output mismatch"
    assert jnp.allclose(pooled, ref_pooled, atol=3e-2, rtol=3e-2), "pooled mismatch"

    print("KERNEL_OK")
</pallas_src>

<mosaic_0001>
module attributes {stable_mosaic.version = 11 : i64} {
  func.func @_dual_lstm_kernel(%arg0: i32, %arg1: i32, %arg2: i32, %arg3: memref<8x2x128xbf16, #tpu.memory_space<vmem>>, %arg4: memref<1x128x512xbf16, #tpu.memory_space<vmem>>, %arg5: memref<1x128x512xbf16, #tpu.memory_space<vmem>>, %arg6: memref<1x1x512xf32, #tpu.memory_space<vmem>>, %arg7: memref<1x8x2x128xbf16, #tpu.memory_space<vmem>>, %arg8: memref<1x2x128xf32, #tpu.memory_space<vmem>>, %arg9: memref<2x128xf32, #tpu.memory_space<vmem>>, %arg10: memref<2x128xf32, #tpu.memory_space<vmem>>) attributes {dimension_semantics = [#tpu.dimension_semantics<parallel>, #tpu.dimension_semantics<parallel>, #tpu.dimension_semantics<arbitrary>], iteration_bounds = array<i64: 2, 1, 1>, scalar_prefetch = 0 : i64, scratch_operands = 2 : i64, tpu.core_type = #tpu.core_type<tc>, window_params = [{transform_indices = @transform_0, window_bounds = array<i64: 8, 2, 128>}, {transform_indices = @transform_1, window_bounds = array<i64: 1, 128, 512>}, {transform_indices = @transform_2, window_bounds = array<i64: 1, 128, 512>}, {transform_indices = @transform_3, window_bounds = array<i64: 1, 1, 512>}, {transform_indices = @transform_4, window_bounds = array<i64: 1, 8, 2, 128>}, {transform_indices = @transform_5, window_bounds = array<i64: 1, 2, 128>}]} {
    %c0_i32 = arith.constant 0 : i32
    %0 = arith.cmpi eq, %arg2, %c0_i32 : i32
    %1 = arith.extui %0 : i1 to i32
    %c0_i32_0 = arith.constant 0 : i32
    %2 = arith.cmpi ne, %1, %c0_i32_0 : i32
    scf.if %2 {
      %cst_234 = arith.constant 0.000000e+00 : f32
      %430 = vector.broadcast %cst_234 : f32 to vector<2x128xf32>
      %c0_235 = arith.constant 0 : index
      %c0_236 = arith.constant 0 : index
      %431 = vector.load %arg9[%c0_235, %c0_236] : memref<2x128xf32, #tpu.memory_space<vmem>>, vector<2x128xf32>
      tpu.vector_store %arg9[%c0_235, %c0_236], %430 {strides = array<i32>} : memref<2x128xf32, #tpu.memory_space<vmem>>, vector<2x128xf32>,
      %cst_237 = arith.constant 0.000000e+00 : f32
      %432 = vector.broadcast %cst_237 : f32 to vector<2x128xf32>
      %c0_238 = arith.constant 0 : index
      %c0_239 = arith.constant 0 : index
      %433 = vector.load %arg10[%c0_238, %c0_239] : memref<2x128xf32, #tpu.memory_space<vmem>>, vector<2x128xf32>
      tpu.vector_store %arg10[%c0_238, %c0_239], %432 {strides = array<i32>} : memref<2x128xf32, #tpu.memory_space<vmem>>, vector<2x128xf32>,
    } else {
    }
    %c0_i32_1 = arith.constant 0 : i32
    %c2_i32 = arith.constant 2 : i32
    %3 = arith.muli %c2_i32, %c0_i32_1 : i32
    %c7_i32 = arith.constant 7 : i32
    %4 = arith.subi %c7_i32, %3 : i32
    %5 = arith.muli %arg0, %4 : i32
    %6 = arith.addi %c0_i32_1, %5 : i32
    %7 = arith.index_cast %6 : i32 to index
    %c0 = arith.constant 0 : index
    %c0_2 = arith.constant 0 : index
    %8 = vector.load %arg3[%7, %c0, %c0_2] : memref<8x2x128xbf16, #tpu.memory_space<vmem>>, vector<1x2x128xbf16>
    %9 = vector.shape_cast %8 : vector<1x2x128xbf16> to vector<2x128xbf16>
    %c0_3 = arith.constant 0 : index
    %c0_4 = arith.constant 0 : index
    %10 = vector.load %arg9[%c0_3, %c0_4] : memref<2x128xf32, #tpu.memory_space<vmem>>, vector<2x128xf32>
    %c0_5 = arith.constant 0 : index
    %c0_6 = arith.constant 0 : index
    %c0_7 = arith.constant 0 : index
    %11 = vector.load %arg4[%c0_5, %c0_6, %c0_7] : memref<1x128x512xbf16, #tpu.memory_space<vmem>>, vector<1x128x512xbf16>
    %12 = vector.shape_cast %11 : vector<1x128x512xbf16> to vector<128x512xbf16>
    %cst = arith.constant dense<0.000000e+00> : vector<2x512xf32>
    %13 = tpu.matmul %9, %12, %cst {dimension_numbers = #tpu.dot_dimension_numbers<[1], [0], [0], [1], [0, 0, 1, 1], [], []>} : vector<2x128xbf16>, vector<128x512xbf16>, vector<2x512xf32> -> vector<2x512xf32>
    %14 = arith.truncf %10 : vector<2x128xf32> to vector<2x128xbf16>
    %c0_8 = arith.constant 0 : index
    %c0_9 = arith.constant 0 : index
    %c0_10 = arith.constant 0 : index
    %15 = vector.load %arg5[%c0_8, %c0_9, %c0_10] : memref<1x128x512xbf16, #tpu.memory_space<vmem>>, vector<1x128x512xbf16>
    %16 = vector.shape_cast %15 : vector<1x128x512xbf16> to vector<128x512xbf16>
    %cst_11 = arith.constant dense<0.000000e+00> : vector<2x512xf32>
    %17 = tpu.matmul %14, %16, %cst_11 {dimension_numbers = #tpu.dot_dimension_numbers<[1], [0], [0], [1], [0, 0, 1, 1], [], []>} : vector<2x128xbf16>, vector<128x512xbf16>, vector<2x512xf32> -> vector<2x512xf32>
    %18 = arith.addf %13, %17 : vector<2x512xf32>
    %c0_12 = arith.constant 0 : index
    %c0_13 = arith.constant 0 : index
    %c0_14 = arith.constant 0 : index
    %19 = vector.load %arg6[%c0_12, %c0_13, %c0_14] : memref<1x1x512xf32, #tpu.memory_space<vmem>>, vector<1x1x512xf32>
    %20 = vector.shape_cast %19 : vector<1x1x512xf32> to vector<1x512xf32>
    %21 = vector.broadcast %20 : vector<1x512xf32> to vector<2x512xf32>
    %22 = arith.addf %18, %21 : vector<2x512xf32>
    %23 = vector.extract_strided_slice %22 {offsets = [0, 0], sizes = [2, 128], strides = [1, 1]} : vector<2x512xf32> to vector<2x128xf32>
    %24 = arith.negf %23 : vector<2x128xf32>
    %25 = math.exp %24 : vector<2x128xf32>
    %cst_15 = arith.constant 1.000000e+00 : f32
    %26 = vector.broadcast %cst_15 : f32 to vector<2x128xf32>
    %27 = arith.addf %26, %25 : vector<2x128xf32>
    %28 = arith.divf %26, %27 : vector<2x128xf32>
    %29 = vector.extract_strided_slice %22 {offsets = [0, 128], sizes = [2, 128], strides = [1, 1]} : vector<2x512xf32> to vector<2x128xf32>
    %30 = arith.negf %29 : vector<2x128xf32>
    %31 = math.exp %30 : vector<2x128xf32>
    %cst_16 = arith.constant 1.000000e+00 : f32
    %32 = vector.broadcast %cst_16 : f32 to vector<2x128xf32>
    %33 = arith.addf %32, %31 : vector<2x128xf32>
    %34 = arith.divf %32, %33 : vector<2x128xf32>
    %35 = vector.extract_strided_slice %22 {offsets = [0, 256], sizes = [2, 128], strides = [1, 1]} : vector<2x512xf32> to vector<2x128xf32>
    %36 = math.tanh %35 : vector<2x128xf32>
    %37 = vector.extract_strided_slice %22 {offsets = [0, 384], sizes = [2, 128], strides = [1, 1]} : vector<2x512xf32> to vector<2x128xf32>
    %38 = arith.negf %37 : vector<2x128xf32>
    %39 = math.exp %38 : vector<2x128xf32>
    %cst_17 = arith.constant 1.000000e+00 : f32
    %40 = vector.broadcast %cst_17 : f32 to vector<2x128xf32>
    %41 = arith.addf %40, %39 : vector<2x128xf32>
    %42 = arith.divf %40, %41 : vector<2x128xf32>
    %c0_18 = arith.constant 0 : index
    %c0_19 = arith.constant 0 : index
    %43 = vector.load %arg10[%c0_18, %c0_19] : memref<2x128xf32, #tpu.memory_space<vmem>>, vector<2x128xf32>
    %44 = arith.mulf %34, %43 : vector<2x128xf32>
    %45 = arith.mulf %28, %36 : vector<2x128xf32>
    %46 = arith.addf %44, %45 : vector<2x128xf32>
    %47 = math.tanh %46 : vector<2x128xf32>
    %48 = arith.mulf %42, %47 : vector<2x128xf32>
    %c0_20 = arith.constant 0 : index
    %c0_21 = arith.constant 0 : index
    %49 = vector.load %arg10[%c0_20, %c0_21] : memref<2x128xf32, #tpu.memory_space<vmem>>, vector<2x128xf32>
    tpu.vector_store %arg10[%c0_20, %c0_21], %46 {strides = array<i32>} : memref<2x128xf32, #tpu.memory_space<vmem>>, vector<2x128xf32>,
    %c0_22 = arith.constant 0 : index
    %c0_23 = arith.constant 0 : index
    %50 = vector.load %arg9[%c0_22, %c0_23] : memref<2x128xf32, #tpu.memory_space<vmem>>, vector<2x128xf32>
    tpu.vector_store %arg9[%c0_22, %c0_23], %48 {strides = array<i32>} : memref<2x128xf32, #tpu.memory_space<vmem>>, vector<2x128xf32>,
    %51 = arith.truncf %48 : vector<2x128xf32> to vector<2x128xbf16>
    %c0_24 = arith.constant 0 : index
    %52 = arith.index_cast %6 : i32 to index
    %c0_25 = arith.constant 0 : index
    %c0_26 = arith.constant 0 : index
    %53 = vector.load %arg7[%c0_24, %52, %c0_25, %c0_26] : memref<1x8x2x128xbf16, #tpu.memory_space<vmem>>, vector<1x1x2x128xbf16>
    %54 = vector.shape_cast %53 : vector<1x1x2x128xbf16> to vector<2x128xbf16>
    %55 = vector.shape_cast %51 : vector<2x128xbf16> to vector<1x1x2x128xbf16>
    tpu.vector_store %arg7[%c0_24, %52, %c0_25, %c0_26], %55 {strides = array<i32>} : memref<1x8x2x128xbf16, #tpu.memory_space<vmem>>, vector<1x1x2x128xbf16>,
    %c1_i32 = arith.constant 1 : i32
    %c2_i32_27 = arith.constant 2 : i32
    %56 = arith.muli %c2_i32_27, %c1_i32 : i32
    %c7_i32_28 = arith.constant 7 : i32
    %57 = arith.subi %c7_i32_28, %56 : i32
    %58 = arith.muli %arg0, %57 : i32
    %59 = arith.addi %c1_i32, %58 : i32
    %60 = arith.index_cast %59 : i32 to index
    %c0_29 = arith.constant 0 : index
    %c0_30 = arith.constant 0 : index
    %61 = vector.load %arg3[%60, %c0_29, %c0_30] : memref<8x2x128xbf16, #tpu.memory_space<vmem>>, vector<1x2x128xbf16>
    %62 = vector.shape_cast %61 : vector<1x2x128xbf16> to vector<2x128xbf16>
    %c0_31 = arith.constant 0 : index
    %c0_32 = arith.constant 0 : index
    %63 = vector.load %arg9[%c0_31, %c0_32] : memref<2x128xf32, #tpu.memory_space<vmem>>, vector<2x128xf32>
    %c0_33 = arith.constant 0 : index
    %c0_34 = arith.constant 0 : index
    %c0_35 = arith.constant 0 : index
    %64 = vector.load %arg4[%c0_33, %c0_34, %c0_35] : memref<1x128x512xbf16, #tpu.memory_space<vmem>>, vector<1x128x512xbf16>
    %65 = vector.shape_cast %64 : vector<1x128x512xbf16> to vector<128x512xbf16>
    %cst_36 = arith.constant dense<0.000000e+00> : vector<2x512xf32>
    %66 = tpu.matmul %62, %65, %cst_36 {dimension_numbers = #tpu.dot_dimension_numbers<[1], [0], [0], [1], [0, 0, 1, 1], [], []>} : vector<2x128xbf16>, vector<128x512xbf16>, vector<2x512xf32> -> vector<2x512xf32>
    %67 = arith.truncf %63 : vector<2x128xf32> to vector<2x128xbf16>
    %c0_37 = arith.constant 0 : index
    %c0_38 = arith.constant 0 : index
    %c0_39 = arith.constant 0 : index
    %68 = vector.load %arg5[%c0_37, %c0_38, %c0_39] : memref<1x128x512xbf16, #tpu.memory_space<vmem>>, vector<1x128x512xbf16>
    %69 = vector.shape_cast %68 : vector<1x128x512xbf16> to vector<128x512xbf16>
    %cst_40 = arith.constant dense<0.000000e+00> : vector<2x512xf32>
    %70 = tpu.matmul %67, %69, %cst_40 {dimension_numbers = #tpu.dot_dimension_numbers<[1], [0], [0], [1], [0, 0, 1, 1], [], []>} : vector<2x128xbf16>, vector<128x512xbf16>, vector<2x512xf32> -> vector<2x512xf32>
    %71 = arith.addf %66, %70 : vector<2x512xf32>
    %c0_41 = arith.constant 0 : index
    %c0_42 = arith.constant 0 : index
    %c0_43 = arith.constant 0 : index
    %72 = vector.load %arg6[%c0_41, %c0_42, %c0_43] : memref<1x1x512xf32, #tpu.memory_space<vmem>>, vector<1x1x512xf32>
    %73 = vector.shape_cast %72 : vector<1x1x512xf32> to vector<1x512xf32>
    %74 = vector.broadcast %73 : vector<1x512xf32> to vector<2x512xf32>
    %75 = arith.addf %71, %74 : vector<2x512xf32>
    %76 = vector.extract_strided_slice %75 {offsets = [0, 0], sizes = [2, 128], strides = [1, 1]} : vector<2x512xf32> to vector<2x128xf32>
    %77 = arith.negf %76 : vector<2x128xf32>
    %78 = math.exp %77 : vector<2x128xf32>
    %cst_44 = arith.constant 1.000000e+00 : f32
    %79 = vector.broadcast %cst_44 : f32 to vector<2x128xf32>
    %80 = arith.addf %79, %78 : vector<2x128xf32>
    %81 = arith.divf %79, %80 : vector<2x128xf32>
    %82 = vector.extract_strided_slice %75 {offsets = [0, 128], sizes = [2, 128], strides = [1, 1]} : vector<2x512xf32> to vector<2x128xf32>
    %83 = arith.negf %82 : vector<2x128xf32>
    %84 = math.exp %83 : vector<2x128xf32>
    %cst_45 = arith.constant 1.000000e+00 : f32
    %85 = vector.broadcast %cst_45 : f32 to vector<2x128xf32>
    %86 = arith.addf %85, %84 : vector<2x128xf32>
    %87 = arith.divf %85, %86 : vector<2x128xf32>
    %88 = vector.extract_strided_slice %75 {offsets = [0, 256], sizes = [2, 128], strides = [1, 1]} : vector<2x512xf32> to vector<2x128xf32>
    %89 = math.tanh %88 : vector<2x128xf32>
    %90 = vector.extract_strided_slice %75 {offsets = [0, 384], sizes = [2, 128], strides = [1, 1]} : vector<2x512xf32> to vector<2x128xf32>
    %91 = arith.negf %90 : vector<2x128xf32>
    %92 = math.exp %91 : vector<2x128xf32>
    %cst_46 = arith.constant 1.000000e+00 : f32
    %93 = vector.broadcast %cst_46 : f32 to vector<2x128xf32>
    %94 = arith.addf %93, %92 : vector<2x128xf32>
    %95 = arith.divf %93, %94 : vector<2x128xf32>
    %c0_47 = arith.constant 0 : index
    %c0_48 = arith.constant 0 : index
    %96 = vector.load %arg10[%c0_47, %c0_48] : memref<2x128xf32, #tpu.memory_space<vmem>>, vector<2x128xf32>
    %97 = arith.mulf %87, %96 : vector<2x128xf32>
    %98 = arith.mulf %81, %89 : vector<2x128xf32>
    %99 = arith.addf %97, %98 : vector<2x128xf32>
    %100 = math.tanh %99 : vector<2x128xf32>
    %101 = arith.mulf %95, %100 : vector<2x128xf32>
    %c0_49 = arith.constant 0 : index
    %c0_50 = arith.constant 0 : index
    %102 = vector.load %arg10[%c0_49, %c0_50] : memref<2x128xf32, #tpu.memory_space<vmem>>, vector<2x128xf32>
    tpu.vector_store %arg10[%c0_49, %c0_50], %99 {strides = array<i32>} : memref<2x128xf32, #tpu.memory_space<vmem>>, vector<2x128xf32>,
    %c0_51 = arith.constant 0 : index
    %c0_52 = arith.constant 0 : index
    %103 = vector.load %arg9[%c0_51, %c0_52] : memref<2x128xf32, #tpu.memory_space<vmem>>, vector<2x128xf32>
    tpu.vector_store %arg9[%c0_51, %c0_52], %101 {strides = array<i32>} : memref<2x128xf32, #tpu.memory_space<vmem>>, vector<2x128xf32>,
    %104 = arith.truncf %101 : vector<2x128xf32> to vector<2x128xbf16>
    %c0_53 = arith.constant 0 : index
    %105 = arith.index_cast %59 : i32 to index
    %c0_54 = arith.constant 0 : index
    %c0_55 = arith.constant 0 : index
    %106 = vector.load %arg7[%c0_53, %105, %c0_54, %c0_55] : memref<1x8x2x128xbf16, #tpu.memory_space<vmem>>, vector<1x1x2x128xbf16>
    %107 = vector.shape_cast %106 : vector<1x1x2x128xbf16> to vector<2x128xbf16>
    %108 = vector.shape_cast %104 : vector<2x128xbf16> to vector<1x1x2x128xbf16>
    tpu.vector_store %arg7[%c0_53, %105, %c0_54, %c0_55], %108 {strides = array<i32>} : memref<1x8x2x128xbf16, #tpu.memory_space<vmem>>, vector<1x1x2x128xbf16>,
    %c2_i32_56 = arith.constant 2 : i32
    %c2_i32_57 = arith.constant 2 : i32
    %109 = arith.muli %c2_i32_57, %c2_i32_56 : i32
    %c7_i32_58 = arith.constant 7 : i32
    %110 = arith.subi %c7_i32_58, %109 : i32
    %111 = arith.muli %arg0, %110 : i32
    %112 = arith.addi %c2_i32_56, %111 : i32
    %113 = arith.index_cast %112 : i32 to index
    %c0_59 = arith.constant 0 : index
    %c0_60 = arith.constant 0 : index
    %114 = vector.load %arg3[%113, %c0_59, %c0_60] : memref<8x2x128xbf16, #tpu.memory_space<vmem>>, vector<1x2x128xbf16>
    %115 = vector.shape_cast %114 : vector<1x2x128xbf16> to vector<2x128xbf16>
    %c0_61 = arith.constant 0 : index
    %c0_62 = arith.constant 0 : index
    %116 = vector.load %arg9[%c0_61, %c0_62] : memref<2x128xf32, #tpu.memory_space<vmem>>, vector<2x128xf32>
    %c0_63 = arith.constant 0 : index
    %c0_64 = arith.constant 0 : index
    %c0_65 = arith.constant 0 : index
    %117 = vector.load %arg4[%c0_63, %c0_64, %c0_65] : memref<1x128x512xbf16, #tpu.memory_space<vmem>>, vector<1x128x512xbf16>
    %118 = vector.shape_cast %117 : vector<1x128x512xbf16> to vector<128x512xbf16>
    %cst_66 = arith.constant dense<0.000000e+00> : vector<2x512xf32>
    %119 = tpu.matmul %115, %118, %cst_66 {dimension_numbers = #tpu.dot_dimension_numbers<[1], [0], [0], [1], [0, 0, 1, 1], [], []>} : vector<2x128xbf16>, vector<128x512xbf16>, vector<2x512xf32> -> vector<2x512xf32>
    %120 = arith.truncf %116 : vector<2x128xf32> to vector<2x128xbf16>
    %c0_67 = arith.constant 0 : index
    %c0_68 = arith.constant 0 : index
    %c0_69 = arith.constant 0 : index
    %121 = vector.load %arg5[%c0_67, %c0_68, %c0_69] : memref<1x128x512xbf16, #tpu.memory_space<vmem>>, vector<1x128x512xbf16>
    %122 = vector.shape_cast %121 : vector<1x128x512xbf16> to vector<128x512xbf16>
    %cst_70 = arith.constant dense<0.000000e+00> : vector<2x512xf32>
    %123 = tpu.matmul %120, %122, %cst_70 {dimension_numbers = #tpu.dot_dimension_numbers<[1], [0], [0], [1], [0, 0, 1, 1], [], []>} : vector<2x128xbf16>, vector<128x512xbf16>, vector<2x512xf32> -> vector<2x512xf32>
    %124 = arith.addf %119, %123 : vector<2x512xf32>
    %c0_71 = arith.constant 0 : index
    %c0_72 = arith.constant 0 : index
    %c0_73 = arith.constant 0 : index
    %125 = vector.load %arg6[%c0_71, %c0_72, %c0_73] : memref<1x1x512xf32, #tpu.memory_space<vmem>>, vector<1x1x512xf32>
    %126 = vector.shape_cast %125 : vector<1x1x512xf32> to vector<1x512xf32>
    %127 = vector.broadcast %126 : vector<1x512xf32> to vector<2x512xf32>
    %128 = arith.addf %124, %127 : vector<2x512xf32>
    %129 = vector.extract_strided_slice %128 {offsets = [0, 0], sizes = [2, 128], strides = [1, 1]} : vector<2x512xf32> to vector<2x128xf32>
    %130 = arith.negf %129 : vector<2x128xf32>
    %131 = math.exp %130 : vector<2x128xf32>
    %cst_74 = arith.constant 1.000000e+00 : f32
    %132 = vector.broadcast %cst_74 : f32 to vector<2x128xf32>
    %133 = arith.addf %132, %131 : vector<2x128xf32>
    %134 = arith.divf %132, %133 : vector<2x128xf32>
    %135 = vector.extract_strided_slice %128 {offsets = [0, 128], sizes = [2, 128], strides = [1, 1]} : vector<2x512xf32> to vector<2x128xf32>
    %136 = arith.negf %135 : vector<2x128xf32>
    %137 = math.exp %136 : vector<2x128xf32>
    %cst_75 = arith.constant 1.000000e+00 : f32
    %138 = vector.broadcast %cst_75 : f32 to vector<2x128xf32>
    %139 = arith.addf %138, %137 : vector<2x128xf32>
    %140 = arith.divf %138, %139 : vector<2x128xf32>
    %141 = vector.extract_strided_slice %128 {offsets = [0, 256], sizes = [2, 128], strides = [1, 1]} : vector<2x512xf32> to vector<2x128xf32>
    %142 = math.tanh %141 : vector<2x128xf32>
    %143 = vector.extract_strided_slice %128 {offsets = [0, 384], sizes = [2, 128], strides = [1, 1]} : vector<2x512xf32> to vector<2x128xf32>
    %144 = arith.negf %143 : vector<2x128xf32>
    %145 = math.exp %144 : vector<2x128xf32>
    %cst_76 = arith.constant 1.000000e+00 : f32
    %146 = vector.broadcast %cst_76 : f32 to vector<2x128xf32>
    %147 = arith.addf %146, %145 : vector<2x128xf32>
    %148 = arith.divf %146, %147 : vector<2x128xf32>
    %c0_77 = arith.constant 0 : index
    %c0_78 = arith.constant 0 : index
    %149 = vector.load %arg10[%c0_77, %c0_78] : memref<2x128xf32, #tpu.memory_space<vmem>>, vector<2x128xf32>
    %150 = arith.mulf %140, %149 : vector<2x128xf32>
    %151 = arith.mulf %134, %142 : vector<2x128xf32>
    %152 = arith.addf %150, %151 : vector<2x128xf32>
    %153 = math.tanh %152 : vector<2x128xf32>
    %154 = arith.mulf %148, %153 : vector<2x128xf32>
    %c0_79 = arith.constant 0 : index
    %c0_80 = arith.constant 0 : index
    %155 = vector.load %arg10[%c0_79, %c0_80] : memref<2x128xf32, #tpu.memory_space<vmem>>, vector<2x128xf32>
    tpu.vector_store %arg10[%c0_79, %c0_80], %152 {strides = array<i32>} : memref<2x128xf32, #tpu.memory_space<vmem>>, vector<2x128xf32>,
    %c0_81 = arith.constant 0 : index
    %c0_82 = arith.constant 0 : index
    %156 = vector.load %arg9[%c0_81, %c0_82] : memref<2x128xf32, #tpu.memory_space<vmem>>, vector<2x128xf32>
    tpu.vector_store %arg9[%c0_81, %c0_82], %154 {strides = array<i32>} : memref<2x128xf32, #tpu.memory_space<vmem>>, vector<2x128xf32>,
    %157 = arith.truncf %154 : vector<2x128xf32> to vector<2x128xbf16>
    %c0_83 = arith.constant 0 : index
    %158 = arith.index_cast %112 : i32 to index
    %c0_84 = arith.constant 0 : index
    %c0_85 = arith.constant 0 : index
    %159 = vector.load %arg7[%c0_83, %158, %c0_84, %c0_85] : memref<1x8x2x128xbf16, #tpu.memory_space<vmem>>, vector<1x1x2x128xbf16>
    %160 = vector.shape_cast %159 : vector<1x1x2x128xbf16> to vector<2x128xbf16>
    %161 = vector.shape_cast %157 : vector<2x128xbf16> to vector<1x1x2x128xbf16>
    tpu.vector_store %arg7[%c0_83, %158, %c0_84, %c0_85], %161 {strides = array<i32>} : memref<1x8x2x128xbf16, #tpu.memory_space<vmem>>, vector<1x1x2x128xbf16>,
    %c3_i32 = arith.constant 3 : i32
    %c2_i32_86 = arith.constant 2 : i32
    %162 = arith.muli %c2_i32_86, %c3_i32 : i32
    %c7_i32_87 = arith.constant 7 : i32
    %163 = arith.subi %c7_i32_87, %162 : i32
    %164 = arith.muli %arg0, %163 : i32
    %165 = arith.addi %c3_i32, %164 : i32
    %166 = arith.index_cast %165 : i32 to index
    %c0_88 = arith.constant 0 : index
    %c0_89 = arith.constant 0 : index
    %167 = vector.load %arg3[%166, %c0_88, %c0_89] : memref<8x2x128xbf16, #tpu.memory_space<vmem>>, vector<1x2x128xbf16>
    %168 = vector.shape_cast %167 : vector<1x2x128xbf16> to vector<2x128xbf16>
    %c0_90 = arith.constant 0 : index
    %c0_91 = arith.constant 0 : index
    %169 = vector.load %arg9[%c0_90, %c0_91] : memref<2x128xf32, #tpu.memory_space<vmem>>, vector<2x128xf32>
    %c0_92 = arith.constant 0 : index
    %c0_93 = arith.constant 0 : index
    %c0_94 = arith.constant 0 : index
    %170 = vector.load %arg4[%c0_92, %c0_93, %c0_94] : memref<1x128x512xbf16, #tpu.memory_space<vmem>>, vector<1x128x512xbf16>
    %171 = vector.shape_cast %170 : vector<1x128x512xbf16> to vector<128x512xbf16>
    %cst_95 = arith.constant dense<0.000000e+00> : vector<2x512xf32>
    %172 = tpu.matmul %168, %171, %cst_95 {dimension_numbers = #tpu.dot_dimension_numbers<[1], [0], [0], [1], [0, 0, 1, 1], [], []>} : vector<2x128xbf16>, vector<128x512xbf16>, vector<2x512xf32> -> vector<2x512xf32>
    %173 = arith.truncf %169 : vector<2x128xf32> to vector<2x128xbf16>
    %c0_96 = arith.constant 0 : index
    %c0_97 = arith.constant 0 : index
    %c0_98 = arith.constant 0 : index
    %174 = vector.load %arg5[%c0_96, %c0_97, %c0_98] : memref<1x128x512xbf16, #tpu.memory_space<vmem>>, vector<1x128x512xbf16>
    %175 = vector.shape_cast %174 : vector<1x128x512xbf16> to vector<128x512xbf16>
    %cst_99 = arith.constant dense<0.000000e+00> : vector<2x512xf32>
    %176 = tpu.matmul %173, %175, %cst_99 {dimension_numbers = #tpu.dot_dimension_numbers<[1], [0], [0], [1], [0, 0, 1, 1], [], []>} : vector<2x128xbf16>, vector<128x512xbf16>, vector<2x512xf32> -> vector<2x512xf32>
    %177 = arith.addf %172, %176 : vector<2x512xf32>
    %c0_100 = arith.constant 0 : index
    %c0_101 = arith.constant 0 : index
    %c0_102 = arith.constant 0 : index
    %178 = vector.load %arg6[%c0_100, %c0_101, %c0_102] : memref<1x1x512xf32, #tpu.memory_space<vmem>>, vector<1x1x512xf32>
    %179 = vector.shape_cast %178 : vector<1x1x512xf32> to vector<1x512xf32>
    %180 = vector.broadcast %179 : vector<1x512xf32> to vector<2x512xf32>
    %181 = arith.addf %177, %180 : vector<2x512xf32>
    %182 = vector.extract_strided_slice %181 {offsets = [0, 0], sizes = [2, 128], strides = [1, 1]} : vector<2x512xf32> to vector<2x128xf32>
    %183 = arith.negf %182 : vector<2x128xf32>
    %184 = math.exp %183 : vector<2x128xf32>
    %cst_103 = arith.constant 1.000000e+00 : f32
    %185 = vector.broadcast %cst_103 : f32 to vector<2x128xf32>
    %186 = arith.addf %185, %184 : vector<2x128xf32>
    %187 = arith.divf %185, %186 : vector<2x128xf32>
    %188 = vector.extract_strided_slice %181 {offsets = [0, 128], sizes = [2, 128], strides = [1, 1]} : vector<2x512xf32> to vector<2x128xf32>
    %189 = arith.negf %188 : vector<2x128xf32>
    %190 = math.exp %189 : vector<2x128xf32>
    %cst_104 = arith.constant 1.000000e+00 : f32
    %191 = vector.broadcast %cst_104 : f32 to vector<2x128xf32>
    %192 = arith.addf %191, %190 : vector<2x128xf32>
    %193 = arith.divf %191, %192 : vector<2x128xf32>
    %194 = vector.extract_strided_slice %181 {offsets = [0, 256], sizes = [2, 128], strides = [1, 1]} : vector<2x512xf32> to vector<2x128xf32>
    %195 = math.tanh %194 : vector<2x128xf32>
    %196 = vector.extract_strided_slice %181 {offsets = [0, 384], sizes = [2, 128], strides = [1, 1]} : vector<2x512xf32> to vector<2x128xf32>
    %197 = arith.negf %196 : vector<2x128xf32>
    %198 = math.exp %197 : vector<2x128xf32>
    %cst_105 = arith.constant 1.000000e+00 : f32
    %199 = vector.broadcast %cst_105 : f32 to vector<2x128xf32>
    %200 = arith.addf %199, %198 : vector<2x128xf32>
    %201 = arith.divf %199, %200 : vector<2x128xf32>
    %c0_106 = arith.constant 0 : index
    %c0_107 = arith.constant 0 : index
    %202 = vector.load %arg10[%c0_106, %c0_107] : memref<2x128xf32, #tpu.memory_space<vmem>>, vector<2x128xf32>
    %203 = arith.mulf %193, %202 : vector<2x128xf32>
    %204 = arith.mulf %187, %195 : vector<2x128xf32>
    %205 = arith.addf %203, %204 : vector<2x128xf32>
    %206 = math.tanh %205 : vector<2x128xf32>
    %207 = arith.mulf %201, %206 : vector<2x128xf32>
    %c0_108 = arith.constant 0 : index
    %c0_109 = arith.constant 0 : index
    %208 = vector.load %arg10[%c0_108, %c0_109] : memref<2x128xf32, #tpu.memory_space<vmem>>, vector<2x128xf32>
    tpu.vector_store %arg10[%c0_108, %c0_109], %205 {strides = array<i32>} : memref<2x128xf32, #tpu.memory_space<vmem>>, vector<2x128xf32>,
    %c0_110 = arith.constant 0 : index
    %c0_111 = arith.constant 0 : index
    %209 = vector.load %arg9[%c0_110, %c0_111] : memref<2x128xf32, #tpu.memory_space<vmem>>, vector<2x128xf32>
    tpu.vector_store %arg9[%c0_110, %c0_111], %207 {strides = array<i32>} : memref<2x128xf32, #tpu.memory_space<vmem>>, vector<2x128xf32>,
    %210 = arith.truncf %207 : vector<2x128xf32> to vector<2x128xbf16>
    %c0_112 = arith.constant 0 : index
    %211 = arith.index_cast %165 : i32 to index
    %c0_113 = arith.constant 0 : index
    %c0_114 = arith.constant 0 : index
    %212 = vector.load %arg7[%c0_112, %211, %c0_113, %c0_114] : memref<1x8x2x128xbf16, #tpu.memory_space<vmem>>, vector<1x1x2x128xbf16>
    %213 = vector.shape_cast %212 : vector<1x1x2x128xbf16> to vector<2x128xbf16>
    %214 = vector.shape_cast %210 : vector<2x128xbf16> to vector<1x1x2x128xbf16>
    tpu.vector_store %arg7[%c0_112, %211, %c0_113, %c0_114], %214 {strides = array<i32>} : memref<1x8x2x128xbf16, #tpu.memory_space<vmem>>, vector<1x1x2x128xbf16>,
    %c4_i32 = arith.constant 4 : i32
    %c2_i32_115 = arith.constant 2 : i32
    %215 = arith.muli %c2_i32_115, %c4_i32 : i32
    %c7_i32_116 = arith.constant 7 : i32
    %216 = arith.subi %c7_i32_116, %215 : i32
    %217 = arith.muli %arg0, %216 : i32
    %218 = arith.addi %c4_i32, %217 : i32
    %219 = arith.index_cast %218 : i32 to index
    %c0_117 = arith.constant 0 : index
    %c0_118 = arith.constant 0 : index
    %220 = vector.load %arg3[%219, %c0_117, %c0_118] : memref<8x2x128xbf16, #tpu.memory_space<vmem>>, vector<1x2x128xbf16>
    %221 = vector.shape_cast %220 : vector<1x2x128xbf16> to vector<2x128xbf16>
    %c0_119 = arith.constant 0 : index
    %c0_120 = arith.constant 0 : index
    %222 = vector.load %arg9[%c0_119, %c0_120] : memref<2x128xf32, #tpu.memory_space<vmem>>, vector<2x128xf32>
    %c0_121 = arith.constant 0 : index
    %c0_122 = arith.constant 0 : index
    %c0_123 = arith.constant 0 : index
    %223 = vector.load %arg4[%c0_121, %c0_122, %c0_123] : memref<1x128x512xbf16, #tpu.memory_space<vmem>>, vector<1x128x512xbf16>
    %224 = vector.shape_cast %223 : vector<1x128x512xbf16> to vector<128x512xbf16>
    %cst_124 = arith.constant dense<0.000000e+00> : vector<2x512xf32>
    %225 = tpu.matmul %221, %224, %cst_124 {dimension_numbers = #tpu.dot_dimension_numbers<[1], [0], [0], [1], [0, 0, 1, 1], [], []>} : vector<2x128xbf16>, vector<128x512xbf16>, vector<2x512xf32> -> vector<2x512xf32>
    %226 = arith.truncf %222 : vector<2x128xf32> to vector<2x128xbf16>
    %c0_125 = arith.constant 0 : index
    %c0_126 = arith.constant 0 : index
    %c0_127 = arith.constant 0 : index
    %227 = vector.load %arg5[%c0_125, %c0_126, %c0_127] : memref<1x128x512xbf16, #tpu.memory_space<vmem>>, vector<1x128x512xbf16>
    %228 = vector.shape_cast %227 : vector<1x128x512xbf16> to vector<128x512xbf16>
    %cst_128 = arith.constant dense<0.000000e+00> : vector<2x512xf32>
    %229 = tpu.matmul %226, %228, %cst_128 {dimension_numbers = #tpu.dot_dimension_numbers<[1], [0], [0], [1], [0, 0, 1, 1], [], []>} : vector<2x128xbf16>, vector<128x512xbf16>, vector<2x512xf32> -> vector<2x512xf32>
    %230 = arith.addf %225, %229 : vector<2x512xf32>
    %c0_129 = arith.constant 0 : index
    %c0_130 = arith.constant 0 : index
    %c0_131 = arith.constant 0 : index
    %231 = vector.load %arg6[%c0_129, %c0_130, %c0_131] : memref<1x1x512xf32, #tpu.memory_space<vmem>>, vector<1x1x512xf32>
    %232 = vector.shape_cast %231 : vector<1x1x512xf32> to vector<1x512xf32>
    %233 = vector.broadcast %232 : vector<1x512xf32> to vector<2x512xf32>
    %234 = arith.addf %230, %233 : vector<2x512xf32>
    %235 = vector.extract_strided_slice %234 {offsets = [0, 0], sizes = [2, 128], strides = [1, 1]} : vector<2x512xf32> to vector<2x128xf32>
    %236 = arith.negf %235 : vector<2x128xf32>
    %237 = math.exp %236 : vector<2x128xf32>
    %cst_132 = arith.constant 1.000000e+00 : f32
    %238 = vector.broadcast %cst_132 : f32 to vector<2x128xf32>
    %239 = arith.addf %238, %237 : vector<2x128xf32>
    %240 = arith.divf %238, %239 : vector<2x128xf32>
    %241 = vector.extract_strided_slice %234 {offsets = [0, 128], sizes = [2, 128], strides = [1, 1]} : vector<2x512xf32> to vector<2x128xf32>
    %242 = arith.negf %241 : vector<2x128xf32>
    %243 = math.exp %242 : vector<2x128xf32>
    %cst_133 = arith.constant 1.000000e+00 : f32
    %244 = vector.broadcast %cst_133 : f32 to vector<2x128xf32>
    %245 = arith.addf %244, %243 : vector<2x128xf32>
    %246 = arith.divf %244, %245 : vector<2x128xf32>
    %247 = vector.extract_strided_slice %234 {offsets = [0, 256], sizes = [2, 128], strides = [1, 1]} : vector<2x512xf32> to vector<2x128xf32>
    %248 = math.tanh %247 : vector<2x128xf32>
    %249 = vector.extract_strided_slice %234 {offsets = [0, 384], sizes = [2, 128], strides = [1, 1]} : vector<2x512xf32> to vector<2x128xf32>
    %250 = arith.negf %249 : vector<2x128xf32>
    %251 = math.exp %250 : vector<2x128xf32>
    %cst_134 = arith.constant 1.000000e+00 : f32
    %252 = vector.broadcast %cst_134 : f32 to vector<2x128xf32>
    %253 = arith.addf %252, %251 : vector<2x128xf32>
    %254 = arith.divf %252, %253 : vector<2x128xf32>
    %c0_135 = arith.constant 0 : index
    %c0_136 = arith.constant 0 : index
    %255 = vector.load %arg10[%c0_135, %c0_136] : memref<2x128xf32, #tpu.memory_space<vmem>>, vector<2x128xf32>
    %256 = arith.mulf %246, %255 : vector<2x128xf32>
    %257 = arith.mulf %240, %248 : vector<2x128xf32>
    %258 = arith.addf %256, %257 : vector<2x128xf32>
    %259 = math.tanh %258 : vector<2x128xf32>
    %260 = arith.mulf %254, %259 : vector<2x128xf32>
    %c0_137 = arith.constant 0 : index
    %c0_138 = arith.constant 0 : index
    %261 = vector.load %arg10[%c0_137, %c0_138] : memref<2x128xf32, #tpu.memory_space<vmem>>, vector<2x128xf32>
    tpu.vector_store %arg10[%c0_137, %c0_138], %258 {strides = array<i32>} : memref<2x128xf32, #tpu.memory_space<vmem>>, vector<2x128xf32>,
    %c0_139 = arith.constant 0 : index
    %c0_140 = arith.constant 0 : index
    %262 = vector.load %arg9[%c0_139, %c0_140] : memref<2x128xf32, #tpu.memory_space<vmem>>, vector<2x128xf32>
    tpu.vector_store %arg9[%c0_139, %c0_140], %260 {strides = array<i32>} : memref<2x128xf32, #tpu.memory_space<vmem>>, vector<2x128xf32>,
    %263 = arith.truncf %260 : vector<2x128xf32> to vector<2x128xbf16>
    %c0_141 = arith.constant 0 : index
    %264 = arith.index_cast %218 : i32 to index
    %c0_142 = arith.constant 0 : index
    %c0_143 = arith.constant 0 : index
    %265 = vector.load %arg7[%c0_141, %264, %c0_142, %c0_143] : memref<1x8x2x128xbf16, #tpu.memory_space<vmem>>, vector<1x1x2x128xbf16>
    %266 = vector.shape_cast %265 : vector<1x1x2x128xbf16> to vector<2x128xbf16>
    %267 = vector.shape_cast %263 : vector<2x128xbf16> to vector<1x1x2x128xbf16>
    tpu.vector_store %arg7[%c0_141, %264, %c0_142, %c0_143], %267 {strides = array<i32>} : memref<1x8x2x128xbf16, #tpu.memory_space<vmem>>, vector<1x1x2x128xbf16>,
    %c5_i32 = arith.constant 5 : i32
    %c2_i32_144 = arith.constant 2 : i32
    %268 = arith.muli %c2_i32_144, %c5_i32 : i32
    %c7_i32_145 = arith.constant 7 : i32
    %269 = arith.subi %c7_i32_145, %268 : i32
    %270 = arith.muli %arg0, %269 : i32
    %271 = arith.addi %c5_i32, %270 : i32
    %272 = arith.index_cast %271 : i32 to index
    %c0_146 = arith.constant 0 : index
    %c0_147 = arith.constant 0 : index
    %273 = vector.load %arg3[%272, %c0_146, %c0_147] : memref<8x2x128xbf16, #tpu.memory_space<vmem>>, vector<1x2x128xbf16>
    %274 = vector.shape_cast %273 : vector<1x2x128xbf16> to vector<2x128xbf16>
    %c0_148 = arith.constant 0 : index
    %c0_149 = arith.constant 0 : index
    %275 = vector.load %arg9[%c0_148, %c0_149] : memref<2x128xf32, #tpu.memory_space<vmem>>, vector<2x128xf32>
    %c0_150 = arith.constant 0 : index
    %c0_151 = arith.constant 0 : index
    %c0_152 = arith.constant 0 : index
    %276 = vector.load %arg4[%c0_150, %c0_151, %c0_152] : memref<1x128x512xbf16, #tpu.memory_space<vmem>>, vector<1x128x512xbf16>
    %277 = vector.shape_cast %276 : vector<1x128x512xbf16> to vector<128x512xbf16>
    %cst_153 = arith.constant dense<0.000000e+00> : vector<2x512xf32>
    %278 = tpu.matmul %274, %277, %cst_153 {dimension_numbers = #tpu.dot_dimension_numbers<[1], [0], [0], [1], [0, 0, 1, 1], [], []>} : vector<2x128xbf16>, vector<128x512xbf16>, vector<2x512xf32> -> vector<2x512xf32>
    %279 = arith.truncf %275 : vector<2x128xf32> to vector<2x128xbf16>
    %c0_154 = arith.constant 0 : index
    %c0_155 = arith.constant 0 : index
    %c0_156 = arith.constant 0 : index
    %280 = vector.load %arg5[%c0_154, %c0_155, %c0_156] : memref<1x128x512xbf16, #tpu.memory_space<vmem>>, vector<1x128x512xbf16>
    %281 = vector.shape_cast %280 : vector<1x128x512xbf16> to vector<128x512xbf16>
    %cst_157 = arith.constant dense<0.000000e+00> : vector<2x512xf32>
    %282 = tpu.matmul %279, %281, %cst_157 {dimension_numbers = #tpu.dot_dimension_numbers<[1], [0], [0], [1], [0, 0, 1, 1], [], []>} : vector<2x128xbf16>, vector<128x512xbf16>, vector<2x512xf32> -> vector<2x512xf32>
    %283 = arith.addf %278, %282 : vector<2x512xf32>
    %c0_158 = arith.constant 0 : index
    %c0_159 = arith.constant 0 : index
    %c0_160 = arith.constant 0 : index
    %284 = vector.load %arg6[%c0_158, %c0_159, %c0_160] : memref<1x1x512xf32, #tpu.memory_space<vmem>>, vector<1x1x512xf32>
    %285 = vector.shape_cast %284 : vector<1x1x512xf32> to vector<1x512xf32>
    %286 = vector.broadcast %285 : vector<1x512xf32> to vector<2x512xf32>
    %287 = arith.addf %283, %286 : vector<2x512xf32>
    %288 = vector.extract_strided_slice %287 {offsets = [0, 0], sizes = [2, 128], strides = [1, 1]} : vector<2x512xf32> to vector<2x128xf32>
    %289 = arith.negf %288 : vector<2x128xf32>
    %290 = math.exp %289 : vector<2x128xf32>
    %cst_161 = arith.constant 1.000000e+00 : f32
    %291 = vector.broadcast %cst_161 : f32 to vector<2x128xf32>
    %292 = arith.addf %291, %290 : vector<2x128xf32>
    %293 = arith.divf %291, %292 : vector<2x128xf32>
    %294 = vector.extract_strided_slice %287 {offsets = [0, 128], sizes = [2, 128], strides = [1, 1]} : vector<2x512xf32> to vector<2x128xf32>
    %295 = arith.negf %294 : vector<2x128xf32>
    %296 = math.exp %295 : vector<2x128xf32>
    %cst_162 = arith.constant 1.000000e+00 : f32
    %297 = vector.broadcast %cst_162 : f32 to vector<2x128xf32>
    %298 = arith.addf %297, %296 : vector<2x128xf32>
    %299 = arith.divf %297, %298 : vector<2x128xf32>
    %300 = vector.extract_strided_slice %287 {offsets = [0, 256], sizes = [2, 128], strides = [1, 1]} : vector<2x512xf32> to vector<2x128xf32>
    %301 = math.tanh %300 : vector<2x128xf32>
    %302 = vector.extract_strided_slice %287 {offsets = [0, 384], sizes = [2, 128], strides = [1, 1]} : vector<2x512xf32> to vector<2x128xf32>
    %303 = arith.negf %302 : vector<2x128xf32>
    %304 = math.exp %303 : vector<2x128xf32>
    %cst_163 = arith.constant 1.000000e+00 : f32
    %305 = vector.broadcast %cst_163 : f32 to vector<2x128xf32>
    %306 = arith.addf %305, %304 : vector<2x128xf32>
    %307 = arith.divf %305, %306 : vector<2x128xf32>
    %c0_164 = arith.constant 0 : index
    %c0_165 = arith.constant 0 : index
    %308 = vector.load %arg10[%c0_164, %c0_165] : memref<2x128xf32, #tpu.memory_space<vmem>>, vector<2x128xf32>
    %309 = arith.mulf %299, %308 : vector<2x128xf32>
    %310 = arith.mulf %293, %301 : vector<2x128xf32>
    %311 = arith.addf %309, %310 : vector<2x128xf32>
    %312 = math.tanh %311 : vector<2x128xf32>
    %313 = arith.mulf %307, %312 : vector<2x128xf32>
    %c0_166 = arith.constant 0 : index
    %c0_167 = arith.constant 0 : index
    %314 = vector.load %arg10[%c0_166, %c0_167] : memref<2x128xf32, #tpu.memory_space<vmem>>, vector<2x128xf32>
    tpu.vector_store %arg10[%c0_166, %c0_167], %311 {strides = array<i32>} : memref<2x128xf32, #tpu.memory_space<vmem>>, vector<2x128xf32>,
    %c0_168 = arith.constant 0 : index
    %c0_169 = arith.constant 0 : index
    %315 = vector.load %arg9[%c0_168, %c0_169] : memref<2x128xf32, #tpu.memory_space<vmem>>, vector<2x128xf32>
    tpu.vector_store %arg9[%c0_168, %c0_169], %313 {strides = array<i32>} : memref<2x128xf32, #tpu.memory_space<vmem>>, vector<2x128xf32>,
    %316 = arith.truncf %313 : vector<2x128xf32> to vector<2x128xbf16>
    %c0_170 = arith.constant 0 : index
    %317 = arith.index_cast %271 : i32 to index
    %c0_171 = arith.constant 0 : index
    %c0_172 = arith.constant 0 : index
    %318 = vector.load %arg7[%c0_170, %317, %c0_171, %c0_172] : memref<1x8x2x128xbf16, #tpu.memory_space<vmem>>, vector<1x1x2x128xbf16>
    %319 = vector.shape_cast %318 : vector<1x1x2x128xbf16> to vector<2x128xbf16>
    %320 = vector.shape_cast %316 : vector<2x128xbf16> to vector<1x1x2x128xbf16>
    tpu.vector_store %arg7[%c0_170, %317, %c0_171, %c0_172], %320 {strides = array<i32>} : memref<1x8x2x128xbf16, #tpu.memory_space<vmem>>, vector<1x1x2x128xbf16>,
    %c6_i32 = arith.constant 6 : i32
    %c2_i32_173 = arith.constant 2 : i32
    %321 = arith.muli %c2_i32_173, %c6_i32 : i32
    %c7_i32_174 = arith.constant 7 : i32
    %322 = arith.subi %c7_i32_174, %321 : i32
    %323 = arith.muli %arg0, %322 : i32
    %324 = arith.addi %c6_i32, %323 : i32
    %325 = arith.index_cast %324 : i32 to index
    %c0_175 = arith.constant 0 : index
    %c0_176 = arith.constant 0 : index
    %326 = vector.load %arg3[%325, %c0_175, %c0_176] : memref<8x2x128xbf16, #tpu.memory_space<vmem>>, vector<1x2x128xbf16>
    %327 = vector.shape_cast %326 : vector<1x2x128xbf16> to vector<2x128xbf16>
    %c0_177 = arith.constant 0 : index
    %c0_178 = arith.constant 0 : index
    %328 = vector.load %arg9[%c0_177, %c0_178] : memref<2x128xf32, #tpu.memory_space<vmem>>, vector<2x128xf32>
    %c0_179 = arith.constant 0 : index
    %c0_180 = arith.constant 0 : index
    %c0_181 = arith.constant 0 : index
    %329 = vector.load %arg4[%c0_179, %c0_180, %c0_181] : memref<1x128x512xbf16, #tpu.memory_space<vmem>>, vector<1x128x512xbf16>
    %330 = vector.shape_cast %329 : vector<1x128x512xbf16> to vector<128x512xbf16>
    %cst_182 = arith.constant dense<0.000000e+00> : vector<2x512xf32>
    %331 = tpu.matmul %327, %330, %cst_182 {dimension_numbers = #tpu.dot_dimension_numbers<[1], [0], [0], [1], [0, 0, 1, 1], [], []>} : vector<2x128xbf16>, vector<128x512xbf16>, vector<2x512xf32> -> vector<2x512xf32>
    %332 = arith.truncf %328 : vector<2x128xf32> to vector<2x128xbf16>
    %c0_183 = arith.constant 0 : index
    %c0_184 = arith.constant 0 : index
    %c0_185 = arith.constant 0 : index
    %333 = vector.load %arg5[%c0_183, %c0_184, %c0_185] : memref<1x128x512xbf16, #tpu.memory_space<vmem>>, vector<1x128x512xbf16>
    %334 = vector.shape_cast %333 : vector<1x128x512xbf16> to vector<128x512xbf16>
    %cst_186 = arith.constant dense<0.000000e+00> : vector<2x512xf32>
    %335 = tpu.matmul %332, %334, %cst_186 {dimension_numbers = #tpu.dot_dimension_numbers<[1], [0], [0], [1], [0, 0, 1, 1], [], []>} : vector<2x128xbf16>, vector<128x512xbf16>, vector<2x512xf32> -> vector<2x512xf32>
    %336 = arith.addf %331, %335 : vector<2x512xf32>
    %c0_187 = arith.constant 0 : index
    %c0_188 = arith.constant 0 : index
    %c0_189 = arith.constant 0 : index
    %337 = vector.load %arg6[%c0_187, %c0_188, %c0_189] : memref<1x1x512xf32, #tpu.memory_space<vmem>>, vector<1x1x512xf32>
    %338 = vector.shape_cast %337 : vector<1x1x512xf32> to vector<1x512xf32>
    %339 = vector.broadcast %338 : vector<1x512xf32> to vector<2x512xf32>
    %340 = arith.addf %336, %339 : vector<2x512xf32>
    %341 = vector.extract_strided_slice %340 {offsets = [0, 0], sizes = [2, 128], strides = [1, 1]} : vector<2x512xf32> to vector<2x128xf32>
    %342 = arith.negf %341 : vector<2x128xf32>
    %343 = math.exp %342 : vector<2x128xf32>
    %cst_190 = arith.constant 1.000000e+00 : f32
    %344 = vector.broadcast %cst_190 : f32 to vector<2x128xf32>
    %345 = arith.addf %344, %343 : vector<2x128xf32>
    %346 = arith.divf %344, %345 : vector<2x128xf32>
    %347 = vector.extract_strided_slice %340 {offsets = [0, 128], sizes = [2, 128], strides = [1, 1]} : vector<2x512xf32> to vector<2x128xf32>
    %348 = arith.negf %347 : vector<2x128xf32>
    %349 = math.exp %348 : vector<2x128xf32>
    %cst_191 = arith.constant 1.000000e+00 : f32
    %350 = vector.broadcast %cst_191 : f32 to vector<2x128xf32>
    %351 = arith.addf %350, %349 : vector<2x128xf32>
    %352 = arith.divf %350, %351 : vector<2x128xf32>
    %353 = vector.extract_strided_slice %340 {offsets = [0, 256], sizes = [2, 128], strides = [1, 1]} : vector<2x512xf32> to vector<2x128xf32>
    %354 = math.tanh %353 : vector<2x128xf32>
    %355 = vector.extract_strided_slice %340 {offsets = [0, 384], sizes = [2, 128], strides = [1, 1]} : vector<2x512xf32> to vector<2x128xf32>
    %356 = arith.negf %355 : vector<2x128xf32>
    %357 = math.exp %356 : vector<2x128xf32>
    %cst_192 = arith.constant 1.000000e+00 : f32
    %358 = vector.broadcast %cst_192 : f32 to vector<2x128xf32>
    %359 = arith.addf %358, %357 : vector<2x128xf32>
    %360 = arith.divf %358, %359 : vector<2x128xf32>
    %c0_193 = arith.constant 0 : index
    %c0_194 = arith.constant 0 : index
    %361 = vector.load %arg10[%c0_193, %c0_194] : memref<2x128xf32, #tpu.memory_space<vmem>>, vector<2x128xf32>
    %362 = arith.mulf %352, %361 : vector<2x128xf32>
    %363 = arith.mulf %346, %354 : vector<2x128xf32>
    %364 = arith.addf %362, %363 : vector<2x128xf32>
    %365 = math.tanh %364 : vector<2x128xf32>
    %366 = arith.mulf %360, %365 : vector<2x128xf32>
    %c0_195 = arith.constant 0 : index
    %c0_196 = arith.constant 0 : index
    %367 = vector.load %arg10[%c0_195, %c0_196] : memref<2x128xf32, #tpu.memory_space<vmem>>, vector<2x128xf32>
    tpu.vector_store %arg10[%c0_195, %c0_196], %364 {strides = array<i32>} : memref<2x128xf32, #tpu.memory_space<vmem>>, vector<2x128xf32>,
    %c0_197 = arith.constant 0 : index
    %c0_198 = arith.constant 0 : index
    %368 = vector.load %arg9[%c0_197, %c0_198] : memref<2x128xf32, #tpu.memory_space<vmem>>, vector<2x128xf32>
    tpu.vector_store %arg9[%c0_197, %c0_198], %366 {strides = array<i32>} : memref<2x128xf32, #tpu.memory_space<vmem>>, vector<2x128xf32>,
    %369 = arith.truncf %366 : vector<2x128xf32> to vector<2x128xbf16>
    %c0_199 = arith.constant 0 : index
    %370 = arith.index_cast %324 : i32 to index
    %c0_200 = arith.constant 0 : index
    %c0_201 = arith.constant 0 : index
    %371 = vector.load %arg7[%c0_199, %370, %c0_200, %c0_201] : memref<1x8x2x128xbf16, #tpu.memory_space<vmem>>, vector<1x1x2x128xbf16>
    %372 = vector.shape_cast %371 : vector<1x1x2x128xbf16> to vector<2x128xbf16>
    %373 = vector.shape_cast %369 : vector<2x128xbf16> to vector<1x1x2x128xbf16>
    tpu.vector_store %arg7[%c0_199, %370, %c0_200, %c0_201], %373 {strides = array<i32>} : memref<1x8x2x128xbf16, #tpu.memory_space<vmem>>, vector<1x1x2x128xbf16>,
    %c7_i32_202 = arith.constant 7 : i32
    %c2_i32_203 = arith.constant 2 : i32
    %374 = arith.muli %c2_i32_203, %c7_i32_202 : i32
    %c7_i32_204 = arith.constant 7 : i32
    %375 = arith.subi %c7_i32_204, %374 : i32
    %376 = arith.muli %arg0, %375 : i32
    %377 = arith.addi %c7_i32_202, %376 : i32
    %378 = arith.index_cast %377 : i32 to index
    %c0_205 = arith.constant 0 : index
    %c0_206 = arith.constant 0 : index
    %379 = vector.load %arg3[%378, %c0_205, %c0_206] : memref<8x2x128xbf16, #tpu.memory_space<vmem>>, vector<1x2x128xbf16>
    %380 = vector.shape_cast %379 : vector<1x2x128xbf16> to vector<2x128xbf16>
    %c0_207 = arith.constant 0 : index
    %c0_208 = arith.constant 0 : index
    %381 = vector.load %arg9[%c0_207, %c0_208] : memref<2x128xf32, #tpu.memory_space<vmem>>, vector<2x128xf32>
    %c0_209 = arith.constant 0 : index
    %c0_210 = arith.constant 0 : index
    %c0_211 = arith.constant 0 : index
    %382 = vector.load %arg4[%c0_209, %c0_210, %c0_211] : memref<1x128x512xbf16, #tpu.memory_space<vmem>>, vector<1x128x512xbf16>
    %383 = vector.shape_cast %382 : vector<1x128x512xbf16> to vector<128x512xbf16>
    %cst_212 = arith.constant dense<0.000000e+00> : vector<2x512xf32>
    %384 = tpu.matmul %380, %383, %cst_212 {dimension_numbers = #tpu.dot_dimension_numbers<[1], [0], [0], [1], [0, 0, 1, 1], [], []>} : vector<2x128xbf16>, vector<128x512xbf16>, vector<2x512xf32> -> vector<2x512xf32>
    %385 = arith.truncf %381 : vector<2x128xf32> to vector<2x128xbf16>
    %c0_213 = arith.constant 0 : index
    %c0_214 = arith.constant 0 : index
    %c0_215 = arith.constant 0 : index
    %386 = vector.load %arg5[%c0_213, %c0_214, %c0_215] : memref<1x128x512xbf16, #tpu.memory_space<vmem>>, vector<1x128x512xbf16>
    %387 = vector.shape_cast %386 : vector<1x128x512xbf16> to vector<128x512xbf16>
    %cst_216 = arith.constant dense<0.000000e+00> : vector<2x512xf32>
    %388 = tpu.matmul %385, %387, %cst_216 {dimension_numbers = #tpu.dot_dimension_numbers<[1], [0], [0], [1], [0, 0, 1, 1], [], []>} : vector<2x128xbf16>, vector<128x512xbf16>, vector<2x512xf32> -> vector<2x512xf32>
    %389 = arith.addf %384, %388 : vector<2x512xf32>
    %c0_217 = arith.constant 0 : index
    %c0_218 = arith.constant 0 : index
    %c0_219 = arith.constant 0 : index
    %390 = vector.load %arg6[%c0_217, %c0_218, %c0_219] : memref<1x1x512xf32, #tpu.memory_space<vmem>>, vector<1x1x512xf32>
    %391 = vector.shape_cast %390 : vector<1x1x512xf32> to vector<1x512xf32>
    %392 = vector.broadcast %391 : vector<1x512xf32> to vector<2x512xf32>
    %393 = arith.addf %389, %392 : vector<2x512xf32>
    %394 = vector.extract_strided_slice %393 {offsets = [0, 0], sizes = [2, 128], strides = [1, 1]} : vector<2x512xf32> to vector<2x128xf32>
    %395 = arith.negf %394 : vector<2x128xf32>
    %396 = math.exp %395 : vector<2x128xf32>
    %cst_220 = arith.constant 1.000000e+00 : f32
    %397 = vector.broadcast %cst_220 : f32 to vector<2x128xf32>
    %398 = arith.addf %397, %396 : vector<2x128xf32>
    %399 = arith.divf %397, %398 : vector<2x128xf32>
    %400 = vector.extract_strided_slice %393 {offsets = [0, 128], sizes = [2, 128], strides = [1, 1]} : vector<2x512xf32> to vector<2x128xf32>
    %401 = arith.negf %400 : vector<2x128xf32>
    %402 = math.exp %401 : vector<2x128xf32>
    %cst_221 = arith.constant 1.000000e+00 : f32
    %403 = vector.broadcast %cst_221 : f32 to vector<2x128xf32>
    %404 = arith.addf %403, %402 : vector<2x128xf32>
    %405 = arith.divf %403, %404 : vector<2x128xf32>
    %406 = vector.extract_strided_slice %393 {offsets = [0, 256], sizes = [2, 128], strides = [1, 1]} : vector<2x512xf32> to vector<2x128xf32>
    %407 = math.tanh %406 : vector<2x128xf32>
    %408 = vector.extract_strided_slice %393 {offsets = [0, 384], sizes = [2, 128], strides = [1, 1]} : vector<2x512xf32> to vector<2x128xf32>
    %409 = arith.negf %408 : vector<2x128xf32>
    %410 = math.exp %409 : vector<2x128xf32>
    %cst_222 = arith.constant 1.000000e+00 : f32
    %411 = vector.broadcast %cst_222 : f32 to vector<2x128xf32>
    %412 = arith.addf %411, %410 : vector<2x128xf32>
    %413 = arith.divf %411, %412 : vector<2x128xf32>
    %c0_223 = arith.constant 0 : index
    %c0_224 = arith.constant 0 : index
    %414 = vector.load %arg10[%c0_223, %c0_224] : memref<2x128xf32, #tpu.memory_space<vmem>>, vector<2x128xf32>
    %415 = arith.mulf %405, %414 : vector<2x128xf32>
    %416 = arith.mulf %399, %407 : vector<2x128xf32>
    %417 = arith.addf %415, %416 : vector<2x128xf32>
    %418 = math.tanh %417 : vector<2x128xf32>
    %419 = arith.mulf %413, %418 : vector<2x128xf32>
    %c0_225 = arith.constant 0 : index
    %c0_226 = arith.constant 0 : index
    %420 = vector.load %arg10[%c0_225, %c0_226] : memref<2x128xf32, #tpu.memory_space<vmem>>, vector<2x128xf32>
    tpu.vector_store %arg10[%c0_225, %c0_226], %417 {strides = array<i32>} : memref<2x128xf32, #tpu.memory_space<vmem>>, vector<2x128xf32>,
    %c0_227 = arith.constant 0 : index
    %c0_228 = arith.constant 0 : index
    %421 = vector.load %arg9[%c0_227, %c0_228] : memref<2x128xf32, #tpu.memory_space<vmem>>, vector<2x128xf32>
    tpu.vector_store %arg9[%c0_227, %c0_228], %419 {strides = array<i32>} : memref<2x128xf32, #tpu.memory_space<vmem>>, vector<2x128xf32>,
    %422 = arith.truncf %419 : vector<2x128xf32> to vector<2x128xbf16>
    %c0_229 = arith.constant 0 : index
    %423 = arith.index_cast %377 : i32 to index
    %c0_230 = arith.constant 0 : index
    %c0_231 = arith.constant 0 : index
    %424 = vector.load %arg7[%c0_229, %423, %c0_230, %c0_231] : memref<1x8x2x128xbf16, #tpu.memory_space<vmem>>, vector<1x1x2x128xbf16>
    %425 = vector.shape_cast %424 : vector<1x1x2x128xbf16> to vector<2x128xbf16>
    %426 = vector.shape_cast %422 : vector<2x128xbf16> to vector<1x1x2x128xbf16>
    tpu.vector_store %arg7[%c0_229, %423, %c0_230, %c0_231], %426 {strides = array<i32>} : memref<1x8x2x128xbf16, #tpu.memory_space<vmem>>, vector<1x1x2x128xbf16>,
    %c8_i32 = arith.constant 8 : i32
    %c0_i32_232 = arith.constant 0 : i32
    %427 = arith.cmpi eq, %arg2, %c0_i32_232 : i32
    %428 = arith.extui %427 : i1 to i32
    %c0_i32_233 = arith.constant 0 : i32
    %429 = arith.cmpi ne, %428, %c0_i32_233 : i32
    scf.if %429 {
      %c0_234 = arith.constant 0 : index
      %c0_235 = arith.constant 0 : index
      %430 = vector.load %arg9[%c0_234, %c0_235] : memref<2x128xf32, #tpu.memory_space<vmem>>, vector<2x128xf32>
      %c0_236 = arith.constant 0 : index
      %c0_237 = arith.constant 0 : index
      %c0_238 = arith.constant 0 : index
      %431 = vector.load %arg8[%c0_236, %c0_237, %c0_238] : memref<1x2x128xf32, #tpu.memory_space<vmem>>, vector<1x2x128xf32>
      %432 = vector.shape_cast %431 : vector<1x2x128xf32> to vector<2x128xf32>
      %433 = vector.shape_cast %430 : vector<2x128xf32> to vector<1x2x128xf32>
      tpu.vector_store %arg8[%c0_236, %c0_237, %c0_238], %433 {strides = array<i32>} : memref<1x2x128xf32, #tpu.memory_space<vmem>>, vector<1x2x128xf32>,
    } else {
    }
    return
  }
  func.func @transform_0(%arg0: i32, %arg1: i32, %arg2: i32) -> (i32, i32, i32) {
    %c2_i32 = arith.constant 2 : i32
    %0 = arith.muli %c2_i32, %arg2 : i32
    %c0_i32 = arith.constant 0 : i32
    %1 = arith.subi %c0_i32, %0 : i32
    %2 = arith.muli %arg0, %1 : i32
    %3 = arith.addi %arg2, %2 : i32
    %c0_i32_0 = arith.constant 0 : i32
    %c0_i32_1 = arith.constant 0 : i32
    return %3, %arg1, %c0_i32_0 : i32, i32, i32
  }
  func.func @transform_1(%arg0: i32, %arg1: i32, %arg2: i32) -> (i32, i32, i32) {
    %c0_i32 = arith.constant 0 : i32
    %c0_i32_0 = arith.constant 0 : i32
    %c0_i32_1 = arith.constant 0 : i32
    return %arg0, %c0_i32, %c0_i32_0 : i32, i32, i32
  }
  func.func @transform_2(%arg0: i32, %arg1: i32, %arg2: i32) -> (i32, i32, i32) {
    %c0_i32 = arith.constant 0 : i32
    %c0_i32_0 = arith.constant 0 : i32
    %c0_i32_1 = arith.constant 0 : i32
    return %arg0, %c0_i32, %c0_i32_0 : i32, i32, i32
  }
  func.func @transform_3(%arg0: i32, %arg1: i32, %arg2: i32) -> (i32, i32, i32) {
    %c0_i32 = arith.constant 0 : i32
    %c0_i32_0 = arith.constant 0 : i32
    %c0_i32_1 = arith.constant 0 : i32
    return %arg0, %c0_i32, %c0_i32_0 : i32, i32, i32
  }
  func.func @transform_4(%arg0: i32, %arg1: i32, %arg2: i32) -> (i32, i32, i32, i32) {
    %c2_i32 = arith.constant 2 : i32
    %0 = arith.muli %c2_i32, %arg2 : i32
    %c0_i32 = arith.constant 0 : i32
    %1 = arith.subi %c0_i32, %0 : i32
    %2 = arith.muli %arg0, %1 : i32
    %3 = arith.addi %arg2, %2 : i32
    %c0_i32_0 = arith.constant 0 : i32
    %c0_i32_1 = arith.constant 0 : i32
    return %arg0, %3, %arg1, %c0_i32_0 : i32, i32, i32, i32
  }
  func.func @transform_5(%arg0: i32, %arg1: i32, %arg2: i32) -> (i32, i32, i32) {
    %c0_i32 = arith.constant 0 : i32
    %c0_i32_0 = arith.constant 0 : i32
    return %arg0, %arg1, %c0_i32 : i32, i32, i32
  }
}

</mosaic_0001>

<bundles_post_ra>
// kernel: tpu_custom_call.1
= control target key start
LH: loop header
LB: loop body
LE: loop exit
PB: predicated region body
PF: predicated region fallthrough
CT: control target
= control target key end

     0   :  { %s8731_s0 = inlined_call_operand.hbm [shape: bf16[8,2,128], index: 0, kind: input, shape index: {}]   ;;  %s8732_s1 = inlined_call_operand.hbm [shape: bf16[2,128,512], index: 1, kind: input, shape index: {}]   ;;  %s8733_s2 = inlined_call_operand.hbm [shape: bf16[2,128,512], index: 2, kind: input, shape index: {}]   ;;  %s8734_s3 = inlined_call_operand.hbm [shape: f32[2,1,512], index: 3, kind: input, shape index: {}]   ;;  %s8735_s4 = inlined_call_operand.hbm [shape: bf16[2,8,2,128], index: 4, kind: output, shape index: {0}]   ;;  %s8736_s5 = inlined_call_operand.hbm [shape: f32[2,2,128], index: 5, kind: output, shape index: {1}]  }
   0x1   :  { %8765 = sst [smem:[#allocation29_spill]] %s8731_s0 }
   0x2   :  { %8766 = sst [smem:[#allocation30_spill]] %s8732_s1 }
   0x3   :  { %8767 = sst [smem:[#allocation31_spill]] %s8733_s2 }
   0x4   :  { %11 = vsyncpa [#allocation5], 0 }
   0x5   :  { %13 = vsyncpa [#allocation5 + $0x1], 0 }
   0x6   :  { %14 = vsyncpa [#allocation8], 0 }
   0x7   :  { %16 = vsyncpa [#allocation8 + $0x1], 0 }
   0x8   :  { %17 = vsyncpa [#allocation11], 0 }
   0x9   :  { %19 = vsyncpa [#allocation11 + $0x1], 0 }
   0xa   :  { %20 = vsyncpa [#allocation6], 0 }
   0xb   :  { %22 = vsyncpa [#allocation6 + $0x1], 0 }
   0xc   :  { %23 = vsyncpa [#allocation14], 0 }
   0xd   :  { %25 = vsyncpa [#allocation14 + $0x1], 0  ;;  %s7046_s18 = smov 0   ;;  %s7048_s19 = smov 0  }
   0xe   :  { %s7050_s20 = smov 0   ;;  %s7052_s21 = smov 0  }
   0xf   :  { %s7054_s22 = smov 0   ;;  %s7056_s23 = smov 0  }
  0x10 LB: > { %8768 = sst [smem:[#allocation20_spill]] %s6989_s20  ;;  %s7077_s24 = sadd.s32 4294967295, %s7001_s23   ;;  %s7001_s23 = sphi %s7056_s23, %s31_s23   ;;  %s6997_s22 = sphi %s7054_s22, %s8833_s22   ;;  %s6993_s21 = sphi %s7052_s21, %s8832_s21   ;;  %s6989_s20 = sphi %s7050_s20, %s8828_s20   ;;  %s6985_s19 = sphi %s7048_s19, %s8831_s19   ;;  %s6981_s18 = sphi %s7046_s18, %s8830_s18  }
  0x11   : > { %s5588_s25 = sadd.s32 4294967294, %s7001_s23   ;;  %s50_s26 = sadd.s32 1, %s6997_s22 }
  0x12   : > { %s93_s27 = sadd.s32 1, %s6989_s20  ;;  %p52_p0 = scmp.ge.s32.totalorder %s50_s26, 2 }
  0x13   : > { %p100_p1 = scmp.ne.s32.totalorder %s6989_s20, %s6985_s19  ;;  %p101_p2 = scmp.eq.s32.totalorder %s7001_s23, 0 }
  0x14   : > { %p106_p3 = scmp.ne.s32.totalorder %s6985_s19, %s6981_s18  ;;  %s8835_s26 = smov (%p52_p0, %s50_s26), 0 }
  0x15   : > { %8769 = sst [smem:[#allocation21_spill]] %s8835_s26  ;;  %p7091_p4 = por %p101_p2, %p100_p1 }
  0x16   : > { %p8737_p5 = scmp.eq.s32.totalorder %s7077_s24, 0  ;;  %s90_s29 = ssub.s32 %s6997_s22, %s8835_s26 }
  0x17   : > { %p194_p6 = scmp.eq.s32.totalorder %s7077_s24, 1  ;;  %p91_p7 = scmp.eq.s32.totalorder %s90_s29, 0 }
  0x18   : > { %p7101_p8 = por %p8737_p5, %p106_p3  ;;  %p200_p10 = scmp.eq.s32.totalorder %s5588_s25, 1 }
  0x19   : > { %p7105_p9 = por %p194_p6, %p100_p1  ;;  %p6201_p13 = scmp.lt.s32.totalorder %s7001_s23, 2 }
  0x1a   : > { %s7110_s7 = scalar_select %p91_p7, %s6989_s20, %s93_s27  }
  0x1b   : > { %s8772_s6 = scalar_select %p7105_p9, 1, 0 }
  0x1c   : > { %8773 = sst [smem:[#allocation22_spill]] %s7110_s7  ;;  %p7112_p11 = por %p200_p10, %p106_p3 }
  0x1d   : > { %s274_s9 = sand.u32 1, %s7001_s23   ;;  %s7120_s10 = sand.u32 1, %s6989_s20  }
  0x1e   : > { %s8774_s8 = scalar_select %p7112_p11, 1, 0 }
  0x1f   : > { %s5592_s11 = sshll.u32 %s7120_s10, 8  ;;  %s6163_s12 = sshll.u32 %s6997_s22, 12 }
  0x20   : > { %s8775_s1 = sld [smem:[#allocation30_spill]]  ;;  %s278_s16 = scalar_lea.vmem [#allocation7], %s5592_s11 }
  0x21   : > { %s285_s17 = sshll.u32 %s278_s16, 4  ;;  %p7133_p0 = pnand %p6201_p13, %p7091_p4  ;;  %s286_s17 = int_to_ptr.vmem [resolvable:$true] %s285_s17 }
  0x22   : > { %s7137_s27 = scalar_lea.sflag [#allocation8], %s274_s9  ;;  %s6786_s29 = scalar_lea.vmem %s286_s17, 4096 }
  0x23   : > { %p8740_p1 = pneg %p7133_p0  ;;  %p6787_p3 = scmp.ne.s32.totalorder %s286_s17, %s6786_s29 }
  0x24   : > { %s7003_s13 = smov [#allocation7]  }
  0x25   : > { %p6789_p6 = pnand %p6787_p3, %p8740_p1  ;;  %s6791_s28 = sshll.u32 %s7003_s13, 4  ;;  %s6792_s28 = int_to_ptr.vmem [resolvable:$false] %s6791_s28 }
  0x26   : > { %s284_s15 = scalar_lea.hbm %s8775_s1, %s6163_s12  ;;  %s6793_s14 = scalar_lea.vmem %s6792_s28, 8192 }
  0x27   : > { %p6790_p7 = pneg %p6789_p6  ;;  %p6794_p4 = scmp.lt.s32.totalorder %s286_s17, %s6792_s28 }
  0x28   : > { %p6795_p10 = scmp.lt.s32.totalorder %s6793_s14, %s6786_s29 }
  0x2a   : > { %p6796_p12 = por %p6795_p10, %p6794_p4 }
  0x2c   : > { %p6797_p5 = pnand %p6796_p12, %p6790_p7 }
  0x2e   : > { %6800 = shalt.err (!%p6797_p5)
}
  0x2f   : > { %s7004_s16 = smov 256   ;;  %s7005_s9 = smov 16  }
  0x30   : > { %6187 = dma.hbm_to_vmem [thread:$0]  (!%p7133_p0), %s284_s15, 4096, %s286_s17, %s7137_s27, %s7004_s16, %s7004_s16, %s7005_s9  }
  0x31   : > { %s8777_s2 = sld [smem:[#allocation31_spill]]  ;;  %s299_s14 = scalar_lea.vmem [#allocation9], %s5592_s11 }
  0x32   : > { %s306_s1 = sshll.u32 %s299_s14, 4  ;;  %p5601_p5 = scmp.ge.s32.totalorder %s7001_s23, 1  ;;  %s7157_s1 = int_to_ptr.vmem [resolvable:$true] %s306_s1 }
  0x33   : > { %p333_p12 = scmp.lt.s32.totalorder %s7001_s23, 3  ;;  %s7006_s7 = smov [#allocation4]  }
  0x34   : > { %s264_s20 = sshll.u32 %s7006_s7, 4  ;;  %p7169_p6 = pnand %p6201_p13, %p101_p2  ;;  %s265_s20 = int_to_ptr.vmem [resolvable:$true] %s264_s20 }
  0x35   : > { %p7161_p3 = pnand %p5601_p5, %p333_p12  ;;  %s5598_s11 = sshll.u32 %s7120_s10, 2 }
  0x36   : > { %p6803_p7 = pneg %p7169_p6  ;;  %s6819_s17 = scalar_lea.vmem %s265_s20, 256 }
  0x37   : > { %s7153_s28 = scalar_lea.hbm %s8777_s2, %s6163_s12  ;;  %s6812_s12 = scalar_lea.vmem %s265_s20, 128 }
  0x38   : > { %p6813_p4 = scmp.ne.s32.totalorder %s265_s20, %s6812_s12  ;;  %p6820_p12 = scmp.lt.s32.totalorder %s265_s20, %s265_s20 }
  0x39   : > { %p6821_p1 = scmp.lt.s32.totalorder %s6819_s17, %s6812_s12 }
  0x3a   : > { %p6815_p10 = pnand %p6813_p4, %p6803_p7 }
  0x3b   : > { %p6822_p11 = por %p6821_p1, %p6820_p12 }
  0x3c   : > { %p6816_p5 = pneg %p6815_p10 }
  0x3e   : > { %p6823_p9 = pnand %p6822_p11, %p6816_p5 }
  0x40   : > { %6826 = shalt.err (!%p6823_p9)
}
  0x41   : > { %s7007_s7 = smov 1   ;;  %s8780_s0 = sld [smem:[#allocation29_spill]] }
  0x42   : > { %s6840_s14 = scalar_lea.vmem %s7157_s1, 4096  ;;  %p8781_p13 = pneg %p7133_p0 }
  0x43   : > { %p6841_p2 = scmp.ne.s32.totalorder %s7157_s1, %s6840_s14  ;;  %s7008_s12 = smov [#allocation9]  }
  0x44   : > { %s6845_s17 = sshll.u32 %s7008_s12, 4  ;;  %s6846_s17 = int_to_ptr.vmem [resolvable:$false] %s6845_s17 }
  0x45   : > { %p6843_p1 = pnand %p6841_p2, %p8781_p13  ;;  %s6847_s15 = scalar_lea.vmem %s6846_s17, 8192 }
  0x46   : > { %p6848_p9 = scmp.lt.s32.totalorder %s7157_s1, %s6846_s17  ;;  %p6849_p7 = scmp.lt.s32.totalorder %s6847_s15, %s6840_s14 }
  0x47   : > { %6184 = dma.hbm_to_vmem [thread:$0]  (!%p7169_p6), %s8780_s0, 128, %s265_s20, [#allocation5], %s7005_s9, %s7005_s9, %s7007_s7  }
  0x48   : > { %p6844_p11 = pneg %p6843_p1  ;;  %p6850_p4 = por %p6849_p7, %p6848_p9 }
  0x4a   : > { %p6851_p10 = pnand %p6850_p4, %p6844_p11 }
  0x4c   : > { %6854 = shalt.err (!%p6851_p10)
}
  0x4d   : > { %6190 = dma.hbm_to_vmem [thread:$0]  (!%p7133_p0), %s7153_s28, 4096, %s7157_s1, %s7137_s27, %s7004_s16, %s7004_s16, %s7005_s9  }
  0x4e   : > { %s6165_s20 = sshll.u32 %s6997_s22, 6  ;;  %s320_s14 = scalar_lea.vmem [#allocation10], %s5598_s11 }
  0x4f   : > { %s326_s29 = scalar_lea.hbm %s8734_s3, %s6165_s20  ;;  %s328_s12 = sshll.u32 %s320_s14, 4  ;;  %s329_s12 = int_to_ptr.vmem [resolvable:$true] %s328_s12 }
  0x50   : > { %s317_s17 = scalar_lea.sflag [#allocation11], %s7120_s10  ;;  %s6868_s15 = scalar_lea.vmem %s329_s12, 64 }
  0x51   : > { %p6869_p6 = scmp.ne.s32.totalorder %s329_s12, %s6868_s15  ;;  %p8782_p5 = pmov %p8781_p13 }
  0x52   : > { %s7009_s0 = smov [#allocation10]  }
  0x53   : > { %p6871_p12 = pnand %p6869_p6, %p8782_p5  ;;  %s6873_s2 = sshll.u32 %s7009_s0, 4  ;;  %s6874_s2 = int_to_ptr.vmem [resolvable:$false] %s6873_s2 }
  0x54   : > { %s6875_s1 = scalar_lea.vmem %s6874_s2, 128  ;;  %p6876_p13 = scmp.lt.s32.totalorder %s329_s12, %s6874_s2 }
  0x55   : > { %p6872_p2 = pneg %p6871_p12  ;;  %p6877_p1 = scmp.lt.s32.totalorder %s6875_s1, %s6868_s15 }
  0x57   : > { %p6878_p11 = por %p6877_p1, %p6876_p13 }
  0x59   : > { %p6879_p9 = pnand %p6878_p11, %p6872_p2 }
  0x5b   : > { %6882 = shalt.err (!%p6879_p9)
}
  0x5c   : > { %6193 = dma.hbm_to_vmem [thread:$0]  (!%p7133_p0), %s326_s29, 64, %s329_s12, %s317_s17  }
  0x5d   : > { %337 = sbr.rel (%p7161_p3) target bundleno = 2514 (0x9d2), region = 36 }
  0x62   : > { %p8783_p7 = scmp.eq.s32.totalorder %s7077_s24, 0 }
  0x64   : > { %6960 = dma.done.wait (%p8783_p7), [#allocation5], 128   ;;  %p8784_p4 = pmov %p8783_p7 }
  0x65   : > { %s348_s0 = sand.u32 1, %s7077_s24   ;;  %s7217_s2 = sand.u32 1, %s6985_s19  }
  0x66   : > { %6962 = vsyncadd (%p8784_p4), [#allocation5], 4294967168  ;;  %s5603_s10 = sshll.u32 %s7217_s2, 8  ;;  %s349_s27 = scalar_lea.sflag [#allocation8], %s348_s0 }
  0x67   : > { %s7220_s25 = scalar_lea.vmem [#allocation7], %s5603_s10 }
  0x68   : > { %6964 = dma.done.wait (%p7101_p8), %s349_s27, 8192  }
  0x69   : > { %6966 = vsyncadd (%p7101_p8), %s349_s27, 4294959104  ;;  %s5605_s26 = sshll.u32 %s7217_s2, 2  ;;  %s7227_s16 = scalar_lea.vmem [#allocation9], %s5603_s10 }
  0x6a   : > { %s367_s9 = scalar_lea.sflag [#allocation11], %s7217_s2  ;;  %s7230_s24 = scalar_lea.vmem [#allocation10], %s5605_s26 }
  0x6b   : > { %6968 = dma.done.wait (%p7101_p8), %s367_s9, 64  }
  0x6c   : > { %6970 = vsyncadd (%p7101_p8), %s367_s9, 4294967232  ;;  %v8742_v0 = vmov 0   ;;  %v7011_v1 = vmov 0.0   ;;  %v7239_v2 = vld [vmem:[%s7227_s16 + $0xe4] ss:$16 sps:$4 sm:$0xff]   ;;  %s434_s30 = smul.u32 7, %s6993_s21 }
  0x6d   : > { %695 = vmatprep.mubr.bf16.mxu0 %v8742_v0  ;;  %432 = vst [vmem:[#allocation2] sm:$0x3] %v7011_v1  ;;  %433 = vst [vmem:[#allocation3] sm:$0x3] %v7011_v1  ;;  %736 = vmatprep.mubr.bf16.mxu1 %v8742_v0  ;;  %v7242_v3 = vld [vmem:[%s7227_s16 + $0xec] ss:$16 sps:$4 sm:$0xff]  }
  0x6e   : > { %663 = vmatprep.subr.bf16.mxu0 %v7239_v2  ;;  %v7246_v4 = vld [vmem:[%s7227_s16 + $0xe0] ss:$16 sps:$4 sm:$0xff]   ;;  %v7249_v5 = vld [vmem:[%s7227_s16 + $0xe8] ss:$16 sps:$4 sm:$0xff]   ;;  %704 = vmatprep.subr.bf16.mxu1 %v7242_v3  ;;  %v7253_v6 = vld [vmem:[%s7227_s16 + $0xc4] ss:$16 sps:$4 sm:$0xff]  }
  0x6f   : > { %664 = vmatpush1.bf16.msra.mxu0 %v7246_v4  ;;  %705 = vmatpush1.bf16.msra.mxu1 %v7249_v5  ;;  %v7258_v7 = vld [vmem:[%s7227_s16 + $0xcc] ss:$16 sps:$4 sm:$0xff]   ;;  %v7261_v8 = vld [vmem:[%s7227_s16 + $0xc0] ss:$16 sps:$4 sm:$0xff]   ;;  %v7265_v9 = vld [vmem:[%s7227_s16 + $0xc8] ss:$16 sps:$4 sm:$0xff]  }
  0x70   : > { %665 = vmatprep.subr.bf16.mxu0 %v7253_v6  ;;  %706 = vmatprep.subr.bf16.mxu1 %v7258_v7  ;;  %v7269_v10 = vld [vmem:[%s7227_s16 + $0xa4] ss:$16 sps:$4 sm:$0xff]   ;;  %v7272_v11 = vld [vmem:[%s7227_s16 + $0xac] ss:$16 sps:$4 sm:$0xff]   ;;  %v7275_v12 = vld [vmem:[%s7227_s16 + $0xa0] ss:$16 sps:$4 sm:$0xff]  }
  0x71   : > { %v7278_v13 = vld [vmem:[%s7227_s16 + $0xa8] ss:$16 sps:$4 sm:$0xff]   ;;  %v7283_v14 = vld [vmem:[%s7227_s16 + $0x84] ss:$16 sps:$4 sm:$0xff]   ;;  %v7288_v15 = vld [vmem:[%s7227_s16 + $0x8c] ss:$16 sps:$4 sm:$0xff]  }
  0x72   : > { %v7291_v16 = vld [vmem:[%s7227_s16 + $0x80] ss:$16 sps:$4 sm:$0xff]   ;;  %v7296_v17 = vld [vmem:[%s7227_s16 + $0x88] ss:$16 sps:$4 sm:$0xff]   ;;  %v7299_v18 = vld [vmem:[%s7227_s16 + $0x64] ss:$16 sps:$4 sm:$0xff]  }
  0x73   : > { %666 = vmatpush1.bf16.msra.mxu0 %v7261_v8  ;;  %707 = vmatpush1.bf16.msra.mxu1 %v7265_v9  ;;  %v7304_v19 = vld [vmem:[%s7227_s16 + $0x6c] ss:$16 sps:$4 sm:$0xff]   ;;  %v7307_v20 = vld [vmem:[%s7227_s16 + $0x60] ss:$16 sps:$4 sm:$0xff]   ;;  %v7310_v21 = vld [vmem:[%s7227_s16 + $0x68] ss:$16 sps:$4 sm:$0xff]  }
  0x74   : > { %667 = vmatprep.subr.bf16.mxu0 %v7269_v10  ;;  %708 = vmatprep.subr.bf16.mxu1 %v7272_v11  ;;  %v7315_v22 = vld [vmem:[%s7227_s16 + $0x44] ss:$16 sps:$4 sm:$0xff]   ;;  %v7320_v23 = vld [vmem:[%s7227_s16 + $0x4c] ss:$16 sps:$4 sm:$0xff]   ;;  %v7325_v24 = vld [vmem:[%s7227_s16 + $0x40] ss:$16 sps:$4 sm:$0xff]  }
  0x75   : > { %v7328_v25 = vld [vmem:[%s7227_s16 + $0x48] ss:$16 sps:$4 sm:$0xff]   ;;  %v7333_v26 = vld [vmem:[%s7227_s16 + $0x24] ss:$16 sps:$4 sm:$0xff]   ;;  %v7336_v27 = vld [vmem:[%s7227_s16 + $0x2c] ss:$16 sps:$4 sm:$0xff]  }
  0x76   : > { %v7339_v28 = vld [vmem:[%s7227_s16 + $0x20] ss:$16 sps:$4 sm:$0xff]   ;;  %v7344_v29 = vld [vmem:[%s7227_s16 + $0x28] ss:$16 sps:$4 sm:$0xff]   ;;  %v7349_v30 = vld [vmem:[%s7227_s16 + $0x4] ss:$16 sps:$4 sm:$0xff]  }
  0x77   : > { %668 = vmatpush1.bf16.msra.mxu0 %v7275_v12  ;;  %709 = vmatpush1.bf16.msra.mxu1 %v7278_v13  ;;  %v7352_v31 = vld [vmem:[%s7227_s16 + $0xc] ss:$16 sps:$4 sm:$0xff]   ;;  %v7355_v32 = vld [vmem:[%s7227_s16] ss:$16 sps:$4 sm:$0xff]   ;;  %v7358_v33 = vld [vmem:[%s7227_s16 + $0x8] ss:$16 sps:$4 sm:$0xff]  }
  0x78   : > { %669 = vmatprep.subr.bf16.mxu0 %v7283_v14  ;;  %710 = vmatprep.subr.bf16.mxu1 %v7288_v15  ;;  %v437_v34 = vld [vmem:[#allocation2] sm:$0x3]  ;;  %v7365_v35 = vld [vmem:[%s7220_s25 + $0xe4] ss:$16 sps:$4 sm:$0xff]   ;;  %v7371_v38 = vld [vmem:[%s7220_s25 + $0xe0] ss:$16 sps:$4 sm:$0xff]  }
  0x79   : > { %v7368_v36 = vld [vmem:[%s7220_s25 + $0xec] ss:$16 sps:$4 sm:$0xff]   ;;  %v470_v37 = vpack.c.bf16 %v437_v34, %v437_v34  ;;  %v7376_v39 = vld [vmem:[%s7220_s25 + $0xe8] ss:$16 sps:$4 sm:$0xff]   ;;  %v7381_v40 = vld [vmem:[%s7220_s25 + $0xc4] ss:$16 sps:$4 sm:$0xff]  }
  0x7a   : > { %v7384_v41 = vld [vmem:[%s7220_s25 + $0xcc] ss:$16 sps:$4 sm:$0xff]   ;;  %v7387_v42 = vld [vmem:[%s7220_s25 + $0xc0] ss:$16 sps:$4 sm:$0xff]   ;;  %v7392_v43 = vld [vmem:[%s7220_s25 + $0xc8] ss:$16 sps:$4 sm:$0xff]  }
  0x7b   : > { %670 = vmatpush1.bf16.msra.mxu0 %v7291_v16  ;;  %711 = vmatpush1.bf16.msra.mxu1 %v7296_v17  ;;  %v7397_v44 = vld [vmem:[%s7220_s25 + $0xa4] ss:$16 sps:$4 sm:$0xff]   ;;  %v7400_v45 = vld [vmem:[%s7220_s25 + $0xac] ss:$16 sps:$4 sm:$0xff]   ;;  %v7405_v46 = vld [vmem:[%s7220_s25 + $0xa0] ss:$16 sps:$4 sm:$0xff]  }
  0x7c   : > { %671 = vmatprep.subr.bf16.mxu0 %v7299_v18  ;;  %712 = vmatprep.subr.bf16.mxu1 %v7304_v19  ;;  %v7410_v47 = vld [vmem:[%s7220_s25 + $0xa8] ss:$16 sps:$4 sm:$0xff]   ;;  %v7415_v48 = vld [vmem:[%s7220_s25 + $0x84] ss:$16 sps:$4 sm:$0xff]   ;;  %v7418_v49 = vld [vmem:[%s7220_s25 + $0x8c] ss:$16 sps:$4 sm:$0xff]  }
  0x7d   : > { %v7421_v50 = vld [vmem:[%s7220_s25 + $0x80] ss:$16 sps:$4 sm:$0xff]   ;;  %v7424_v51 = vld [vmem:[%s7220_s25 + $0x88] ss:$16 sps:$4 sm:$0xff]   ;;  %v7427_v52 = vld [vmem:[%s7220_s25 + $0x64] ss:$16 sps:$4 sm:$0xff]  }
  0x7e   : > { %v7430_v53 = vld [vmem:[%s7220_s25 + $0x6c] ss:$16 sps:$4 sm:$0xff]   ;;  %v7437_v54 = vld [vmem:[%s7220_s25 + $0x60] ss:$16 sps:$4 sm:$0xff]   ;;  %v7440_v55 = vld [vmem:[%s7220_s25 + $0x68] ss:$16 sps:$4 sm:$0xff]  }
  0x7f   : > { %672 = vmatpush1.bf16.msra.mxu0 %v7307_v20  ;;  %713 = vmatpush1.bf16.msra.mxu1 %v7310_v21  ;;  %v7443_v56 = vld [vmem:[%s7220_s25 + $0x44] ss:$16 sps:$4 sm:$0xff]   ;;  %v7446_v57 = vld [vmem:[%s7220_s25 + $0x4c] ss:$16 sps:$4 sm:$0xff]   ;;  %v7453_v58 = vld [vmem:[%s7220_s25 + $0x40] ss:$16 sps:$4 sm:$0xff]  }
  0x80   : > { %673 = vmatprep.subr.bf16.mxu0 %v7315_v22  ;;  %714 = vmatprep.subr.bf16.mxu1 %v7320_v23  ;;  %8785 = vst [vmem:[#allocation23_spill] sm:$0xff] %v7453_v58  ;;  %v7456_v59 = vld [vmem:[%s7220_s25 + $0x48] ss:$16 sps:$4 sm:$0xff]   ;;  %v7459_v60 = vld [vmem:[%s7220_s25 + $0x24] ss:$16 sps:$4 sm:$0xff]   ;;  %s435_s28 = scalar_lea.vmem [#allocation4], %s434_s30 }
  0x81   : > { %v7462_v61 = vld [vmem:[%s7220_s25 + $0x2c] ss:$16 sps:$4 sm:$0xff]   ;;  %v7469_v62 = vld [vmem:[%s7220_s25 + $0x20] ss:$16 sps:$4 sm:$0xff]   ;;  %v7472_v63 = vld [vmem:[%s7220_s25 + $0x28] ss:$16 sps:$4 sm:$0xff]  }
  0x82   : > { %v7475_v1 = vld [vmem:[%s7220_s25 + $0x4] ss:$16 sps:$4 sm:$0xff]   ;;  %v7478_v34 = vld [vmem:[%s7220_s25 + $0xc] ss:$16 sps:$4 sm:$0xff]   ;;  %s5606_s11 = sshll.u32 %s7217_s2, 3  ;;  %s5458_s13 = smul.u32 5, %s6993_s21 }
  0x83   : > { %674 = vmatpush1.bf16.msra.mxu0 %v7325_v24  ;;  %715 = vmatpush1.bf16.msra.mxu1 %v7328_v25  ;;  %8786 = vst [vmem:[#allocation24_spill] sm:$0xff] %v7478_v34  ;;  %s7549_s20 = scalar_lea.vmem [#allocation12], %s5606_s11  ;;  %s5464_s12 = smul.u32 3, %s6993_s21 }
  0x84   : > { %675 = vmatprep.subr.bf16.mxu0 %v7333_v26  ;;  %716 = vmatprep.subr.bf16.mxu1 %v7336_v27  ;;  %s1041_s7 = scalar_lea.vmem %s7549_s20, %s434_s30 [#allocation12]  ;;  %s5459_s29 = scalar_lea.vmem [#allocation4], %s5458_s13 }
  0x85   : > { %s5462_s14 = scalar_lea.vmem %s7549_s20, %s5458_s13 [#allocation12]  ;;  %s5465_s17 = scalar_lea.vmem [#allocation4], %s5464_s12 }
  0x86   : > { %s5468_s15 = scalar_lea.vmem %s7549_s20, %s5464_s12 [#allocation12]  ;;  %s5470_s1 = scalar_lea.vmem [#allocation4], %s6993_s21 }
  0x87   : > { %676 = vmatpush1.bf16.msra.mxu0 %v7339_v28  ;;  %717 = vmatpush1.bf16.msra.mxu1 %v7344_v29  ;;  %s5472_s0 = scalar_lea.vmem %s7549_s20, %s6993_s21 [#allocation12]  ;;  %s2872_s10 = ssub.s32 4, %s6993_s21 }
  0x88   : > { %677 = vmatprep.subr.bf16.mxu0 %v7349_v30  ;;  %718 = vmatprep.subr.bf16.mxu1 %v7352_v31  ;;  %s2873_s27 = scalar_lea.vmem [#allocation4], %s2872_s10  ;;  %s3479_s26 = scalar_lea.vmem %s7549_s20, %s2872_s10 [#allocation12] }
  0x89   : > { %s5476_s9 = smul.u32 4294967293, %s6993_s21  ;;  %p8824_p0 = scmp.ne.s32.totalorder %s8772_s6, 0 }
  0x8b   : > { %678 = vmatpush1.bf16.msra.mxu0 %v7355_v32  ;;  %719 = vmatpush1.bf16.msra.mxu1 %v7358_v33  ;;  %s5477_s30 = scalar_lea.vmem [#allocation4], %s5476_s9 }
  0x8c   : > { %905 = vmatprep.subr.bf16.mxu0 %v7365_v35  ;;  %946 = vmatprep.subr.bf16.mxu1 %v7368_v36 }
  0x8e   : > { %696 = vmatmul.mubr.bf16.vlgmr.msra.gmra.mxu0 %v470_v37  ;;  %737 = vmatmul.mubr.bf16.vlgmr.msra.gmra.mxu1 %v470_v37  ;;  %v7486_v37 = vld [vmem:[%s7220_s25] ss:$16 sps:$4 sm:$0xff]  }
  0x8f   : > { %906 = vmatpush1.bf16.msra.mxu0 %v7371_v38  ;;  %947 = vmatpush1.bf16.msra.mxu1 %v7376_v39 }
  0x90   : > { %907 = vmatprep.subr.bf16.mxu0 %v7381_v40  ;;  %948 = vmatprep.subr.bf16.mxu1 %v7384_v41 }
  0x91   : > { %937 = vmatprep.mubr.bf16.mxu0 %v8742_v0  ;;  %978 = vmatprep.mubr.bf16.mxu1 %v8742_v0  ;;  %v7489_v0 = vld [vmem:[%s7220_s25 + $0x8] ss:$16 sps:$4 sm:$0xff]  }
  0x93   : > { %908 = vmatpush1.bf16.msra.mxu0 %v7387_v42  ;;  %949 = vmatpush1.bf16.msra.mxu1 %v7392_v43 }
  0x94   : > { %909 = vmatprep.subr.bf16.mxu0 %v7397_v44  ;;  %950 = vmatprep.subr.bf16.mxu1 %v7400_v45 }
  0x97   : > { %910 = vmatpush1.bf16.msra.mxu0 %v7405_v46  ;;  %951 = vmatpush1.bf16.msra.mxu1 %v7410_v47 }
  0x98   : > { %911 = vmatprep.subr.bf16.mxu0 %v7415_v48  ;;  %952 = vmatprep.subr.bf16.mxu1 %v7418_v49 }
  0x9b   : > { %912 = vmatpush1.bf16.msra.mxu0 %v7421_v50  ;;  %953 = vmatpush1.bf16.msra.mxu1 %v7424_v51 }
  0x9c   : > { %913 = vmatprep.subr.bf16.mxu0 %v7427_v52  ;;  %954 = vmatprep.subr.bf16.mxu1 %v7430_v53 }
  0x9f   : > { %914 = vmatpush1.bf16.msra.mxu0 %v7437_v54  ;;  %955 = vmatpush1.bf16.msra.mxu1 %v7440_v55 }
  0xa0   : > { %915 = vmatprep.subr.bf16.mxu0 %v7443_v56  ;;  %956 = vmatprep.subr.bf16.mxu1 %v7446_v57 }
  0xa3   : > { %916 = vmatpush1.bf16.msra.mxu0 %v7453_v58  ;;  %957 = vmatpush1.bf16.msra.mxu1 %v7456_v59  ;;  %v436_v58 = vld [vmem:[%s435_s28] sm:$0x1]  ;;  %s5482_s28 = smul.u32 4294967291, %s6993_s21 }
  0xa4   : > { %917 = vmatprep.subr.bf16.mxu0 %v7459_v60  ;;  %958 = vmatprep.subr.bf16.mxu1 %v7462_v61 }
  0xa5   : > { %s5483_s11 = scalar_lea.vmem [#allocation4], %s5482_s28 }
  0xa7   : > { %918 = vmatpush1.bf16.msra.mxu0 %v7469_v62  ;;  %959 = vmatpush1.bf16.msra.mxu1 %v7472_v63 }
  0xa8   : > { %919 = vmatprep.subr.bf16.mxu0 %v7475_v1  ;;  %960 = vmatprep.subr.bf16.mxu1 %v7478_v34  ;;  %v8787_v34 = vmov 0  }
  0xab   : > { %920 = vmatpush1.bf16.msra.mxu0 %v7486_v37  ;;  %961 = vmatpush1.bf16.msra.mxu1 %v7489_v0 }
  0xac   : > { %1273 = vmatprep.subr.bf16.mxu0 %v7239_v2  ;;  %1314 = vmatprep.subr.bf16.mxu1 %v7242_v3 }
  0xae   : > { %938 = vmatmul.mubr.bf16.vlgmr.msra.gmra.mxu0 %v436_v58  ;;  %979 = vmatmul.mubr.bf16.vlgmr.msra.gmra.mxu1 %v436_v58 }
  0xaf   : > { %1274 = vmatpush1.bf16.msra.mxu0 %v7246_v4  ;;  %1315 = vmatpush1.bf16.msra.mxu1 %v7249_v5 }
  0xb0   : > { %1275 = vmatprep.subr.bf16.mxu0 %v7253_v6  ;;  %1316 = vmatprep.subr.bf16.mxu1 %v7258_v7 }
  0xb1   : > { %1305 = vmatprep.mubr.bf16.mxu0 %v8787_v34  ;;  %1346 = vmatprep.mubr.bf16.mxu1 %v8787_v34 }
  0xb3   : > { %1276 = vmatpush1.bf16.msra.mxu0 %v7261_v8  ;;  %1317 = vmatpush1.bf16.msra.mxu1 %v7265_v9 }
  0xb4   : > { %1277 = vmatprep.subr.bf16.mxu0 %v7269_v10  ;;  %1318 = vmatprep.subr.bf16.mxu1 %v7272_v11  ;;  %v989_v10 = vlaneseq }
  0xb6   : > { %v990_v11 = vshrl.u32 %v989_v10, 7 }
  0xb7   : > { %1278 = vmatpush1.bf16.msra.mxu0 %v7275_v12  ;;  %1319 = vmatpush1.bf16.msra.mxu1 %v7278_v13  ;;  %v987_v13 = vld [vmem:[%s7230_s24] sm:$0xf] }
  0xb8   : > { %1279 = vmatprep.subr.bf16.mxu0 %v7283_v14  ;;  %1320 = vmatprep.subr.bf16.mxu1 %v7288_v15  ;;  %v7535_v12 = vsub.s32 0, %v990_v11  ;;  %v7538_v14 = vsub.s32 1, %v990_v11 }
  0xba   : > { %8788 = vst [vmem:[#allocation25_spill] sm:$0xff] %v7538_v14  ;;  %v992_v15 = vrot.slane %v987_v13, %v7535_v12 }
  0xbb   : > { %1280 = vmatpush1.bf16.msra.mxu0 %v7291_v16  ;;  %1321 = vmatpush1.bf16.msra.mxu1 %v7296_v17 }
  0xbc   : > { %1281 = vmatprep.subr.bf16.mxu0 %v7299_v18  ;;  %1322 = vmatprep.subr.bf16.mxu1 %v7304_v19  ;;  %v996_v19 = vrot.slane %v987_v13, %v7538_v14 }
  0xbf   : > { %1282 = vmatpush1.bf16.msra.mxu0 %v7307_v20  ;;  %1323 = vmatpush1.bf16.msra.mxu1 %v7310_v21 }
  0xc0   : > { %1283 = vmatprep.subr.bf16.mxu0 %v7315_v22  ;;  %1324 = vmatprep.subr.bf16.mxu1 %v7320_v23 }
  0xc3   : > { %1284 = vmatpush1.bf16.msra.mxu0 %v7325_v24  ;;  %1325 = vmatpush1.bf16.msra.mxu1 %v7328_v25 }
  0xc4   : > { %1285 = vmatprep.subr.bf16.mxu0 %v7333_v26  ;;  %1326 = vmatprep.subr.bf16.mxu1 %v7336_v27 }
  0xc7   : > { %1286 = vmatpush1.bf16.msra.mxu0 %v7339_v28  ;;  %1327 = vmatpush1.bf16.msra.mxu1 %v7344_v29  ;;  %v7542_v28 = vsub.s32 3, %v990_v11 }
  0xc8   : > { %1287 = vmatprep.subr.bf16.mxu0 %v7349_v30  ;;  %1328 = vmatprep.subr.bf16.mxu1 %v7352_v31 }
  0xcb   : > { %1288 = vmatpush1.bf16.msra.mxu0 %v7355_v32  ;;  %1329 = vmatpush1.bf16.msra.mxu1 %v7358_v33  ;;  %v1004_v33 = vrot.slane %v987_v13, %v7542_v28 }
  0xcc   : > { %1515 = vmatprep.subr.bf16.mxu0 %v7365_v35  ;;  %1556 = vmatprep.subr.bf16.mxu1 %v7368_v36  ;;  %v7545_v35 = vsub.s32 2, %v990_v11  ;;  %v1032_v11 = vld [vmem:[#allocation3] sm:$0x3] }
 0x14e   : > { %v697_v2 = vpop.f32.mrf.mxu0  ;;  %v738_v3 = vpop.f32.mrf.mxu1 }
 0x150   : > { %v699_v4 = vpop.f32.mrf.mxu0  ;;  %v740_v5 = vpop.f32.mrf.mxu1 }
 0x152   : > { %v701_v6 = vpop.f32.mrf.mxu0  ;;  %v742_v7 = vpop.f32.mrf.mxu1 }
 0x154   : > { %v702_v8 = vpop.f32.mrf.mxu0  ;;  %v743_v9 = vpop.f32.mrf.mxu1 }
 0x16e   : > { %v939_v16 = vpop.f32.mrf.mxu0  ;;  %v980_v17 = vpop.f32.mrf.mxu1 }
 0x16f   : > { %v940_v18 = vadd.f32 %v939_v16, %v697_v2  ;;  %v981_v58 = vadd.f32 %v980_v17, %v738_v3  ;;  %v1000_v2 = vrot.slane %v987_v13, %v7545_v35 }
 0x170   : > { %v941_v20 = vpop.f32.mrf.mxu0  ;;  %v982_v21 = vpop.f32.mrf.mxu1 }
 0x171   : > { %v1009_v22 = vadd.f32 %v992_v15, %v940_v18  ;;  %v942_v23 = vadd.f32 %v941_v20, %v699_v4  ;;  %v983_v32 = vadd.f32 %v982_v21, %v740_v5  ;;  %v1011_v7 = vadd.f32 %v1000_v2, %v981_v58  ;;  %v7720_v58 = vld [vmem:[%s7220_s25 + $0xec] ss:$16 sps:$4 sm:$0xff]  }
 0x172   : > { %v943_v24 = vpop.f32.mrf.mxu0  ;;  %v984_v25 = vpop.f32.mrf.mxu1 }
 0x173   : > { %v5672_v26 = vmul.f32 -1.442695, %v1009_v22  ;;  %v1010_v27 = vadd.f32 %v996_v19, %v942_v23  ;;  %v1012_v36 = vadd.f32 %v1004_v33, %v983_v32  ;;  %v7710_v32 = vld [vmem:[%s7227_s16 + $0x8] ss:$16 sps:$4 sm:$0xff]   ;;  %v7713_v33 = vld [vmem:[%s7227_s16 + $0xc] ss:$16 sps:$4 sm:$0xff]  }
 0x174   : > { %v944_v29 = vpop.f32.mrf.mxu0  ;;  %v985_v30 = vpop.f32.mrf.mxu1 }
 0x175   : > { %6645 = vpow2.f32 %v5672_v26  ;;  %v5673_v31 = vmul.f32 -1.442695, %v1010_v27  ;;  %v5674_v4 = vmul.f32 -1.442695, %v1012_v36  ;;  %v7691_v26 = vld [vmem:[%s7227_s16 + $0x2c] ss:$16 sps:$4 sm:$0xff]  }
 0x176   : > { %v7694_v27 = vld [vmem:[%s7227_s16 + $0x20] ss:$16 sps:$4 sm:$0xff]   ;;  %v7697_v29 = vld [vmem:[%s7227_s16 + $0x28] ss:$16 sps:$4 sm:$0xff]   ;;  %v7702_v30 = vld [vmem:[%s7227_s16 + $0x4] ss:$16 sps:$4 sm:$0xff]  }
 0x177   : > { %6647 = vpow2.f32 %v5673_v31  ;;  %v7707_v31 = vld [vmem:[%s7227_s16] ss:$16 sps:$4 sm:$0xff]   ;;  %v7717_v36 = vld [vmem:[%s7220_s25 + $0xe4] ss:$16 sps:$4 sm:$0xff]  }
 0x178   : > { %6649 = vpow2.f32 %v5674_v4 }
 0x182   : > { %v6646_v6 = vpop.eup %6645 }
 0x183   : > { %v1016_v8 = vadd.f32 1.0, %v6646_v6 }
 0x184   : > { %v6648_v9 = vpop.eup %6647 }
 0x185   : > { %6651 = vrcp.f32 %v1016_v8  ;;  %v1022_v10 = vadd.f32 1.0, %v6648_v9  ;;  %v6650_v5 = vpop.eup %6649 }
 0x186   : > { %6653 = vtanh.f32 %v1011_v7  ;;  %v1029_v3 = vadd.f32 1.0, %v6650_v5 }
 0x187   : > { %6655 = vrcp.f32 %v1022_v10 }
 0x188   : > { %6657 = vrcp.f32 %v1029_v3 }
 0x192   : > { %v6652_v15 = vpop.eup %6651 }
 0x193   : > { %v6654_v16 = vpop.eup %6653 }
 0x194   : > { %v6656_v18 = vpop.eup %6655  ;;  %v1034_v17 = vmul.f32 %v6654_v16, %v6652_v15  ;;  %v1597_v15 = vld [vmem:[%s7230_s24] sm:$0xf] }
 0x195   : > { %v1033_v13 = vmul.f32 %v6656_v18, %v1032_v11  ;;  %v6658_v20 = vpop.eup %6657  ;;  %v1602_v11 = vrot.slane %v1597_v15, %v7535_v12 }
 0x197   : > { %v1035_v19 = vadd.f32 %v1034_v17, %v1033_v13  ;;  %v1606_v17 = vrot.slane %v1597_v15, %v7538_v14 }
 0x199   : > { %6659 = vtanh.f32 %v1035_v19  ;;  %1038 = vst [vmem:[#allocation3] sm:$0x3] %v1035_v19 }
 0x1a6   : > { %v6660_v21 = vpop.eup %6659 }
 0x1a7   : > { %v1037_v22 = vmul.f32 %v6660_v21, %v6658_v20 }
 0x1a9   : > { %1039 = vst [vmem:[#allocation2] sm:$0x3] %v1037_v22  ;;  %v1040_v23 = vpack.c.bf16 %v1037_v22, %v1037_v22 }
 0x1ab   : > { %1042 = vst [vmem:[%s1041_s7] sm:$0x1] %v1040_v23  ;;  %s5488_s7 = smul.u32 4294967289, %s6993_s21 }
 0x1ad   : > { %s5489_s13 = scalar_lea.vmem [#allocation4], %s5488_s7  ;;  %s5492_s12 = scalar_lea.vmem %s7549_s20, %s5488_s7 [#allocation12] }
 0x1b0   : > { %v1047_v24 = vld [vmem:[#allocation2] sm:$0x3] }
 0x1b1   : > { %v1080_v25 = vpack.c.bf16 %v1047_v24, %v1047_v24 }
 0x1b3   : > { %1306 = vmatmul.mubr.bf16.vlgmr.msra.gmra.mxu0 %v1080_v25  ;;  %1347 = vmatmul.mubr.bf16.vlgmr.msra.gmra.mxu1 %v1080_v25 }
 0x1b4   : > { %1516 = vmatpush1.bf16.msra.mxu0 %v7371_v38  ;;  %1557 = vmatpush1.bf16.msra.mxu1 %v7376_v39  ;;  %v8789_v38 = vld [vmem:[#allocation23_spill] sm:$0xff]  ;;  %v8790_v39 = vld [vmem:[#allocation24_spill] sm:$0xff] }
 0x1b5   : > { %1517 = vmatprep.subr.bf16.mxu0 %v7381_v40  ;;  %1558 = vmatprep.subr.bf16.mxu1 %v7384_v41  ;;  %v5675_v40 = vld [vmem:[%s5459_s29 + $0x1] sm:$0x1]  ;;  %v7592_v41 = vld [vmem:[%s7227_s16 + $0xe4] ss:$16 sps:$4 sm:$0xff]   ;;  %s5342_s29 = sshll.u32 %s7549_s20, 4  ;;  %s8652_s29 = int_to_ptr.vmem [resolvable:$true] %s5342_s29 }
 0x1b6   : > { %1547 = vmatprep.mubr.bf16.mxu0 %v8787_v34  ;;  %1588 = vmatprep.mubr.bf16.mxu1 %v8787_v34 }
 0x1b8   : > { %1518 = vmatpush1.bf16.msra.mxu0 %v7387_v42  ;;  %1559 = vmatpush1.bf16.msra.mxu1 %v7392_v43  ;;  %v7595_v42 = vld [vmem:[%s7227_s16 + $0xec] ss:$16 sps:$4 sm:$0xff]   ;;  %v7598_v43 = vld [vmem:[%s7227_s16 + $0xe0] ss:$16 sps:$4 sm:$0xff]  }
 0x1b9   : > { %1519 = vmatprep.subr.bf16.mxu0 %v7397_v44  ;;  %1560 = vmatprep.subr.bf16.mxu1 %v7400_v45  ;;  %v7608_v44 = vld [vmem:[%s7227_s16 + $0xc4] ss:$16 sps:$4 sm:$0xff]   ;;  %v7611_v45 = vld [vmem:[%s7227_s16 + $0xcc] ss:$16 sps:$4 sm:$0xff]  }
 0x1bc   : > { %1520 = vmatpush1.bf16.msra.mxu0 %v7405_v46  ;;  %1561 = vmatpush1.bf16.msra.mxu1 %v7410_v47  ;;  %v7614_v46 = vld [vmem:[%s7227_s16 + $0xc0] ss:$16 sps:$4 sm:$0xff]   ;;  %v7617_v47 = vld [vmem:[%s7227_s16 + $0xc8] ss:$16 sps:$4 sm:$0xff]  }
 0x1bd   : > { %1521 = vmatprep.subr.bf16.mxu0 %v7415_v48  ;;  %1562 = vmatprep.subr.bf16.mxu1 %v7418_v49  ;;  %v7624_v48 = vld [vmem:[%s7227_s16 + $0xa4] ss:$16 sps:$4 sm:$0xff]   ;;  %v7627_v49 = vld [vmem:[%s7227_s16 + $0xac] ss:$16 sps:$4 sm:$0xff]  }
 0x1c0   : > { %1522 = vmatpush1.bf16.msra.mxu0 %v7421_v50  ;;  %1563 = vmatpush1.bf16.msra.mxu1 %v7424_v51  ;;  %v7630_v50 = vld [vmem:[%s7227_s16 + $0xa0] ss:$16 sps:$4 sm:$0xff]   ;;  %v7633_v51 = vld [vmem:[%s7227_s16 + $0xa8] ss:$16 sps:$4 sm:$0xff]  }
 0x1c1   : > { %1523 = vmatprep.subr.bf16.mxu0 %v7427_v52  ;;  %1564 = vmatprep.subr.bf16.mxu1 %v7430_v53  ;;  %v7640_v52 = vld [vmem:[%s7227_s16 + $0x84] ss:$16 sps:$4 sm:$0xff]   ;;  %v7643_v53 = vld [vmem:[%s7227_s16 + $0x8c] ss:$16 sps:$4 sm:$0xff]  }
 0x1c4   : > { %1524 = vmatpush1.bf16.msra.mxu0 %v7437_v54  ;;  %1565 = vmatpush1.bf16.msra.mxu1 %v7440_v55  ;;  %v7646_v54 = vld [vmem:[%s7227_s16 + $0x80] ss:$16 sps:$4 sm:$0xff]   ;;  %v7649_v55 = vld [vmem:[%s7227_s16 + $0x88] ss:$16 sps:$4 sm:$0xff]  }
 0x1c5   : > { %1525 = vmatprep.subr.bf16.mxu0 %v7443_v56  ;;  %1566 = vmatprep.subr.bf16.mxu1 %v7446_v57  ;;  %v7656_v56 = vld [vmem:[%s7227_s16 + $0x64] ss:$16 sps:$4 sm:$0xff]   ;;  %v7659_v57 = vld [vmem:[%s7227_s16 + $0x6c] ss:$16 sps:$4 sm:$0xff]  }
 0x1c8   : > { %1526 = vmatpush1.bf16.msra.mxu0 %v8789_v38  ;;  %1567 = vmatpush1.bf16.msra.mxu1 %v7456_v59  ;;  %v7662_v59 = vld [vmem:[%s7227_s16 + $0x60] ss:$16 sps:$4 sm:$0xff]  }
 0x1c9   : > { %1527 = vmatprep.subr.bf16.mxu0 %v7459_v60  ;;  %1568 = vmatprep.subr.bf16.mxu1 %v7462_v61  ;;  %v7665_v60 = vld [vmem:[%s7227_s16 + $0x68] ss:$16 sps:$4 sm:$0xff]   ;;  %v7672_v61 = vld [vmem:[%s7227_s16 + $0x44] ss:$16 sps:$4 sm:$0xff]  }
 0x1cc   : > { %1528 = vmatpush1.bf16.msra.mxu0 %v7469_v62  ;;  %1569 = vmatpush1.bf16.msra.mxu1 %v7472_v63  ;;  %v7675_v62 = vld [vmem:[%s7227_s16 + $0x4c] ss:$16 sps:$4 sm:$0xff]   ;;  %v7678_v63 = vld [vmem:[%s7227_s16 + $0x40] ss:$16 sps:$4 sm:$0xff]  }
 0x1cd   : > { %1529 = vmatprep.subr.bf16.mxu0 %v7475_v1  ;;  %1570 = vmatprep.subr.bf16.mxu1 %v8790_v39  ;;  %v7681_v1 = vld [vmem:[%s7227_s16 + $0x48] ss:$16 sps:$4 sm:$0xff]  }
 0x1d0   : > { %1530 = vmatpush1.bf16.msra.mxu0 %v7486_v37  ;;  %1571 = vmatpush1.bf16.msra.mxu1 %v7489_v0  ;;  %v7601_v0 = vld [vmem:[%s7227_s16 + $0xe8] ss:$16 sps:$4 sm:$0xff]   ;;  %v7688_v37 = vld [vmem:[%s7227_s16 + $0x24] ss:$16 sps:$4 sm:$0xff]  }
 0x1d1   : > { %1883 = vmatprep.subr.bf16.mxu0 %v7592_v41  ;;  %1924 = vmatprep.subr.bf16.mxu1 %v7595_v42 }
 0x1d3   : > { %1548 = vmatmul.mubr.bf16.vlgmr.msra.gmra.mxu0 %v5675_v40  ;;  %1589 = vmatmul.mubr.bf16.vlgmr.msra.gmra.mxu1 %v5675_v40 }
 0x1d4   : > { %1915 = vmatprep.mubr.bf16.mxu0 %v8787_v34  ;;  %1956 = vmatprep.mubr.bf16.mxu1 %v8787_v34 }
 0x1d5   : > { %1884 = vmatpush1.bf16.msra.mxu0 %v7598_v43  ;;  %1925 = vmatpush1.bf16.msra.mxu1 %v7601_v0 }
 0x1d6   : > { %1885 = vmatprep.subr.bf16.mxu0 %v7608_v44  ;;  %1926 = vmatprep.subr.bf16.mxu1 %v7611_v45 }
 0x1d9   : > { %1886 = vmatpush1.bf16.msra.mxu0 %v7614_v46  ;;  %1927 = vmatpush1.bf16.msra.mxu1 %v7617_v47 }
 0x1da   : > { %1887 = vmatprep.subr.bf16.mxu0 %v7624_v48  ;;  %1928 = vmatprep.subr.bf16.mxu1 %v7627_v49 }
 0x1dd   : > { %1888 = vmatpush1.bf16.msra.mxu0 %v7630_v50  ;;  %1929 = vmatpush1.bf16.msra.mxu1 %v7633_v51 }
 0x1de   : > { %1889 = vmatprep.subr.bf16.mxu0 %v7640_v52  ;;  %1930 = vmatprep.subr.bf16.mxu1 %v7643_v53 }
 0x1e1   : > { %1890 = vmatpush1.bf16.msra.mxu0 %v7646_v54  ;;  %1931 = vmatpush1.bf16.msra.mxu1 %v7649_v55 }
 0x1e2   : > { %1891 = vmatprep.subr.bf16.mxu0 %v7656_v56  ;;  %1932 = vmatprep.subr.bf16.mxu1 %v7659_v57 }
 0x1e5   : > { %1892 = vmatpush1.bf16.msra.mxu0 %v7662_v59  ;;  %1933 = vmatpush1.bf16.msra.mxu1 %v7665_v60 }
 0x1e6   : > { %1893 = vmatprep.subr.bf16.mxu0 %v7672_v61  ;;  %1934 = vmatprep.subr.bf16.mxu1 %v7675_v62 }
 0x1e9   : > { %1894 = vmatpush1.bf16.msra.mxu0 %v7678_v63  ;;  %1935 = vmatpush1.bf16.msra.mxu1 %v7681_v1 }
 0x1ea   : > { %1895 = vmatprep.subr.bf16.mxu0 %v7688_v37  ;;  %1936 = vmatprep.subr.bf16.mxu1 %v7691_v26 }
 0x1ed   : > { %1896 = vmatpush1.bf16.msra.mxu0 %v7694_v27  ;;  %1937 = vmatpush1.bf16.msra.mxu1 %v7697_v29 }
 0x1ee   : > { %1897 = vmatprep.subr.bf16.mxu0 %v7702_v30  ;;  %1938 = vmatprep.subr.bf16.mxu1 %v7713_v33 }
 0x1f1   : > { %1898 = vmatpush1.bf16.msra.mxu0 %v7707_v31  ;;  %1939 = vmatpush1.bf16.msra.mxu1 %v7710_v32 }
 0x1f2   : > { %2125 = vmatprep.subr.bf16.mxu0 %v7717_v36  ;;  %2166 = vmatprep.subr.bf16.mxu1 %v7720_v58 }
 0x273   : > { %v1307_v2 = vpop.f32.mrf.mxu0  ;;  %v1348_v4 = vpop.f32.mrf.mxu1 }
 0x275   : > { %v1309_v6 = vpop.f32.mrf.mxu0  ;;  %v1350_v7 = vpop.f32.mrf.mxu1 }
 0x277   : > { %v1311_v8 = vpop.f32.mrf.mxu0  ;;  %v1352_v9 = vpop.f32.mrf.mxu1 }
 0x278   : > { %v1614_v9 = vrot.slane %v1597_v15, %v7542_v28 }
 0x279   : > { %v1312_v10 = vpop.f32.mrf.mxu0  ;;  %v1353_v5 = vpop.f32.mrf.mxu1 }
 0x27a   : > { %v1610_v5 = vrot.slane %v1597_v15, %v7545_v35 }
 0x293   : > { %v1549_v16 = vpop.f32.mrf.mxu0  ;;  %v1590_v18 = vpop.f32.mrf.mxu1 }
 0x294   : > { %v1550_v3 = vadd.f32 %v1549_v16, %v1307_v2  ;;  %v1591_v2 = vadd.f32 %v1590_v18, %v1348_v4  ;;  %v1642_v4 = vld [vmem:[#allocation3] sm:$0x3] }
 0x295   : > { %v1551_v13 = vpop.f32.mrf.mxu0  ;;  %v1592_v19 = vpop.f32.mrf.mxu1 }
 0x296   : > { %v1619_v20 = vadd.f32 %v1602_v11, %v1550_v3  ;;  %v1552_v21 = vadd.f32 %v1551_v13, %v1309_v6  ;;  %v1593_v8 = vadd.f32 %v1592_v19, %v1350_v7  ;;  %v1621_v11 = vadd.f32 %v1610_v5, %v1591_v2  ;;  %v7750_v2 = vld [vmem:[%s7220_s25 + $0xc0] ss:$16 sps:$4 sm:$0xff]   ;;  %v7753_v5 = vld [vmem:[%s7220_s25 + $0xc8] ss:$16 sps:$4 sm:$0xff]  }
 0x297   : > { %v1553_v22 = vpop.f32.mrf.mxu0  ;;  %v1594_v23 = vpop.f32.mrf.mxu1 }
 0x298   : > { %v5740_v24 = vmul.f32 -1.442695, %v1619_v20  ;;  %v1620_v25 = vadd.f32 %v1606_v17, %v1552_v21  ;;  %v1622_v10 = vadd.f32 %v1614_v9, %v1593_v8  ;;  %v7742_v9 = vld [vmem:[%s7220_s25 + $0xc4] ss:$16 sps:$4 sm:$0xff]  }
 0x299   : > { %v1554_v38 = vpop.f32.mrf.mxu0  ;;  %v1595_v39 = vpop.f32.mrf.mxu1 }
 0x29a   : > { %6661 = vpow2.f32 %v5740_v24  ;;  %v5741_v40 = vmul.f32 -1.442695, %v1620_v25  ;;  %v5742_v16 = vmul.f32 -1.442695, %v1622_v10  ;;  %v7736_v38 = vld [vmem:[%s7220_s25 + $0xe0] ss:$16 sps:$4 sm:$0xff]  }
 0x29b   : > { %v7739_v39 = vld [vmem:[%s7220_s25 + $0xe8] ss:$16 sps:$4 sm:$0xff]   ;;  %v7745_v10 = vld [vmem:[%s7220_s25 + $0xcc] ss:$16 sps:$4 sm:$0xff]  }
 0x29c   : > { %6663 = vpow2.f32 %v5741_v40 }
 0x29d   : > { %6665 = vpow2.f32 %v5742_v16  ;;  %v7758_v16 = vld [vmem:[%s7220_s25 + $0xa4] ss:$16 sps:$4 sm:$0xff]  }
 0x2a7   : > { %v6662_v14 = vpop.eup %6661 }
 0x2a8   : > { %v1626_v6 = vadd.f32 1.0, %v6662_v14 }
 0x2a9   : > { %v6664_v3 = vpop.eup %6663 }
 0x2aa   : > { %6667 = vrcp.f32 %v1626_v6  ;;  %v1632_v17 = vadd.f32 1.0, %v6664_v3  ;;  %v6666_v13 = vpop.eup %6665  ;;  %v7768_v6 = vld [vmem:[%s7220_s25 + $0xa0] ss:$16 sps:$4 sm:$0xff]   ;;  %v7771_v3 = vld [vmem:[%s7220_s25 + $0xa8] ss:$16 sps:$4 sm:$0xff]  }
 0x2ab   : > { %6669 = vtanh.f32 %v1621_v11  ;;  %v1639_v15 = vadd.f32 1.0, %v6666_v13  ;;  %v7761_v11 = vld [vmem:[%s7220_s25 + $0xac] ss:$16 sps:$4 sm:$0xff]  }
 0x2ac   : > { %6671 = vrcp.f32 %v1632_v17  ;;  %v7776_v17 = vld [vmem:[%s7220_s25 + $0x84] ss:$16 sps:$4 sm:$0xff]   ;;  %v7779_v13 = vld [vmem:[%s7220_s25 + $0x8c] ss:$16 sps:$4 sm:$0xff]  }
 0x2ad   : > { %6673 = vrcp.f32 %v1639_v15  ;;  %v7800_v15 = vld [vmem:[%s7220_s25 + $0x60] ss:$16 sps:$4 sm:$0xff]  }
 0x2b7   : > { %v6668_v7 = vpop.eup %6667 }
 0x2b8   : > { %v6670_v19 = vpop.eup %6669 }
 0x2b9   : > { %v6672_v20 = vpop.eup %6671  ;;  %v1644_v18 = vmul.f32 %v6670_v19, %v6668_v7  ;;  %v7784_v7 = vld [vmem:[%s7220_s25 + $0x80] ss:$16 sps:$4 sm:$0xff]   ;;  %v7787_v19 = vld [vmem:[%s7220_s25 + $0x88] ss:$16 sps:$4 sm:$0xff]  }
 0x2ba   : > { %v1643_v21 = vmul.f32 %v6672_v20, %v1642_v4  ;;  %v6674_v22 = vpop.eup %6673  ;;  %v7792_v20 = vld [vmem:[%s7220_s25 + $0x64] ss:$16 sps:$4 sm:$0xff]   ;;  %v7795_v4 = vld [vmem:[%s7220_s25 + $0x6c] ss:$16 sps:$4 sm:$0xff]  }
 0x2bc   : > { %v1645_v14 = vadd.f32 %v1644_v18, %v1643_v21  ;;  %v7803_v18 = vld [vmem:[%s7220_s25 + $0x68] ss:$16 sps:$4 sm:$0xff]   ;;  %v7808_v21 = vld [vmem:[%s7220_s25 + $0x44] ss:$16 sps:$4 sm:$0xff]  }
 0x2bd   : > { %8791 = vst [vmem:[#allocation23_spill] sm:$0xff] %v7808_v21 }
 0x2be   : > { %6675 = vtanh.f32 %v1645_v14  ;;  %1648 = vst [vmem:[#allocation3] sm:$0x3] %v1645_v14  ;;  %v7811_v14 = vld [vmem:[%s7220_s25 + $0x4c] ss:$16 sps:$4 sm:$0xff]  }
 0x2bf   : > { %8792 = vst [vmem:[#allocation24_spill] sm:$0xff] %v7811_v14 }
 0x2cb   : > { %v6676_v23 = vpop.eup %6675 }
 0x2cc   : > { %v1647_v24 = vmul.f32 %v6676_v23, %v6674_v22  ;;  %v7816_v22 = vld [vmem:[%s7220_s25 + $0x40] ss:$16 sps:$4 sm:$0xff]   ;;  %v7819_v23 = vld [vmem:[%s7220_s25 + $0x48] ss:$16 sps:$4 sm:$0xff]  }
 0x2cd   : > { %8793 = vst [vmem:[#allocation26_spill] sm:$0xff] %v7816_v22  ;;  %8794 = vst [vmem:[#allocation27_spill] sm:$0xff] %v7819_v23 }
 0x2ce   : > { %1649 = vst [vmem:[#allocation2] sm:$0x3] %v1647_v24  ;;  %v1650_v25 = vpack.c.bf16 %v1647_v24, %v1647_v24  ;;  %v7824_v24 = vld [vmem:[%s7220_s25 + $0x24] ss:$16 sps:$4 sm:$0xff]  }
 0x2d0   : > { %5743 = vst [vmem:[%s5462_s14 + $0x1] sm:$0x1] %v1650_v25  ;;  %v7827_v25 = vld [vmem:[%s7220_s25 + $0x2c] ss:$16 sps:$4 sm:$0xff]   ;;  %s5607_s14 = sshll.u32 %s7217_s2, 1 }
 0x2d1   : > { %8795 = vst [vmem:[#allocation28_spill] sm:$0xff] %v7827_v25  ;;  %s8655_s10 = scalar_lea.vmem [#allocation13], %s5607_s14 }
 0x2d5   : > { %v1657_v40 = vld [vmem:[#allocation2] sm:$0x3] }
 0x2d6   : > { %v1690_v8 = vpack.c.bf16 %v1657_v40, %v1657_v40  ;;  %v7832_v40 = vld [vmem:[%s7220_s25 + $0x20] ss:$16 sps:$4 sm:$0xff]  }
 0x2d8   : > { %1916 = vmatmul.mubr.bf16.vlgmr.msra.gmra.mxu0 %v1690_v8  ;;  %1957 = vmatmul.mubr.bf16.vlgmr.msra.gmra.mxu1 %v1690_v8  ;;  %v7835_v8 = vld [vmem:[%s7220_s25 + $0x28] ss:$16 sps:$4 sm:$0xff]  }
 0x2d9   : > { %2126 = vmatpush1.bf16.msra.mxu0 %v7736_v38  ;;  %2167 = vmatpush1.bf16.msra.mxu1 %v7739_v39 }
 0x2da   : > { %2127 = vmatprep.subr.bf16.mxu0 %v7742_v9  ;;  %2168 = vmatprep.subr.bf16.mxu1 %v7745_v10 }
 0x2db   : > { %2157 = vmatprep.mubr.bf16.mxu0 %v8787_v34  ;;  %2198 = vmatprep.mubr.bf16.mxu1 %v8787_v34 }
 0x2dd   : > { %2128 = vmatpush1.bf16.msra.mxu0 %v7750_v2  ;;  %2169 = vmatpush1.bf16.msra.mxu1 %v7753_v5 }
 0x2de   : > { %2129 = vmatprep.subr.bf16.mxu0 %v7758_v16  ;;  %2170 = vmatprep.subr.bf16.mxu1 %v7761_v11 }
 0x2e1   : > { %2130 = vmatpush1.bf16.msra.mxu0 %v7768_v6  ;;  %2171 = vmatpush1.bf16.msra.mxu1 %v7771_v3 }
 0x2e2   : > { %2131 = vmatprep.subr.bf16.mxu0 %v7776_v17  ;;  %2172 = vmatprep.subr.bf16.mxu1 %v7779_v13 }
 0x2e5   : > { %2132 = vmatpush1.bf16.msra.mxu0 %v7784_v7  ;;  %2173 = vmatpush1.bf16.msra.mxu1 %v7787_v19 }
 0x2e6   : > { %2133 = vmatprep.subr.bf16.mxu0 %v7792_v20  ;;  %2174 = vmatprep.subr.bf16.mxu1 %v7795_v4 }
 0x2e9   : > { %2134 = vmatpush1.bf16.msra.mxu0 %v7800_v15  ;;  %2175 = vmatpush1.bf16.msra.mxu1 %v7803_v18 }
 0x2ea   : > { %2135 = vmatprep.subr.bf16.mxu0 %v7808_v21  ;;  %2176 = vmatprep.subr.bf16.mxu1 %v7811_v14  ;;  %v7840_v21 = vld [vmem:[%s7220_s25 + $0x4] ss:$16 sps:$4 sm:$0xff]   ;;  %v7843_v14 = vld [vmem:[%s7220_s25 + $0xc] ss:$16 sps:$4 sm:$0xff]  }
 0x2ed   : > { %2136 = vmatpush1.bf16.msra.mxu0 %v7816_v22  ;;  %2177 = vmatpush1.bf16.msra.mxu1 %v7819_v23  ;;  %v7849_v22 = vld [vmem:[%s7220_s25] ss:$16 sps:$4 sm:$0xff]   ;;  %v7852_v23 = vld [vmem:[%s7220_s25 + $0x8] ss:$16 sps:$4 sm:$0xff]  }
 0x2ee   : > { %2137 = vmatprep.subr.bf16.mxu0 %v7824_v24  ;;  %2178 = vmatprep.subr.bf16.mxu1 %v7827_v25  ;;  %v5744_v25 = vld [vmem:[%s5465_s17 + $0x2] sm:$0x1] }
 0x2f1   : > { %2138 = vmatpush1.bf16.msra.mxu0 %v7832_v40  ;;  %2179 = vmatpush1.bf16.msra.mxu1 %v7835_v8 }
 0x2f2   : > { %2139 = vmatprep.subr.bf16.mxu0 %v7840_v21  ;;  %2180 = vmatprep.subr.bf16.mxu1 %v7843_v14 }
 0x2f5   : > { %2140 = vmatpush1.bf16.msra.mxu0 %v7849_v22  ;;  %2181 = vmatpush1.bf16.msra.mxu1 %v7852_v23 }
 0x2f6   : > { %2492 = vmatprep.subr.bf16.mxu0 %v7592_v41  ;;  %2533 = vmatprep.subr.bf16.mxu1 %v7595_v42 }
 0x2f8   : > { %2158 = vmatmul.mubr.bf16.vlgmr.msra.gmra.mxu0 %v5744_v25  ;;  %2199 = vmatmul.mubr.bf16.vlgmr.msra.gmra.mxu1 %v5744_v25 }
 0x2f9   : > { %2493 = vmatpush1.bf16.msra.mxu0 %v7598_v43  ;;  %2534 = vmatpush1.bf16.msra.mxu1 %v7601_v0 }
 0x2fa   : > { %2494 = vmatprep.subr.bf16.mxu0 %v7608_v44  ;;  %2535 = vmatprep.subr.bf16.mxu1 %v7611_v45 }
 0x2fb   : > { %2524 = vmatprep.mubr.bf16.mxu0 %v8787_v34  ;;  %2565 = vmatprep.mubr.bf16.mxu1 %v8787_v34 }
 0x2fd   : > { %2495 = vmatpush1.bf16.msra.mxu0 %v7614_v46  ;;  %2536 = vmatpush1.bf16.msra.mxu1 %v7617_v47 }
 0x2fe   : > { %2496 = vmatprep.subr.bf16.mxu0 %v7624_v48  ;;  %2537 = vmatprep.subr.bf16.mxu1 %v7627_v49  ;;  %v2207_v48 = vld [vmem:[%s7230_s24] sm:$0xf] }
 0x2ff   : > { %v2212_v49 = vrot.slane %v2207_v48, %v7535_v12 }
 0x301   : > { %2497 = vmatpush1.bf16.msra.mxu0 %v7630_v50  ;;  %2538 = vmatpush1.bf16.msra.mxu1 %v7633_v51 }
 0x302   : > { %2498 = vmatprep.subr.bf16.mxu0 %v7640_v52  ;;  %2539 = vmatprep.subr.bf16.mxu1 %v7643_v53  ;;  %v8796_v53 = vld [vmem:[#allocation25_spill] sm:$0xff] }
 0x305   : > { %2499 = vmatpush1.bf16.msra.mxu0 %v7646_v54  ;;  %2540 = vmatpush1.bf16.msra.mxu1 %v7649_v55  ;;  %v2216_v54 = vrot.slane %v2207_v48, %v8796_v53 }
 0x306   : > { %2500 = vmatprep.subr.bf16.mxu0 %v7656_v56  ;;  %2541 = vmatprep.subr.bf16.mxu1 %v7659_v57 }
 0x309   : > { %2501 = vmatpush1.bf16.msra.mxu0 %v7662_v59  ;;  %2542 = vmatpush1.bf16.msra.mxu1 %v7665_v60 }
 0x30a   : > { %2502 = vmatprep.subr.bf16.mxu0 %v7672_v61  ;;  %2543 = vmatprep.subr.bf16.mxu1 %v7675_v62 }
 0x30d   : > { %2503 = vmatpush1.bf16.msra.mxu0 %v7678_v63  ;;  %2544 = vmatpush1.bf16.msra.mxu1 %v7681_v1 }
 0x30e   : > { %2504 = vmatprep.subr.bf16.mxu0 %v7688_v37  ;;  %2545 = vmatprep.subr.bf16.mxu1 %v7691_v26 }
 0x311   : > { %2505 = vmatpush1.bf16.msra.mxu0 %v7694_v27  ;;  %2546 = vmatpush1.bf16.msra.mxu1 %v7697_v29  ;;  %v2224_v29 = vrot.slane %v2207_v48, %v7542_v28 }
 0x312   : > { %2506 = vmatprep.subr.bf16.mxu0 %v7702_v30  ;;  %2547 = vmatprep.subr.bf16.mxu1 %v7713_v33 }
 0x315   : > { %2507 = vmatpush1.bf16.msra.mxu0 %v7707_v31  ;;  %2548 = vmatpush1.bf16.msra.mxu1 %v7710_v32  ;;  %v2220_v32 = vrot.slane %v2207_v48, %v7545_v35 }
 0x316   : > { %2734 = vmatprep.subr.bf16.mxu0 %v7717_v36  ;;  %2775 = vmatprep.subr.bf16.mxu1 %v7720_v58 }
 0x398   : > { %v1917_v41 = vpop.f32.mrf.mxu0  ;;  %v1958_v42 = vpop.f32.mrf.mxu1 }
 0x39a   : > { %v1919_v43 = vpop.f32.mrf.mxu0  ;;  %v1960_v0 = vpop.f32.mrf.mxu1 }
 0x39c   : > { %v1921_v44 = vpop.f32.mrf.mxu0  ;;  %v1962_v45 = vpop.f32.mrf.mxu1 }
 0x39e   : > { %v1922_v46 = vpop.f32.mrf.mxu0  ;;  %v1963_v47 = vpop.f32.mrf.mxu1 }
 0x39f   : > { %v2252_v47 = vld [vmem:[#allocation3] sm:$0x3] }
 0x3b8   : > { %v2159_v50 = vpop.f32.mrf.mxu0  ;;  %v2200_v51 = vpop.f32.mrf.mxu1 }
 0x3b9   : > { %v2160_v52 = vadd.f32 %v2159_v50, %v1917_v41  ;;  %v2201_v31 = vadd.f32 %v2200_v51, %v1958_v42 }
 0x3ba   : > { %v2161_v55 = vpop.f32.mrf.mxu0  ;;  %v2202_v56 = vpop.f32.mrf.mxu1 }
 0x3bb   : > { %v2229_v57 = vadd.f32 %v2212_v49, %v2160_v52  ;;  %v2162_v59 = vadd.f32 %v2161_v55, %v1919_v43  ;;  %v2203_v27 = vadd.f32 %v2202_v56, %v1960_v0  ;;  %v2231_v58 = vadd.f32 %v2220_v32, %v2201_v31  ;;  %v8058_v31 = vld [vmem:[%s7227_s16 + $0x8] ss:$16 sps:$4 sm:$0xff]   ;;  %v8061_v32 = vld [vmem:[%s7227_s16 + $0xc] ss:$16 sps:$4 sm:$0xff]  }
 0x3bc   : > { %v2163_v60 = vpop.f32.mrf.mxu0  ;;  %v2204_v61 = vpop.f32.mrf.mxu1 }
 0x3bd   : > { %v5809_v62 = vmul.f32 -1.442695, %v2229_v57  ;;  %v2230_v63 = vadd.f32 %v2216_v54, %v2162_v59  ;;  %v2232_v30 = vadd.f32 %v2224_v29, %v2203_v27  ;;  %v8013_v59 = vld [vmem:[%s7227_s16 + $0x68] ss:$16 sps:$4 sm:$0xff]   ;;  %v8020_v60 = vld [vmem:[%s7227_s16 + $0x44] ss:$16 sps:$4 sm:$0xff]  }
 0x3be   : > { %v2164_v1 = vpop.f32.mrf.mxu0  ;;  %v2205_v37 = vpop.f32.mrf.mxu1  ;;  %v8023_v61 = vld [vmem:[%s7227_s16 + $0x4c] ss:$16 sps:$4 sm:$0xff]   ;;  %v8045_v27 = vld [vmem:[%s7227_s16 + $0x28] ss:$16 sps:$4 sm:$0xff]   ;;  %v8050_v29 = vld [vmem:[%s7227_s16 + $0x4] ss:$16 sps:$4 sm:$0xff]  }
 0x3bf   : > { %6677 = vpow2.f32 %v5809_v62  ;;  %v5810_v26 = vmul.f32 -1.442695, %v2230_v63  ;;  %v5811_v33 = vmul.f32 -1.442695, %v2232_v30  ;;  %v8026_v62 = vld [vmem:[%s7227_s16 + $0x40] ss:$16 sps:$4 sm:$0xff]  }
 0x3c0   : > { %v8029_v63 = vld [vmem:[%s7227_s16 + $0x48] ss:$16 sps:$4 sm:$0xff]   ;;  %v8036_v1 = vld [vmem:[%s7227_s16 + $0x24] ss:$16 sps:$4 sm:$0xff]   ;;  %v8039_v37 = vld [vmem:[%s7227_s16 + $0x2c] ss:$16 sps:$4 sm:$0xff]  }
 0x3c1   : > { %6679 = vpow2.f32 %v5810_v26  ;;  %v8042_v26 = vld [vmem:[%s7227_s16 + $0x20] ss:$16 sps:$4 sm:$0xff]  }
 0x3c2   : > { %6681 = vpow2.f32 %v5811_v33  ;;  %v8055_v30 = vld [vmem:[%s7227_s16] ss:$16 sps:$4 sm:$0xff]   ;;  %v8065_v33 = vld [vmem:[%s7220_s25 + $0xe4] ss:$16 sps:$4 sm:$0xff]  }
 0x3cc   : > { %v6678_v36 = vpop.eup %6677 }
 0x3cd   : > { %v2236_v25 = vadd.f32 1.0, %v6678_v36  ;;  %v8068_v36 = vld [vmem:[%s7220_s25 + $0xec] ss:$16 sps:$4 sm:$0xff]  }
 0x3ce   : > { %v6680_v41 = vpop.eup %6679 }
 0x3cf   : > { %6683 = vrcp.f32 %v2236_v25  ;;  %v2242_v43 = vadd.f32 1.0, %v6680_v41  ;;  %v6682_v44 = vpop.eup %6681 }
 0x3d0   : > { %6685 = vtanh.f32 %v2231_v58  ;;  %v2249_v42 = vadd.f32 1.0, %v6682_v44 }
 0x3d1   : > { %6687 = vrcp.f32 %v2242_v43 }
 0x3d2   : > { %6689 = vrcp.f32 %v2249_v42 }
 0x3dc   : > { %v6684_v0 = vpop.eup %6683 }
 0x3dd   : > { %v6686_v45 = vpop.eup %6685 }
 0x3de   : > { %v6688_v46 = vpop.eup %6687  ;;  %v2254_v49 = vmul.f32 %v6686_v45, %v6684_v0 }
 0x3df   : > { %v2253_v48 = vmul.f32 %v6688_v46, %v2252_v47  ;;  %v6690_v51 = vpop.eup %6689  ;;  %v2816_v47 = vld [vmem:[%s7230_s24] sm:$0xf] }
 0x3e0   : > { %v2821_v42 = vrot.slane %v2816_v47, %v7535_v12 }
 0x3e1   : > { %v2255_v50 = vadd.f32 %v2254_v49, %v2253_v48 }
 0x3e3   : > { %6691 = vtanh.f32 %v2255_v50  ;;  %2258 = vst [vmem:[#allocation3] sm:$0x3] %v2255_v50 }
 0x3f0   : > { %v6692_v52 = vpop.eup %6691 }
 0x3f1   : > { %v2257_v54 = vmul.f32 %v6692_v52, %v6690_v51  ;;  %v2825_v51 = vrot.slane %v2816_v47, %v8796_v53 }
 0x3f3   : > { %2259 = vst [vmem:[#allocation2] sm:$0x3] %v2257_v54  ;;  %v2260_v55 = vpack.c.bf16 %v2257_v54, %v2257_v54 }
 0x3f5   : > { %5812 = vst [vmem:[%s5468_s15 + $0x2] sm:$0x1] %v2260_v55 }
 0x3fa   : > { %v2266_v56 = vld [vmem:[#allocation2] sm:$0x3] }
 0x3fb   : > { %v2299_v57 = vpack.c.bf16 %v2266_v56, %v2266_v56 }
 0x3fd   : > { %2525 = vmatmul.mubr.bf16.vlgmr.msra.gmra.mxu0 %v2299_v57  ;;  %2566 = vmatmul.mubr.bf16.vlgmr.msra.gmra.mxu1 %v2299_v57 }
 0x3fe   : > { %2735 = vmatpush1.bf16.msra.mxu0 %v7736_v38  ;;  %2776 = vmatpush1.bf16.msra.mxu1 %v7739_v39  ;;  %v8797_v38 = vld [vmem:[#allocation23_spill] sm:$0xff]  ;;  %v8798_v39 = vld [vmem:[#allocation24_spill] sm:$0xff] }
 0x3ff   : > { %2736 = vmatprep.subr.bf16.mxu0 %v7742_v9  ;;  %2777 = vmatprep.subr.bf16.mxu1 %v7745_v10  ;;  %v8799_v9 = vld [vmem:[#allocation26_spill] sm:$0xff]  ;;  %v8800_v10 = vld [vmem:[#allocation27_spill] sm:$0xff] }
 0x400   : > { %2766 = vmatprep.mubr.bf16.mxu0 %v8787_v34  ;;  %2807 = vmatprep.mubr.bf16.mxu1 %v8787_v34 }
 0x402   : > { %2737 = vmatpush1.bf16.msra.mxu0 %v7750_v2  ;;  %2778 = vmatpush1.bf16.msra.mxu1 %v7753_v5  ;;  %v8801_v2 = vld [vmem:[#allocation28_spill] sm:$0xff]  ;;  %v5813_v5 = vld [vmem:[%s5470_s1 + $0x3] sm:$0x1] }
 0x403   : > { %2738 = vmatprep.subr.bf16.mxu0 %v7758_v16  ;;  %2779 = vmatprep.subr.bf16.mxu1 %v7761_v11  ;;  %v7940_v16 = vld [vmem:[%s7227_s16 + $0xe4] ss:$16 sps:$4 sm:$0xff]   ;;  %v7943_v11 = vld [vmem:[%s7227_s16 + $0xec] ss:$16 sps:$4 sm:$0xff]  }
 0x406   : > { %2739 = vmatpush1.bf16.msra.mxu0 %v7768_v6  ;;  %2780 = vmatpush1.bf16.msra.mxu1 %v7771_v3  ;;  %v7946_v6 = vld [vmem:[%s7227_s16 + $0xe0] ss:$16 sps:$4 sm:$0xff]   ;;  %v7949_v3 = vld [vmem:[%s7227_s16 + $0xe8] ss:$16 sps:$4 sm:$0xff]  }
 0x407   : > { %2740 = vmatprep.subr.bf16.mxu0 %v7776_v17  ;;  %2781 = vmatprep.subr.bf16.mxu1 %v7779_v13  ;;  %v7956_v17 = vld [vmem:[%s7227_s16 + $0xc4] ss:$16 sps:$4 sm:$0xff]   ;;  %v7959_v13 = vld [vmem:[%s7227_s16 + $0xcc] ss:$16 sps:$4 sm:$0xff]  }
 0x40a   : > { %2741 = vmatpush1.bf16.msra.mxu0 %v7784_v7  ;;  %2782 = vmatpush1.bf16.msra.mxu1 %v7787_v19  ;;  %v7962_v7 = vld [vmem:[%s7227_s16 + $0xc0] ss:$16 sps:$4 sm:$0xff]   ;;  %v7965_v19 = vld [vmem:[%s7227_s16 + $0xc8] ss:$16 sps:$4 sm:$0xff]  }
 0x40b   : > { %2742 = vmatprep.subr.bf16.mxu0 %v7792_v20  ;;  %2783 = vmatprep.subr.bf16.mxu1 %v7795_v4  ;;  %v7972_v20 = vld [vmem:[%s7227_s16 + $0xa4] ss:$16 sps:$4 sm:$0xff]   ;;  %v7975_v4 = vld [vmem:[%s7227_s16 + $0xac] ss:$16 sps:$4 sm:$0xff]  }
 0x40e   : > { %2743 = vmatpush1.bf16.msra.mxu0 %v7800_v15  ;;  %2784 = vmatpush1.bf16.msra.mxu1 %v7803_v18  ;;  %v7978_v15 = vld [vmem:[%s7227_s16 + $0xa0] ss:$16 sps:$4 sm:$0xff]   ;;  %v7981_v18 = vld [vmem:[%s7227_s16 + $0xa8] ss:$16 sps:$4 sm:$0xff]  }
 0x40f   : > { %2744 = vmatprep.subr.bf16.mxu0 %v8797_v38  ;;  %2785 = vmatprep.subr.bf16.mxu1 %v8798_v39 }
 0x412   : > { %2745 = vmatpush1.bf16.msra.mxu0 %v8799_v9  ;;  %2786 = vmatpush1.bf16.msra.mxu1 %v8800_v10 }
 0x413   : > { %2746 = vmatprep.subr.bf16.mxu0 %v7824_v24  ;;  %2787 = vmatprep.subr.bf16.mxu1 %v8801_v2  ;;  %v8004_v24 = vld [vmem:[%s7227_s16 + $0x64] ss:$16 sps:$4 sm:$0xff]  }
 0x416   : > { %2747 = vmatpush1.bf16.msra.mxu0 %v7832_v40  ;;  %2788 = vmatpush1.bf16.msra.mxu1 %v7835_v8  ;;  %v8007_v40 = vld [vmem:[%s7227_s16 + $0x6c] ss:$16 sps:$4 sm:$0xff]   ;;  %v8010_v8 = vld [vmem:[%s7227_s16 + $0x60] ss:$16 sps:$4 sm:$0xff]  }
 0x417   : > { %2748 = vmatprep.subr.bf16.mxu0 %v7840_v21  ;;  %2789 = vmatprep.subr.bf16.mxu1 %v7843_v14  ;;  %v7988_v21 = vld [vmem:[%s7227_s16 + $0x84] ss:$16 sps:$4 sm:$0xff]   ;;  %v7991_v14 = vld [vmem:[%s7227_s16 + $0x8c] ss:$16 sps:$4 sm:$0xff]  }
 0x41a   : > { %2749 = vmatpush1.bf16.msra.mxu0 %v7849_v22  ;;  %2790 = vmatpush1.bf16.msra.mxu1 %v7852_v23  ;;  %v7994_v22 = vld [vmem:[%s7227_s16 + $0x80] ss:$16 sps:$4 sm:$0xff]   ;;  %v7997_v23 = vld [vmem:[%s7227_s16 + $0x88] ss:$16 sps:$4 sm:$0xff]  }
 0x41b   : > { %3101 = vmatprep.subr.bf16.mxu0 %v7940_v16  ;;  %3142 = vmatprep.subr.bf16.mxu1 %v7943_v11 }
 0x41d   : > { %2767 = vmatmul.mubr.bf16.vlgmr.msra.gmra.mxu0 %v5813_v5  ;;  %2808 = vmatmul.mubr.bf16.vlgmr.msra.gmra.mxu1 %v5813_v5 }
 0x41e   : > { %3133 = vmatprep.mubr.bf16.mxu0 %v8787_v34  ;;  %3174 = vmatprep.mubr.bf16.mxu1 %v8787_v34 }
 0x41f   : > { %3102 = vmatpush1.bf16.msra.mxu0 %v7946_v6  ;;  %3143 = vmatpush1.bf16.msra.mxu1 %v7949_v3 }
 0x420   : > { %3103 = vmatprep.subr.bf16.mxu0 %v7956_v17  ;;  %3144 = vmatprep.subr.bf16.mxu1 %v7959_v13 }
 0x423   : > { %3104 = vmatpush1.bf16.msra.mxu0 %v7962_v7  ;;  %3145 = vmatpush1.bf16.msra.mxu1 %v7965_v19 }
 0x424   : > { %3105 = vmatprep.subr.bf16.mxu0 %v7972_v20  ;;  %3146 = vmatprep.subr.bf16.mxu1 %v7975_v4 }
 0x427   : > { %3106 = vmatpush1.bf16.msra.mxu0 %v7978_v15  ;;  %3147 = vmatpush1.bf16.msra.mxu1 %v7981_v18 }
 0x428   : > { %3107 = vmatprep.subr.bf16.mxu0 %v7988_v21  ;;  %3148 = vmatprep.subr.bf16.mxu1 %v7991_v14 }
 0x42b   : > { %3108 = vmatpush1.bf16.msra.mxu0 %v7994_v22  ;;  %3149 = vmatpush1.bf16.msra.mxu1 %v7997_v23 }
 0x42c   : > { %3109 = vmatprep.subr.bf16.mxu0 %v8004_v24  ;;  %3150 = vmatprep.subr.bf16.mxu1 %v8007_v40 }
 0x42f   : > { %3110 = vmatpush1.bf16.msra.mxu0 %v8010_v8  ;;  %3151 = vmatpush1.bf16.msra.mxu1 %v8013_v59 }
 0x430   : > { %3111 = vmatprep.subr.bf16.mxu0 %v8020_v60  ;;  %3152 = vmatprep.subr.bf16.mxu1 %v8023_v61 }
 0x433   : > { %3112 = vmatpush1.bf16.msra.mxu0 %v8026_v62  ;;  %3153 = vmatpush1.bf16.msra.mxu1 %v8029_v63 }
 0x434   : > { %3113 = vmatprep.subr.bf16.mxu0 %v8036_v1  ;;  %3154 = vmatprep.subr.bf16.mxu1 %v8039_v37 }
 0x437   : > { %3114 = vmatpush1.bf16.msra.mxu0 %v8042_v26  ;;  %3155 = vmatpush1.bf16.msra.mxu1 %v8045_v27 }
 0x438   : > { %3115 = vmatprep.subr.bf16.mxu0 %v8050_v29  ;;  %3156 = vmatprep.subr.bf16.mxu1 %v8061_v32 }
 0x43b   : > { %3116 = vmatpush1.bf16.msra.mxu0 %v8055_v30  ;;  %3157 = vmatpush1.bf16.msra.mxu1 %v8058_v31 }
 0x43c   : > { %3343 = vmatprep.subr.bf16.mxu0 %v8065_v33  ;;  %3384 = vmatprep.subr.bf16.mxu1 %v8068_v36 }
 0x4bd   : > { %v2526_v58 = vpop.f32.mrf.mxu0  ;;  %v2567_v25 = vpop.f32.mrf.mxu1 }
 0x4bf   : > { %v2528_v41 = vpop.f32.mrf.mxu0  ;;  %v2569_v43 = vpop.f32.mrf.mxu1 }
 0x4c1   : > { %v2530_v44 = vpop.f32.mrf.mxu0  ;;  %v2571_v0 = vpop.f32.mrf.mxu1 }
 0x4c2   : > { %v2833_v0 = vrot.slane %v2816_v47, %v7542_v28 }
 0x4c3   : > { %v2531_v45 = vpop.f32.mrf.mxu0  ;;  %v2572_v46 = vpop.f32.mrf.mxu1 }
 0x4c4   : > { %v2829_v46 = vrot.slane %v2816_v47, %v7545_v35 }
 0x4dd   : > { %v2768_v49 = vpop.f32.mrf.mxu0  ;;  %v2809_v48 = vpop.f32.mrf.mxu1 }
 0x4de   : > { %v2769_v50 = vadd.f32 %v2768_v49, %v2526_v58  ;;  %v2810_v58 = vadd.f32 %v2809_v48, %v2567_v25  ;;  %v2861_v25 = vld [vmem:[#allocation3] sm:$0x3] }
 0x4df   : > { %v2770_v52 = vpop.f32.mrf.mxu0  ;;  %v2811_v54 = vpop.f32.mrf.mxu1 }
 0x4e0   : > { %v2838_v55 = vadd.f32 %v2821_v42, %v2769_v50  ;;  %v2771_v56 = vadd.f32 %v2770_v52, %v2528_v41  ;;  %v2812_v44 = vadd.f32 %v2811_v54, %v2569_v43  ;;  %v2840_v42 = vadd.f32 %v2829_v46, %v2810_v58  ;;  %v8097_v58 = vld [vmem:[%s7220_s25 + $0xc0] ss:$16 sps:$4 sm:$0xff]   ;;  %v8100_v46 = vld [vmem:[%s7220_s25 + $0xc8] ss:$16 sps:$4 sm:$0xff]  }
 0x4e1   : > { %v2772_v57 = vpop.f32.mrf.mxu0  ;;  %v2813_v38 = vpop.f32.mrf.mxu1 }
 0x4e2   : > { %v5878_v39 = vmul.f32 -1.442695, %v2838_v55  ;;  %v2839_v9 = vadd.f32 %v2825_v51, %v2771_v56  ;;  %v2841_v45 = vadd.f32 %v2833_v0, %v2812_v44  ;;  %v8089_v0 = vld [vmem:[%s7220_s25 + $0xc4] ss:$16 sps:$4 sm:$0xff]  }
 0x4e3   : > { %v2773_v10 = vpop.f32.mrf.mxu0  ;;  %v2814_v2 = vpop.f32.mrf.mxu1 }
 0x4e4   : > { %6693 = vpow2.f32 %v5878_v39  ;;  %v5879_v5 = vmul.f32 -1.442695, %v2839_v9  ;;  %v5880_v49 = vmul.f32 -1.442695, %v2841_v45  ;;  %v8083_v10 = vld [vmem:[%s7220_s25 + $0xe0] ss:$16 sps:$4 sm:$0xff]  }
 0x4e5   : > { %v8086_v2 = vld [vmem:[%s7220_s25 + $0xe8] ss:$16 sps:$4 sm:$0xff]   ;;  %v8092_v45 = vld [vmem:[%s7220_s25 + $0xcc] ss:$16 sps:$4 sm:$0xff]  }
 0x4e6   : > { %6695 = vpow2.f32 %v5879_v5 }
 0x4e7   : > { %6697 = vpow2.f32 %v5880_v49  ;;  %v8105_v49 = vld [vmem:[%s7220_s25 + $0xa4] ss:$16 sps:$4 sm:$0xff]  }
 0x4f1   : > { %v6694_v53 = vpop.eup %6693 }
 0x4f2   : > { %v2845_v41 = vadd.f32 1.0, %v6694_v53 }
 0x4f3   : > { %v6696_v50 = vpop.eup %6695 }
 0x4f4   : > { %6699 = vrcp.f32 %v2845_v41  ;;  %v2851_v51 = vadd.f32 1.0, %v6696_v50  ;;  %v6698_v52 = vpop.eup %6697  ;;  %v8115_v41 = vld [vmem:[%s7220_s25 + $0xa0] ss:$16 sps:$4 sm:$0xff]   ;;  %v8118_v50 = vld [vmem:[%s7220_s25 + $0xa8] ss:$16 sps:$4 sm:$0xff]  }
 0x4f5   : > { %6701 = vtanh.f32 %v2840_v42  ;;  %v2858_v47 = vadd.f32 1.0, %v6698_v52  ;;  %v8108_v42 = vld [vmem:[%s7220_s25 + $0xac] ss:$16 sps:$4 sm:$0xff]  }
 0x4f6   : > { %6703 = vrcp.f32 %v2851_v51  ;;  %v8123_v51 = vld [vmem:[%s7220_s25 + $0x84] ss:$16 sps:$4 sm:$0xff]   ;;  %v8126_v52 = vld [vmem:[%s7220_s25 + $0x8c] ss:$16 sps:$4 sm:$0xff]  }
 0x4f7   : > { %6705 = vrcp.f32 %v2858_v47  ;;  %v8147_v47 = vld [vmem:[%s7220_s25 + $0x60] ss:$16 sps:$4 sm:$0xff]  }
 0x501   : > { %v6700_v43 = vpop.eup %6699 }
 0x502   : > { %v6702_v54 = vpop.eup %6701 }
 0x503   : > { %v6704_v55 = vpop.eup %6703  ;;  %v2863_v48 = vmul.f32 %v6702_v54, %v6700_v43  ;;  %v8131_v43 = vld [vmem:[%s7220_s25 + $0x80] ss:$16 sps:$4 sm:$0xff]   ;;  %v8134_v54 = vld [vmem:[%s7220_s25 + $0x88] ss:$16 sps:$4 sm:$0xff]  }
 0x504   : > { %v2862_v56 = vmul.f32 %v6704_v55, %v2861_v25  ;;  %v6706_v57 = vpop.eup %6705  ;;  %v8139_v55 = vld [vmem:[%s7220_s25 + $0x64] ss:$16 sps:$4 sm:$0xff]   ;;  %v8142_v25 = vld [vmem:[%s7220_s25 + $0x6c] ss:$16 sps:$4 sm:$0xff]  }
 0x506   : > { %v2864_v53 = vadd.f32 %v2863_v48, %v2862_v56  ;;  %v8150_v48 = vld [vmem:[%s7220_s25 + $0x68] ss:$16 sps:$4 sm:$0xff]   ;;  %v8155_v56 = vld [vmem:[%s7220_s25 + $0x44] ss:$16 sps:$4 sm:$0xff]  }
 0x507   : > { %8802 = vst [vmem:[#allocation23_spill] sm:$0xff] %v8155_v56 }
 0x508   : > { %6707 = vtanh.f32 %v2864_v53  ;;  %2867 = vst [vmem:[#allocation3] sm:$0x3] %v2864_v53  ;;  %v8158_v53 = vld [vmem:[%s7220_s25 + $0x4c] ss:$16 sps:$4 sm:$0xff]  }
 0x509   : > { %8803 = vst [vmem:[#allocation24_spill] sm:$0xff] %v8158_v53 }
 0x515   : > { %v6708_v38 = vpop.eup %6707 }
 0x516   : > { %v2866_v39 = vmul.f32 %v6708_v38, %v6706_v57  ;;  %v8163_v57 = vld [vmem:[%s7220_s25 + $0x40] ss:$16 sps:$4 sm:$0xff]   ;;  %v8166_v38 = vld [vmem:[%s7220_s25 + $0x48] ss:$16 sps:$4 sm:$0xff]  }
 0x517   : > { %8804 = vst [vmem:[#allocation26_spill] sm:$0xff] %v8163_v57  ;;  %8805 = vst [vmem:[#allocation27_spill] sm:$0xff] %v8166_v38 }
 0x518   : > { %v2869_v9 = vpack.c.bf16 %v2866_v39, %v2866_v39  ;;  %2868 = vst [vmem:[#allocation2] sm:$0x3] %v2866_v39  ;;  %v8171_v39 = vld [vmem:[%s7220_s25 + $0x24] ss:$16 sps:$4 sm:$0xff]  }
 0x51a   : > { %5881 = vst [vmem:[%s5472_s0 + $0x3] sm:$0x1] %v2869_v9  ;;  %v8174_v9 = vld [vmem:[%s7220_s25 + $0x2c] ss:$16 sps:$4 sm:$0xff]   ;;  %s6160_s0 = sshll.u32 %s6993_s21, 5 }
 0x51b   : > { %8806 = vst [vmem:[#allocation28_spill] sm:$0xff] %v8174_v9 }
 0x51f   : > { %v2875_v5 = vld [vmem:[#allocation2] sm:$0x3] }
 0x520   : > { %v2908_v44 = vpack.c.bf16 %v2875_v5, %v2875_v5  ;;  %v8179_v5 = vld [vmem:[%s7220_s25 + $0x20] ss:$16 sps:$4 sm:$0xff]  }
 0x522   : > { %3134 = vmatmul.mubr.bf16.vlgmr.msra.gmra.mxu0 %v2908_v44  ;;  %3175 = vmatmul.mubr.bf16.vlgmr.msra.gmra.mxu1 %v2908_v44  ;;  %v8182_v44 = vld [vmem:[%s7220_s25 + $0x28] ss:$16 sps:$4 sm:$0xff]  }
 0x523   : > { %3344 = vmatpush1.bf16.msra.mxu0 %v8083_v10  ;;  %3385 = vmatpush1.bf16.msra.mxu1 %v8086_v2 }
 0x524   : > { %3345 = vmatprep.subr.bf16.mxu0 %v8089_v0  ;;  %3386 = vmatprep.subr.bf16.mxu1 %v8092_v45 }
 0x525   : > { %3375 = vmatprep.mubr.bf16.mxu0 %v8787_v34  ;;  %3416 = vmatprep.mubr.bf16.mxu1 %v8787_v34 }
 0x527   : > { %3346 = vmatpush1.bf16.msra.mxu0 %v8097_v58  ;;  %3387 = vmatpush1.bf16.msra.mxu1 %v8100_v46 }
 0x528   : > { %3347 = vmatprep.subr.bf16.mxu0 %v8105_v49  ;;  %3388 = vmatprep.subr.bf16.mxu1 %v8108_v42 }
 0x52b   : > { %3348 = vmatpush1.bf16.msra.mxu0 %v8115_v41  ;;  %3389 = vmatpush1.bf16.msra.mxu1 %v8118_v50 }
 0x52c   : > { %3349 = vmatprep.subr.bf16.mxu0 %v8123_v51  ;;  %3390 = vmatprep.subr.bf16.mxu1 %v8126_v52 }
 0x52f   : > { %3350 = vmatpush1.bf16.msra.mxu0 %v8131_v43  ;;  %3391 = vmatpush1.bf16.msra.mxu1 %v8134_v54 }
 0x530   : > { %3351 = vmatprep.subr.bf16.mxu0 %v8139_v55  ;;  %3392 = vmatprep.subr.bf16.mxu1 %v8142_v25 }
 0x533   : > { %3352 = vmatpush1.bf16.msra.mxu0 %v8147_v47  ;;  %3393 = vmatpush1.bf16.msra.mxu1 %v8150_v48 }
 0x534   : > { %3353 = vmatprep.subr.bf16.mxu0 %v8155_v56  ;;  %3394 = vmatprep.subr.bf16.mxu1 %v8158_v53  ;;  %v8187_v56 = vld [vmem:[%s7220_s25 + $0x4] ss:$16 sps:$4 sm:$0xff]   ;;  %v8190_v53 = vld [vmem:[%s7220_s25 + $0xc] ss:$16 sps:$4 sm:$0xff]  }
 0x537   : > { %3354 = vmatpush1.bf16.msra.mxu0 %v8163_v57  ;;  %3395 = vmatpush1.bf16.msra.mxu1 %v8166_v38  ;;  %v8196_v57 = vld [vmem:[%s7220_s25] ss:$16 sps:$4 sm:$0xff]   ;;  %v8199_v38 = vld [vmem:[%s7220_s25 + $0x8] ss:$16 sps:$4 sm:$0xff]  }
 0x538   : > { %3355 = vmatprep.subr.bf16.mxu0 %v8171_v39  ;;  %3396 = vmatprep.subr.bf16.mxu1 %v8174_v9  ;;  %v2874_v9 = vld [vmem:[%s2873_s27] sm:$0x1]  ;;  %s5359_s27 = sshll.u32 %s8655_s10, 4  ;;  %s5360_s27 = int_to_ptr.vmem [resolvable:$true] %s5359_s27 }
 0x53b   : > { %3356 = vmatpush1.bf16.msra.mxu0 %v8179_v5  ;;  %3397 = vmatpush1.bf16.msra.mxu1 %v8182_v44 }
 0x53c   : > { %3357 = vmatprep.subr.bf16.mxu0 %v8187_v56  ;;  %3398 = vmatprep.subr.bf16.mxu1 %v8190_v53 }
 0x53f   : > { %3358 = vmatpush1.bf16.msra.mxu0 %v8196_v57  ;;  %3399 = vmatpush1.bf16.msra.mxu1 %v8199_v38 }
 0x540   : > { %3711 = vmatprep.subr.bf16.mxu0 %v7940_v16  ;;  %3752 = vmatprep.subr.bf16.mxu1 %v7943_v11 }
 0x542   : > { %3376 = vmatmul.mubr.bf16.vlgmr.msra.gmra.mxu0 %v2874_v9  ;;  %3417 = vmatmul.mubr.bf16.vlgmr.msra.gmra.mxu1 %v2874_v9 }
 0x543   : > { %3712 = vmatpush1.bf16.msra.mxu0 %v7946_v6  ;;  %3753 = vmatpush1.bf16.msra.mxu1 %v7949_v3 }
 0x544   : > { %3713 = vmatprep.subr.bf16.mxu0 %v7956_v17  ;;  %3754 = vmatprep.subr.bf16.mxu1 %v7959_v13 }
 0x545   : > { %3743 = vmatprep.mubr.bf16.mxu0 %v8787_v34  ;;  %3784 = vmatprep.mubr.bf16.mxu1 %v8787_v34 }
 0x547   : > { %3714 = vmatpush1.bf16.msra.mxu0 %v7962_v7  ;;  %3755 = vmatpush1.bf16.msra.mxu1 %v7965_v19 }
 0x548   : > { %3715 = vmatprep.subr.bf16.mxu0 %v7972_v20  ;;  %3756 = vmatprep.subr.bf16.mxu1 %v7975_v4  ;;  %v3425_v20 = vld [vmem:[%s7230_s24] sm:$0xf] }
 0x549   : > { %v3430_v4 = vrot.slane %v3425_v20, %v7535_v12 }
 0x54b   : > { %3716 = vmatpush1.bf16.msra.mxu0 %v7978_v15  ;;  %3757 = vmatpush1.bf16.msra.mxu1 %v7981_v18 }
 0x54c   : > { %3717 = vmatprep.subr.bf16.mxu0 %v7988_v21  ;;  %3758 = vmatprep.subr.bf16.mxu1 %v7991_v14  ;;  %v8807_v14 = vld [vmem:[#allocation25_spill] sm:$0xff] }
 0x54f   : > { %3718 = vmatpush1.bf16.msra.mxu0 %v7994_v22  ;;  %3759 = vmatpush1.bf16.msra.mxu1 %v7997_v23  ;;  %v3434_v22 = vrot.slane %v3425_v20, %v8807_v14 }
 0x550   : > { %3719 = vmatprep.subr.bf16.mxu0 %v8004_v24  ;;  %3760 = vmatprep.subr.bf16.mxu1 %v8007_v40 }
 0x553   : > { %3720 = vmatpush1.bf16.msra.mxu0 %v8010_v8  ;;  %3761 = vmatpush1.bf16.msra.mxu1 %v8013_v59 }
 0x554   : > { %3721 = vmatprep.subr.bf16.mxu0 %v8020_v60  ;;  %3762 = vmatprep.subr.bf16.mxu1 %v8023_v61 }
 0x557   : > { %3722 = vmatpush1.bf16.msra.mxu0 %v8026_v62  ;;  %3763 = vmatpush1.bf16.msra.mxu1 %v8029_v63 }
 0x558   : > { %3723 = vmatprep.subr.bf16.mxu0 %v8036_v1  ;;  %3764 = vmatprep.subr.bf16.mxu1 %v8039_v37 }
 0x55b   : > { %3724 = vmatpush1.bf16.msra.mxu0 %v8042_v26  ;;  %3765 = vmatpush1.bf16.msra.mxu1 %v8045_v27  ;;  %v3442_v27 = vrot.slane %v3425_v20, %v7542_v28 }
 0x55c   : > { %3725 = vmatprep.subr.bf16.mxu0 %v8050_v29  ;;  %3766 = vmatprep.subr.bf16.mxu1 %v8061_v32 }
 0x55f   : > { %3726 = vmatpush1.bf16.msra.mxu0 %v8055_v30  ;;  %3767 = vmatpush1.bf16.msra.mxu1 %v8058_v31  ;;  %v3438_v31 = vrot.slane %v3425_v20, %v7545_v35 }
 0x560   : > { %3953 = vmatprep.subr.bf16.mxu0 %v8065_v33  ;;  %3994 = vmatprep.subr.bf16.mxu1 %v8068_v36 }
 0x5e2   : > { %v3135_v16 = vpop.f32.mrf.mxu0  ;;  %v3176_v11 = vpop.f32.mrf.mxu1 }
 0x5e4   : > { %v3137_v6 = vpop.f32.mrf.mxu0  ;;  %v3178_v3 = vpop.f32.mrf.mxu1 }
 0x5e6   : > { %v3139_v17 = vpop.f32.mrf.mxu0  ;;  %v3180_v13 = vpop.f32.mrf.mxu1 }
 0x5e8   : > { %v3140_v7 = vpop.f32.mrf.mxu0  ;;  %v3181_v19 = vpop.f32.mrf.mxu1 }
 0x5e9   : > { %v3470_v19 = vld [vmem:[#allocation3] sm:$0x3] }
 0x602   : > { %v3377_v15 = vpop.f32.mrf.mxu0  ;;  %v3418_v18 = vpop.f32.mrf.mxu1 }
 0x603   : > { %v3378_v21 = vadd.f32 %v3377_v15, %v3135_v16  ;;  %v3419_v30 = vadd.f32 %v3418_v18, %v3176_v11 }
 0x604   : > { %v3379_v23 = vpop.f32.mrf.mxu0  ;;  %v3420_v24 = vpop.f32.mrf.mxu1 }
 0x605   : > { %v3447_v40 = vadd.f32 %v3430_v4, %v3378_v21  ;;  %v3380_v8 = vadd.f32 %v3379_v23, %v3137_v6  ;;  %v3421_v26 = vadd.f32 %v3420_v24, %v3178_v3  ;;  %v3449_v36 = vadd.f32 %v3438_v31, %v3419_v30  ;;  %v8407_v30 = vld [vmem:[%s7227_s16 + $0x8] ss:$16 sps:$4 sm:$0xff]   ;;  %v8410_v31 = vld [vmem:[%s7227_s16 + $0xc] ss:$16 sps:$4 sm:$0xff]  }
 0x606   : > { %v3381_v59 = vpop.f32.mrf.mxu0  ;;  %v3422_v60 = vpop.f32.mrf.mxu1 }
 0x607   : > { %v5946_v61 = vmul.f32 -1.442695, %v3447_v40  ;;  %v3448_v62 = vadd.f32 %v3434_v22, %v3380_v8  ;;  %v3450_v29 = vadd.f32 %v3442_v27, %v3421_v26  ;;  %v8362_v8 = vld [vmem:[%s7227_s16 + $0x68] ss:$16 sps:$4 sm:$0xff]   ;;  %v8369_v59 = vld [vmem:[%s7227_s16 + $0x44] ss:$16 sps:$4 sm:$0xff]  }
 0x608   : > { %v3382_v63 = vpop.f32.mrf.mxu0  ;;  %v3423_v1 = vpop.f32.mrf.mxu1  ;;  %v8372_v60 = vld [vmem:[%s7227_s16 + $0x4c] ss:$16 sps:$4 sm:$0xff]   ;;  %v8394_v26 = vld [vmem:[%s7227_s16 + $0x28] ss:$16 sps:$4 sm:$0xff]   ;;  %v8399_v27 = vld [vmem:[%s7227_s16 + $0x4] ss:$16 sps:$4 sm:$0xff]  }
 0x609   : > { %6709 = vpow2.f32 %v5946_v61  ;;  %v5947_v37 = vmul.f32 -1.442695, %v3448_v62  ;;  %v5948_v32 = vmul.f32 -1.442695, %v3450_v29  ;;  %v8375_v61 = vld [vmem:[%s7227_s16 + $0x40] ss:$16 sps:$4 sm:$0xff]  }
 0x60a   : > { %v8378_v62 = vld [vmem:[%s7227_s16 + $0x48] ss:$16 sps:$4 sm:$0xff]   ;;  %v8385_v63 = vld [vmem:[%s7227_s16 + $0x24] ss:$16 sps:$4 sm:$0xff]   ;;  %v8388_v1 = vld [vmem:[%s7227_s16 + $0x2c] ss:$16 sps:$4 sm:$0xff]  }
 0x60b   : > { %6711 = vpow2.f32 %v5947_v37  ;;  %v8391_v37 = vld [vmem:[%s7227_s16 + $0x20] ss:$16 sps:$4 sm:$0xff]  }
 0x60c   : > { %6713 = vpow2.f32 %v5948_v32  ;;  %v8404_v29 = vld [vmem:[%s7227_s16] ss:$16 sps:$4 sm:$0xff]   ;;  %v8414_v32 = vld [vmem:[%s7220_s25 + $0xe4] ss:$16 sps:$4 sm:$0xff]  }
 0x616   : > { %v6710_v33 = vpop.eup %6709 }
 0x617   : > { %v3454_v9 = vadd.f32 1.0, %v6710_v33  ;;  %v8417_v33 = vld [vmem:[%s7220_s25 + $0xec] ss:$16 sps:$4 sm:$0xff]  }
 0x618   : > { %v6712_v16 = vpop.eup %6711 }
 0x619   : > { %6715 = vrcp.f32 %v3454_v9  ;;  %v3460_v6 = vadd.f32 1.0, %v6712_v16  ;;  %v6714_v17 = vpop.eup %6713 }
 0x61a   : > { %6717 = vtanh.f32 %v3449_v36  ;;  %v3467_v11 = vadd.f32 1.0, %v6714_v17 }
 0x61b   : > { %6719 = vrcp.f32 %v3460_v6 }
 0x61c   : > { %6721 = vrcp.f32 %v3467_v11 }
 0x626   : > { %v6716_v3 = vpop.eup %6715 }
 0x627   : > { %v6718_v13 = vpop.eup %6717 }
 0x628   : > { %v6720_v7 = vpop.eup %6719  ;;  %v3472_v4 = vmul.f32 %v6718_v13, %v6716_v3 }
 0x629   : > { %v3471_v20 = vmul.f32 %v6720_v7, %v3470_v19  ;;  %v6722_v18 = vpop.eup %6721  ;;  %v4035_v19 = vld [vmem:[%s7230_s24] sm:$0xf] }
 0x62a   : > { %v4040_v11 = vrot.slane %v4035_v19, %v7535_v12 }
 0x62b   : > { %v3473_v15 = vadd.f32 %v3472_v4, %v3471_v20 }
 0x62d   : > { %6723 = vtanh.f32 %v3473_v15  ;;  %3476 = vst [vmem:[#allocation3] sm:$0x3] %v3473_v15 }
 0x63a   : > { %v6724_v21 = vpop.eup %6723 }
 0x63b   : > { %v3475_v22 = vmul.f32 %v6724_v21, %v6722_v18  ;;  %v4044_v18 = vrot.slane %v4035_v19, %v8807_v14 }
 0x63d   : > { %v3478_v23 = vpack.c.bf16 %v3475_v22, %v3475_v22  ;;  %3477 = vst [vmem:[#allocation2] sm:$0x3] %v3475_v22 }
 0x63f   : > { %3480 = vst [vmem:[%s3479_s26] sm:$0x1] %v3478_v23  ;;  %s6883_s26 = scalar_lea.vmem %s8652_s29, 128 }
 0x640   : > { %p6884_p8 = scmp.ne.s32.totalorder %s8652_s29, %s6883_s26 }
 0x642   : > { %p6885_p3 = pnand %p6884_p8, %p8824_p0 }
 0x644   : > { %v3485_v24 = vld [vmem:[#allocation2] sm:$0x3]  ;;  %p6886_p10 = pneg %p6885_p3 }
 0x645   : > { %v3518_v40 = vpack.c.bf16 %v3485_v24, %v3485_v24 }
 0x647   : > { %3744 = vmatmul.mubr.bf16.vlgmr.msra.gmra.mxu0 %v3518_v40  ;;  %3785 = vmatmul.mubr.bf16.vlgmr.msra.gmra.mxu1 %v3518_v40 }
 0x648   : > { %3954 = vmatpush1.bf16.msra.mxu0 %v8083_v10  ;;  %3995 = vmatpush1.bf16.msra.mxu1 %v8086_v2  ;;  %v8808_v10 = vld [vmem:[#allocation23_spill] sm:$0xff]  ;;  %v8809_v2 = vld [vmem:[#allocation24_spill] sm:$0xff] }
 0x649   : > { %3955 = vmatprep.subr.bf16.mxu0 %v8089_v0  ;;  %3996 = vmatprep.subr.bf16.mxu1 %v8092_v45  ;;  %v8810_v0 = vld [vmem:[#allocation26_spill] sm:$0xff]  ;;  %v8811_v45 = vld [vmem:[#allocation27_spill] sm:$0xff] }
 0x64a   : > { %3985 = vmatprep.mubr.bf16.mxu0 %v8787_v34  ;;  %4026 = vmatprep.mubr.bf16.mxu1 %v8787_v34 }
 0x64c   : > { %3956 = vmatpush1.bf16.msra.mxu0 %v8097_v58  ;;  %3997 = vmatpush1.bf16.msra.mxu1 %v8100_v46  ;;  %v8812_v58 = vld [vmem:[#allocation28_spill] sm:$0xff]  ;;  %v5949_v46 = vld [vmem:[%s5477_s30 + $0x5] sm:$0x1] }
 0x64d   : > { %3957 = vmatprep.subr.bf16.mxu0 %v8105_v49  ;;  %3998 = vmatprep.subr.bf16.mxu1 %v8108_v42  ;;  %v8289_v49 = vld [vmem:[%s7227_s16 + $0xe4] ss:$16 sps:$4 sm:$0xff]   ;;  %v8292_v42 = vld [vmem:[%s7227_s16 + $0xec] ss:$16 sps:$4 sm:$0xff]  }
 0x650   : > { %3958 = vmatpush1.bf16.msra.mxu0 %v8115_v41  ;;  %3999 = vmatpush1.bf16.msra.mxu1 %v8118_v50  ;;  %v8295_v41 = vld [vmem:[%s7227_s16 + $0xe0] ss:$16 sps:$4 sm:$0xff]   ;;  %v8298_v50 = vld [vmem:[%s7227_s16 + $0xe8] ss:$16 sps:$4 sm:$0xff]  }
 0x651   : > { %3959 = vmatprep.subr.bf16.mxu0 %v8123_v51  ;;  %4000 = vmatprep.subr.bf16.mxu1 %v8126_v52  ;;  %v8305_v51 = vld [vmem:[%s7227_s16 + $0xc4] ss:$16 sps:$4 sm:$0xff]   ;;  %v8308_v52 = vld [vmem:[%s7227_s16 + $0xcc] ss:$16 sps:$4 sm:$0xff]  }
 0x654   : > { %3960 = vmatpush1.bf16.msra.mxu0 %v8131_v43  ;;  %4001 = vmatpush1.bf16.msra.mxu1 %v8134_v54  ;;  %v8311_v43 = vld [vmem:[%s7227_s16 + $0xc0] ss:$16 sps:$4 sm:$0xff]   ;;  %v8314_v54 = vld [vmem:[%s7227_s16 + $0xc8] ss:$16 sps:$4 sm:$0xff]  }
 0x655   : > { %3961 = vmatprep.subr.bf16.mxu0 %v8139_v55  ;;  %4002 = vmatprep.subr.bf16.mxu1 %v8142_v25  ;;  %v8321_v55 = vld [vmem:[%s7227_s16 + $0xa4] ss:$16 sps:$4 sm:$0xff]   ;;  %v8324_v25 = vld [vmem:[%s7227_s16 + $0xac] ss:$16 sps:$4 sm:$0xff]  }
 0x658   : > { %3962 = vmatpush1.bf16.msra.mxu0 %v8147_v47  ;;  %4003 = vmatpush1.bf16.msra.mxu1 %v8150_v48  ;;  %v8327_v47 = vld [vmem:[%s7227_s16 + $0xa0] ss:$16 sps:$4 sm:$0xff]   ;;  %v8330_v48 = vld [vmem:[%s7227_s16 + $0xa8] ss:$16 sps:$4 sm:$0xff]  }
 0x659   : > { %3963 = vmatprep.subr.bf16.mxu0 %v8808_v10  ;;  %4004 = vmatprep.subr.bf16.mxu1 %v8809_v2 }
 0x65c   : > { %3964 = vmatpush1.bf16.msra.mxu0 %v8810_v0  ;;  %4005 = vmatpush1.bf16.msra.mxu1 %v8811_v45 }
 0x65d   : > { %3965 = vmatprep.subr.bf16.mxu0 %v8171_v39  ;;  %4006 = vmatprep.subr.bf16.mxu1 %v8812_v58  ;;  %v8353_v39 = vld [vmem:[%s7227_s16 + $0x64] ss:$16 sps:$4 sm:$0xff]  }
 0x660   : > { %3966 = vmatpush1.bf16.msra.mxu0 %v8179_v5  ;;  %4007 = vmatpush1.bf16.msra.mxu1 %v8182_v44  ;;  %v8356_v5 = vld [vmem:[%s7227_s16 + $0x6c] ss:$16 sps:$4 sm:$0xff]   ;;  %v8359_v44 = vld [vmem:[%s7227_s16 + $0x60] ss:$16 sps:$4 sm:$0xff]  }
 0x661   : > { %3967 = vmatprep.subr.bf16.mxu0 %v8187_v56  ;;  %4008 = vmatprep.subr.bf16.mxu1 %v8190_v53  ;;  %v8337_v56 = vld [vmem:[%s7227_s16 + $0x84] ss:$16 sps:$4 sm:$0xff]   ;;  %v8340_v53 = vld [vmem:[%s7227_s16 + $0x8c] ss:$16 sps:$4 sm:$0xff]  }
 0x664   : > { %3968 = vmatpush1.bf16.msra.mxu0 %v8196_v57  ;;  %4009 = vmatpush1.bf16.msra.mxu1 %v8199_v38  ;;  %v8343_v57 = vld [vmem:[%s7227_s16 + $0x80] ss:$16 sps:$4 sm:$0xff]   ;;  %v8346_v38 = vld [vmem:[%s7227_s16 + $0x88] ss:$16 sps:$4 sm:$0xff]   ;;  %s5480_s16 = scalar_lea.vmem %s7549_s20, %s5476_s9 [#allocation12]  ;;  %s7012_s9 = smov [#allocation12]  }
 0x665   : > { %4321 = vmatprep.subr.bf16.mxu0 %v8289_v49  ;;  %4362 = vmatprep.subr.bf16.mxu1 %v8292_v42  ;;  %s6887_s30 = sshll.u32 %s7012_s9, 4  ;;  %s6888_s30 = int_to_ptr.vmem [resolvable:$false] %s6887_s30 }
 0x666   : > { %p6890_p6 = scmp.lt.s32.totalorder %s8652_s29, %s6888_s30 }
 0x667   : > { %3986 = vmatmul.mubr.bf16.vlgmr.msra.gmra.mxu0 %v5949_v46  ;;  %4027 = vmatmul.mubr.bf16.vlgmr.msra.gmra.mxu1 %v5949_v46 }
 0x668   : > { %4353 = vmatprep.mubr.bf16.mxu0 %v8787_v34  ;;  %4394 = vmatprep.mubr.bf16.mxu1 %v8787_v34 }
 0x669   : > { %4322 = vmatpush1.bf16.msra.mxu0 %v8295_v41  ;;  %4363 = vmatpush1.bf16.msra.mxu1 %v8298_v50 }
 0x66a   : > { %4323 = vmatprep.subr.bf16.mxu0 %v8305_v51  ;;  %4364 = vmatprep.subr.bf16.mxu1 %v8308_v52 }
 0x66d   : > { %4324 = vmatpush1.bf16.msra.mxu0 %v8311_v43  ;;  %4365 = vmatpush1.bf16.msra.mxu1 %v8314_v54 }
 0x66e   : > { %4325 = vmatprep.subr.bf16.mxu0 %v8321_v55  ;;  %4366 = vmatprep.subr.bf16.mxu1 %v8324_v25 }
 0x671   : > { %4326 = vmatpush1.bf16.msra.mxu0 %v8327_v47  ;;  %4367 = vmatpush1.bf16.msra.mxu1 %v8330_v48 }
 0x672   : > { %4327 = vmatprep.subr.bf16.mxu0 %v8337_v56  ;;  %4368 = vmatprep.subr.bf16.mxu1 %v8340_v53 }
 0x675   : > { %4328 = vmatpush1.bf16.msra.mxu0 %v8343_v57  ;;  %4369 = vmatpush1.bf16.msra.mxu1 %v8346_v38 }
 0x676   : > { %4329 = vmatprep.subr.bf16.mxu0 %v8353_v39  ;;  %4370 = vmatprep.subr.bf16.mxu1 %v8356_v5 }
 0x679   : > { %4330 = vmatpush1.bf16.msra.mxu0 %v8359_v44  ;;  %4371 = vmatpush1.bf16.msra.mxu1 %v8362_v8 }
 0x67a   : > { %4331 = vmatprep.subr.bf16.mxu0 %v8369_v59  ;;  %4372 = vmatprep.subr.bf16.mxu1 %v8372_v60 }
 0x67d   : > { %4332 = vmatpush1.bf16.msra.mxu0 %v8375_v61  ;;  %4373 = vmatpush1.bf16.msra.mxu1 %v8378_v62 }
 0x67e   : > { %4333 = vmatprep.subr.bf16.mxu0 %v8385_v63  ;;  %4374 = vmatprep.subr.bf16.mxu1 %v8388_v1 }
 0x681   : > { %4334 = vmatpush1.bf16.msra.mxu0 %v8391_v37  ;;  %4375 = vmatpush1.bf16.msra.mxu1 %v8394_v26 }
 0x682   : > { %4335 = vmatprep.subr.bf16.mxu0 %v8399_v27  ;;  %4376 = vmatprep.subr.bf16.mxu1 %v8410_v31 }
 0x685   : > { %4336 = vmatpush1.bf16.msra.mxu0 %v8404_v29  ;;  %4377 = vmatpush1.bf16.msra.mxu1 %v8407_v30 }
 0x686   : > { %4563 = vmatprep.subr.bf16.mxu0 %v8414_v32  ;;  %4604 = vmatprep.subr.bf16.mxu1 %v8417_v33 }
 0x707   : > { %v3745_v36 = vpop.f32.mrf.mxu0  ;;  %v3786_v9 = vpop.f32.mrf.mxu1 }
 0x709   : > { %v3747_v16 = vpop.f32.mrf.mxu0  ;;  %v3788_v6 = vpop.f32.mrf.mxu1 }
 0x70b   : > { %v3749_v17 = vpop.f32.mrf.mxu0  ;;  %v3790_v3 = vpop.f32.mrf.mxu1 }
 0x70c   : > { %v4052_v3 = vrot.slane %v4035_v19, %v7542_v28 }
 0x70d   : > { %v3750_v13 = vpop.f32.mrf.mxu0  ;;  %v3791_v7 = vpop.f32.mrf.mxu1 }
 0x70e   : > { %v4048_v7 = vrot.slane %v4035_v19, %v7545_v35 }
 0x727   : > { %v3987_v4 = vpop.f32.mrf.mxu0  ;;  %v4028_v20 = vpop.f32.mrf.mxu1 }
 0x728   : > { %v3988_v15 = vadd.f32 %v3987_v4, %v3745_v36  ;;  %v4029_v36 = vadd.f32 %v4028_v20, %v3786_v9  ;;  %v4080_v9 = vld [vmem:[#allocation3] sm:$0x3] }
 0x729   : > { %v3989_v21 = vpop.f32.mrf.mxu0  ;;  %v4030_v22 = vpop.f32.mrf.mxu1 }
 0x72a   : > { %v4057_v23 = vadd.f32 %v4040_v11, %v3988_v15  ;;  %v3990_v24 = vadd.f32 %v3989_v21, %v3747_v16  ;;  %v4031_v17 = vadd.f32 %v4030_v22, %v3788_v6  ;;  %v4059_v11 = vadd.f32 %v4048_v7, %v4029_v36  ;;  %v8447_v36 = vld [vmem:[%s7220_s25 + $0xc0] ss:$16 sps:$4 sm:$0xff]   ;;  %v8450_v7 = vld [vmem:[%s7220_s25 + $0xc8] ss:$16 sps:$4 sm:$0xff]  }
 0x72b   : > { %v3991_v40 = vpop.f32.mrf.mxu0  ;;  %v4032_v10 = vpop.f32.mrf.mxu1 }
 0x72c   : > { %v6014_v2 = vmul.f32 -1.442695, %v4057_v23  ;;  %v4058_v0 = vadd.f32 %v4044_v18, %v3990_v24  ;;  %v4060_v13 = vadd.f32 %v4052_v3, %v4031_v17  ;;  %v8439_v3 = vld [vmem:[%s7220_s25 + $0xc4] ss:$16 sps:$4 sm:$0xff]  }
 0x72d   : > { %v3992_v45 = vpop.f32.mrf.mxu0  ;;  %v4033_v58 = vpop.f32.mrf.mxu1 }
 0x72e   : > { %6725 = vpow2.f32 %v6014_v2  ;;  %v6015_v46 = vmul.f32 -1.442695, %v4058_v0  ;;  %v6016_v4 = vmul.f32 -1.442695, %v4060_v13  ;;  %v8433_v45 = vld [vmem:[%s7220_s25 + $0xe0] ss:$16 sps:$4 sm:$0xff]  }
 0x72f   : > { %v8436_v58 = vld [vmem:[%s7220_s25 + $0xe8] ss:$16 sps:$4 sm:$0xff]   ;;  %v8442_v13 = vld [vmem:[%s7220_s25 + $0xcc] ss:$16 sps:$4 sm:$0xff]  }
 0x730   : > { %6727 = vpow2.f32 %v6015_v46 }
 0x731   : > { %6729 = vpow2.f32 %v6016_v4  ;;  %v8455_v4 = vld [vmem:[%s7220_s25 + $0xa4] ss:$16 sps:$4 sm:$0xff]  }
 0x73b   : > { %v6726_v14 = vpop.eup %6725 }
 0x73c   : > { %v4064_v16 = vadd.f32 1.0, %v6726_v14 }
 0x73d   : > { %v6728_v15 = vpop.eup %6727 }
 0x73e   : > { %6731 = vrcp.f32 %v4064_v16  ;;  %v4070_v18 = vadd.f32 1.0, %v6728_v15  ;;  %v6730_v21 = vpop.eup %6729  ;;  %v8465_v16 = vld [vmem:[%s7220_s25 + $0xa0] ss:$16 sps:$4 sm:$0xff]   ;;  %v8468_v15 = vld [vmem:[%s7220_s25 + $0xa8] ss:$16 sps:$4 sm:$0xff]  }
 0x73f   : > { %6733 = vtanh.f32 %v4059_v11  ;;  %v4077_v19 = vadd.f32 1.0, %v6730_v21  ;;  %v8458_v11 = vld [vmem:[%s7220_s25 + $0xac] ss:$16 sps:$4 sm:$0xff]  }
 0x740   : > { %6735 = vrcp.f32 %v4070_v18  ;;  %v8473_v18 = vld [vmem:[%s7220_s25 + $0x84] ss:$16 sps:$4 sm:$0xff]   ;;  %v8476_v21 = vld [vmem:[%s7220_s25 + $0x8c] ss:$16 sps:$4 sm:$0xff]  }
 0x741   : > { %6737 = vrcp.f32 %v4077_v19  ;;  %v8497_v19 = vld [vmem:[%s7220_s25 + $0x60] ss:$16 sps:$4 sm:$0xff]  }
 0x74b   : > { %v6732_v6 = vpop.eup %6731 }
 0x74c   : > { %v6734_v22 = vpop.eup %6733 }
 0x74d   : > { %v6736_v23 = vpop.eup %6735  ;;  %v4082_v20 = vmul.f32 %v6734_v22, %v6732_v6  ;;  %v8481_v6 = vld [vmem:[%s7220_s25 + $0x80] ss:$16 sps:$4 sm:$0xff]   ;;  %v8484_v22 = vld [vmem:[%s7220_s25 + $0x88] ss:$16 sps:$4 sm:$0xff]  }
 0x74e   : > { %v4081_v24 = vmul.f32 %v6736_v23, %v4080_v9  ;;  %v6738_v40 = vpop.eup %6737  ;;  %v8489_v23 = vld [vmem:[%s7220_s25 + $0x64] ss:$16 sps:$4 sm:$0xff]   ;;  %v8492_v9 = vld [vmem:[%s7220_s25 + $0x6c] ss:$16 sps:$4 sm:$0xff]  }
 0x750   : > { %v4083_v14 = vadd.f32 %v4082_v20, %v4081_v24  ;;  %v8500_v20 = vld [vmem:[%s7220_s25 + $0x68] ss:$16 sps:$4 sm:$0xff]   ;;  %v8505_v24 = vld [vmem:[%s7220_s25 + $0x44] ss:$16 sps:$4 sm:$0xff]  }
 0x751   : > { %8813 = vst [vmem:[#allocation23_spill] sm:$0xff] %v8505_v24 }
 0x752   : > { %6739 = vtanh.f32 %v4083_v14  ;;  %4086 = vst [vmem:[#allocation3] sm:$0x3] %v4083_v14  ;;  %v8508_v14 = vld [vmem:[%s7220_s25 + $0x4c] ss:$16 sps:$4 sm:$0xff]  }
 0x753   : > { %8814 = vst [vmem:[#allocation24_spill] sm:$0xff] %v8508_v14 }
 0x75f   : > { %v6740_v10 = vpop.eup %6739 }
 0x760   : > { %v4085_v2 = vmul.f32 %v6740_v10, %v6738_v40  ;;  %v8513_v40 = vld [vmem:[%s7220_s25 + $0x40] ss:$16 sps:$4 sm:$0xff]   ;;  %v8516_v10 = vld [vmem:[%s7220_s25 + $0x48] ss:$16 sps:$4 sm:$0xff]  }
 0x761   : > { %8815 = vst [vmem:[#allocation26_spill] sm:$0xff] %v8513_v40  ;;  %8816 = vst [vmem:[#allocation27_spill] sm:$0xff] %v8516_v10 }
 0x762   : > { %v4088_v0 = vpack.c.bf16 %v4085_v2, %v4085_v2  ;;  %4087 = vst [vmem:[#allocation2] sm:$0x3] %v4085_v2  ;;  %v8521_v2 = vld [vmem:[%s7220_s25 + $0x24] ss:$16 sps:$4 sm:$0xff]  }
 0x764   : > { %6017 = vst [vmem:[%s5480_s16 + $0x5] sm:$0x1] %v4088_v0  ;;  %v8524_v0 = vld [vmem:[%s7220_s25 + $0x2c] ss:$16 sps:$4 sm:$0xff]   ;;  %s6889_s16 = scalar_lea.vmem %s6888_s30, 256 }
 0x765   : > { %8817 = vst [vmem:[#allocation28_spill] sm:$0xff] %v8524_v0  ;;  %p6891_p5 = scmp.lt.s32.totalorder %s6889_s16, %s6883_s26 }
 0x767   : > { %p6892_p12 = por %p6891_p5, %p6890_p6 }
 0x769   : > { %v4095_v46 = vld [vmem:[#allocation2] sm:$0x3]  ;;  %p6893_p2 = pnand %p6892_p12, %p6886_p10 }
 0x76a   : > { %v4128_v17 = vpack.c.bf16 %v4095_v46, %v4095_v46  ;;  %v8529_v46 = vld [vmem:[%s7220_s25 + $0x20] ss:$16 sps:$4 sm:$0xff]  }
 0x76c   : > { %4354 = vmatmul.mubr.bf16.vlgmr.msra.gmra.mxu0 %v4128_v17  ;;  %4395 = vmatmul.mubr.bf16.vlgmr.msra.gmra.mxu1 %v4128_v17  ;;  %v8532_v17 = vld [vmem:[%s7220_s25 + $0x28] ss:$16 sps:$4 sm:$0xff]  }
 0x76d   : > { %4564 = vmatpush1.bf16.msra.mxu0 %v8433_v45  ;;  %4605 = vmatpush1.bf16.msra.mxu1 %v8436_v58 }
 0x76e   : > { %4565 = vmatprep.subr.bf16.mxu0 %v8439_v3  ;;  %4606 = vmatprep.subr.bf16.mxu1 %v8442_v13 }
 0x76f   : > { %4595 = vmatprep.mubr.bf16.mxu0 %v8787_v34  ;;  %4636 = vmatprep.mubr.bf16.mxu1 %v8787_v34 }
 0x771   : > { %4566 = vmatpush1.bf16.msra.mxu0 %v8447_v36  ;;  %4607 = vmatpush1.bf16.msra.mxu1 %v8450_v7 }
 0x772   : > { %4567 = vmatprep.subr.bf16.mxu0 %v8455_v4  ;;  %4608 = vmatprep.subr.bf16.mxu1 %v8458_v11 }
 0x775   : > { %4568 = vmatpush1.bf16.msra.mxu0 %v8465_v16  ;;  %4609 = vmatpush1.bf16.msra.mxu1 %v8468_v15 }
 0x776   : > { %4569 = vmatprep.subr.bf16.mxu0 %v8473_v18  ;;  %4610 = vmatprep.subr.bf16.mxu1 %v8476_v21 }
 0x779   : > { %4570 = vmatpush1.bf16.msra.mxu0 %v8481_v6  ;;  %4611 = vmatpush1.bf16.msra.mxu1 %v8484_v22 }
 0x77a   : > { %4571 = vmatprep.subr.bf16.mxu0 %v8489_v23  ;;  %4612 = vmatprep.subr.bf16.mxu1 %v8492_v9 }
 0x77d   : > { %4572 = vmatpush1.bf16.msra.mxu0 %v8497_v19  ;;  %4613 = vmatpush1.bf16.msra.mxu1 %v8500_v20 }
 0x77e   : > { %4573 = vmatprep.subr.bf16.mxu0 %v8505_v24  ;;  %4614 = vmatprep.subr.bf16.mxu1 %v8508_v14  ;;  %v8537_v24 = vld [vmem:[%s7220_s25 + $0x4] ss:$16 sps:$4 sm:$0xff]   ;;  %v8540_v14 = vld [vmem:[%s7220_s25 + $0xc] ss:$16 sps:$4 sm:$0xff]  }
 0x781   : > { %4574 = vmatpush1.bf16.msra.mxu0 %v8513_v40  ;;  %4615 = vmatpush1.bf16.msra.mxu1 %v8516_v10  ;;  %v8546_v40 = vld [vmem:[%s7220_s25] ss:$16 sps:$4 sm:$0xff]   ;;  %v8549_v10 = vld [vmem:[%s7220_s25 + $0x8] ss:$16 sps:$4 sm:$0xff]   ;;  %s5486_s25 = scalar_lea.vmem %s7549_s20, %s5482_s28 [#allocation12]  ;;  %s5317_s20 = scalar_lea.sflag [#allocation6], %s7217_s2 }
 0x782   : > { %4575 = vmatprep.subr.bf16.mxu0 %v8521_v2  ;;  %4616 = vmatprep.subr.bf16.mxu1 %v8524_v0  ;;  %v6018_v0 = vld [vmem:[%s5483_s11 + $0x6] sm:$0x1] }
 0x785   : > { %4576 = vmatpush1.bf16.msra.mxu0 %v8529_v46  ;;  %4617 = vmatpush1.bf16.msra.mxu1 %v8532_v17 }
 0x786   : > { %4577 = vmatprep.subr.bf16.mxu0 %v8537_v24  ;;  %4618 = vmatprep.subr.bf16.mxu1 %v8540_v14 }
 0x789   : > { %4578 = vmatpush1.bf16.msra.mxu0 %v8546_v40  ;;  %4619 = vmatpush1.bf16.msra.mxu1 %v8549_v10 }
 0x78a   : > { %4931 = vmatprep.subr.bf16.mxu0 %v8289_v49  ;;  %4972 = vmatprep.subr.bf16.mxu1 %v8292_v42 }
 0x78c   : > { %4596 = vmatmul.mubr.bf16.vlgmr.msra.gmra.mxu0 %v6018_v0  ;;  %4637 = vmatmul.mubr.bf16.vlgmr.msra.gmra.mxu1 %v6018_v0 }
 0x78d   : > { %4932 = vmatpush1.bf16.msra.mxu0 %v8295_v41  ;;  %4973 = vmatpush1.bf16.msra.mxu1 %v8298_v50 }
 0x78e   : > { %4933 = vmatprep.subr.bf16.mxu0 %v8305_v51  ;;  %4974 = vmatprep.subr.bf16.mxu1 %v8308_v52 }
 0x78f   : > { %4963 = vmatprep.mubr.bf16.mxu0 %v8787_v34  ;;  %5004 = vmatprep.mubr.bf16.mxu1 %v8787_v34 }
 0x791   : > { %4934 = vmatpush1.bf16.msra.mxu0 %v8311_v43  ;;  %4975 = vmatpush1.bf16.msra.mxu1 %v8314_v54 }
 0x792   : > { %4935 = vmatprep.subr.bf16.mxu0 %v8321_v55  ;;  %4976 = vmatprep.subr.bf16.mxu1 %v8324_v25  ;;  %v4645_v55 = vld [vmem:[%s7230_s24] sm:$0xf] }
 0x793   : > { %v4650_v25 = vrot.slane %v4645_v55, %v7535_v12 }
 0x795   : > { %4936 = vmatpush1.bf16.msra.mxu0 %v8327_v47  ;;  %4977 = vmatpush1.bf16.msra.mxu1 %v8330_v48 }
 0x796   : > { %4937 = vmatprep.subr.bf16.mxu0 %v8337_v56  ;;  %4978 = vmatprep.subr.bf16.mxu1 %v8340_v53  ;;  %v8818_v53 = vld [vmem:[#allocation25_spill] sm:$0xff] }
 0x799   : > { %4938 = vmatpush1.bf16.msra.mxu0 %v8343_v57  ;;  %4979 = vmatpush1.bf16.msra.mxu1 %v8346_v38  ;;  %v4654_v57 = vrot.slane %v4645_v55, %v8818_v53 }
 0x79a   : > { %4939 = vmatprep.subr.bf16.mxu0 %v8353_v39  ;;  %4980 = vmatprep.subr.bf16.mxu1 %v8356_v5 }
 0x79d   : > { %4940 = vmatpush1.bf16.msra.mxu0 %v8359_v44  ;;  %4981 = vmatpush1.bf16.msra.mxu1 %v8362_v8 }
 0x79e   : > { %4941 = vmatprep.subr.bf16.mxu0 %v8369_v59  ;;  %4982 = vmatprep.subr.bf16.mxu1 %v8372_v60 }
 0x7a1   : > { %4942 = vmatpush1.bf16.msra.mxu0 %v8375_v61  ;;  %4983 = vmatpush1.bf16.msra.mxu1 %v8378_v62 }
 0x7a2   : > { %4943 = vmatprep.subr.bf16.mxu0 %v8385_v63  ;;  %4984 = vmatprep.subr.bf16.mxu1 %v8388_v1 }
 0x7a5   : > { %4944 = vmatpush1.bf16.msra.mxu0 %v8391_v37  ;;  %4985 = vmatpush1.bf16.msra.mxu1 %v8394_v26  ;;  %v4662_v26 = vrot.slane %v4645_v55, %v7542_v28 }
 0x7a6   : > { %4945 = vmatprep.subr.bf16.mxu0 %v8399_v27  ;;  %4986 = vmatprep.subr.bf16.mxu1 %v8410_v31 }
 0x7a9   : > { %4946 = vmatpush1.bf16.msra.mxu0 %v8404_v29  ;;  %4987 = vmatpush1.bf16.msra.mxu1 %v8407_v30  ;;  %v4658_v30 = vrot.slane %v4645_v55, %v7545_v35 }
 0x7aa   : > { %5173 = vmatprep.subr.bf16.mxu0 %v8414_v32  ;;  %5214 = vmatprep.subr.bf16.mxu1 %v8417_v33 }
 0x82c   : > { %v4355_v49 = vpop.f32.mrf.mxu0  ;;  %v4396_v42 = vpop.f32.mrf.mxu1 }
 0x82e   : > { %v4357_v41 = vpop.f32.mrf.mxu0  ;;  %v4398_v50 = vpop.f32.mrf.mxu1 }
 0x830   : > { %v4359_v51 = vpop.f32.mrf.mxu0  ;;  %v4400_v52 = vpop.f32.mrf.mxu1 }
 0x832   : > { %v4360_v43 = vpop.f32.mrf.mxu0  ;;  %v4401_v54 = vpop.f32.mrf.mxu1 }
 0x833   : > { %v4690_v54 = vld [vmem:[#allocation3] sm:$0x3] }
 0x84c   : > { %v4597_v47 = vpop.f32.mrf.mxu0  ;;  %v4638_v48 = vpop.f32.mrf.mxu1 }
 0x84d   : > { %v4598_v56 = vadd.f32 %v4597_v47, %v4355_v49  ;;  %v4639_v29 = vadd.f32 %v4638_v48, %v4396_v42 }
 0x84e   : > { %v4599_v38 = vpop.f32.mrf.mxu0  ;;  %v4640_v39 = vpop.f32.mrf.mxu1 }
 0x84f   : > { %v4667_v5 = vadd.f32 %v4650_v25, %v4598_v56  ;;  %v4600_v44 = vadd.f32 %v4599_v38, %v4357_v41  ;;  %v4641_v37 = vadd.f32 %v4640_v39, %v4398_v50  ;;  %v4669_v33 = vadd.f32 %v4658_v30, %v4639_v29 }
 0x850   : > { %v4601_v8 = vpop.f32.mrf.mxu0  ;;  %v4642_v59 = vpop.f32.mrf.mxu1 }
 0x851   : > { %v6083_v60 = vmul.f32 -1.442695, %v4667_v5  ;;  %v4668_v61 = vadd.f32 %v4654_v57, %v4600_v44  ;;  %v4670_v27 = vadd.f32 %v4662_v26, %v4641_v37 }
 0x852   : > { %v4602_v62 = vpop.f32.mrf.mxu0  ;;  %v4643_v63 = vpop.f32.mrf.mxu1 }
 0x853   : > { %6741 = vpow2.f32 %v6083_v60  ;;  %v6084_v1 = vmul.f32 -1.442695, %v4668_v61  ;;  %v6085_v31 = vmul.f32 -1.442695, %v4670_v27 }
 0x855   : > { %6743 = vpow2.f32 %v6084_v1 }
 0x856   : > { %6745 = vpow2.f32 %v6085_v31 }
 0x860   : > { %v6742_v32 = vpop.eup %6741 }
 0x861   : > { %v4674_v0 = vadd.f32 1.0, %v6742_v32 }
 0x862   : > { %v6744_v49 = vpop.eup %6743 }
 0x863   : > { %6747 = vrcp.f32 %v4674_v0  ;;  %v4680_v41 = vadd.f32 1.0, %v6744_v49  ;;  %v6746_v51 = vpop.eup %6745 }
 0x864   : > { %6749 = vtanh.f32 %v4669_v33  ;;  %v4687_v42 = vadd.f32 1.0, %v6746_v51 }
 0x865   : > { %6751 = vrcp.f32 %v4680_v41 }
 0x866   : > { %6753 = vrcp.f32 %v4687_v42 }
 0x870   : > { %v6748_v50 = vpop.eup %6747 }
 0x871   : > { %v6750_v52 = vpop.eup %6749 }
 0x872   : > { %v6752_v43 = vpop.eup %6751  ;;  %v4692_v25 = vmul.f32 %v6750_v52, %v6748_v50 }
 0x873   : > { %v4691_v55 = vmul.f32 %v6752_v43, %v4690_v54  ;;  %v6754_v48 = vpop.eup %6753 }
 0x875   : > { %v4693_v47 = vadd.f32 %v4692_v25, %v4691_v55 }
 0x877   : > { %6755 = vtanh.f32 %v4693_v47  ;;  %4696 = vst [vmem:[#allocation3] sm:$0x3] %v4693_v47 }
 0x884   : > { %v6756_v56 = vpop.eup %6755 }
 0x885   : > { %v4695_v57 = vmul.f32 %v6756_v56, %v6754_v48 }
 0x887   : > { %v4698_v38 = vpack.c.bf16 %v4695_v57, %v4695_v57  ;;  %4697 = vst [vmem:[#allocation2] sm:$0x3] %v4695_v57 }
 0x889   : > { %6086 = vst [vmem:[%s5486_s25 + $0x6] sm:$0x1] %v4698_v38 }
 0x88e   : > { %v4705_v39 = vld [vmem:[#allocation2] sm:$0x3] }
 0x88f   : > { %v4738_v5 = vpack.c.bf16 %v4705_v39, %v4705_v39 }
 0x891   : > { %4964 = vmatmul.mubr.bf16.vlgmr.msra.gmra.mxu0 %v4738_v5  ;;  %5005 = vmatmul.mubr.bf16.vlgmr.msra.gmra.mxu1 %v4738_v5 }
 0x892   : > { %5174 = vmatpush1.bf16.msra.mxu0 %v8433_v45  ;;  %5215 = vmatpush1.bf16.msra.mxu1 %v8436_v58  ;;  %v8820_v45 = vld [vmem:[#allocation24_spill] sm:$0xff]  ;;  %v8821_v58 = vld [vmem:[#allocation26_spill] sm:$0xff] }
 0x893   : > { %5175 = vmatprep.subr.bf16.mxu0 %v8439_v3  ;;  %5216 = vmatprep.subr.bf16.mxu1 %v8442_v13  ;;  %v8822_v3 = vld [vmem:[#allocation27_spill] sm:$0xff]  ;;  %v8823_v13 = vld [vmem:[#allocation28_spill] sm:$0xff] }
 0x894   : > { %5205 = vmatprep.mubr.bf16.mxu0 %v8787_v34  ;;  %5246 = vmatprep.mubr.bf16.mxu1 %v8787_v34  ;;  %v8819_v34 = vld [vmem:[#allocation23_spill] sm:$0xff] }
 0x896   : > { %5176 = vmatpush1.bf16.msra.mxu0 %v8447_v36  ;;  %5217 = vmatpush1.bf16.msra.mxu1 %v8450_v7  ;;  %v6087_v36 = vld [vmem:[%s5489_s13 + $0x7] sm:$0x1] }
 0x897   : > { %5177 = vmatprep.subr.bf16.mxu0 %v8455_v4  ;;  %5218 = vmatprep.subr.bf16.mxu1 %v8458_v11 }
 0x89a   : > { %5178 = vmatpush1.bf16.msra.mxu0 %v8465_v16  ;;  %5219 = vmatpush1.bf16.msra.mxu1 %v8468_v15 }
 0x89b   : > { %5179 = vmatprep.subr.bf16.mxu0 %v8473_v18  ;;  %5220 = vmatprep.subr.bf16.mxu1 %v8476_v21 }
 0x89e   : > { %5180 = vmatpush1.bf16.msra.mxu0 %v8481_v6  ;;  %5221 = vmatpush1.bf16.msra.mxu1 %v8484_v22  ;;  %v5255_v22 = vld [vmem:[%s7230_s24] sm:$0xf]  ;;  %s6166_s24 = sshll.u32 %s6993_s21, 7 }
 0x89f   : > { %5181 = vmatprep.subr.bf16.mxu0 %v8489_v23  ;;  %5222 = vmatprep.subr.bf16.mxu1 %v8492_v9  ;;  %v5260_v23 = vrot.slane %v5255_v22, %v7535_v12  ;;  %v5272_v12 = vrot.slane %v5255_v22, %v7542_v28  ;;  %s8650_s1 = scalar_lea.hbm %s8735_s4, %s6166_s24 }
 0x8a2   : > { %5182 = vmatpush1.bf16.msra.mxu0 %v8497_v19  ;;  %5223 = vmatpush1.bf16.msra.mxu1 %v8500_v20 }
 0x8a3   : > { %5183 = vmatprep.subr.bf16.mxu0 %v8819_v34  ;;  %5224 = vmatprep.subr.bf16.mxu1 %v8820_v45 }
 0x8a6   : > { %5184 = vmatpush1.bf16.msra.mxu0 %v8821_v58  ;;  %5225 = vmatpush1.bf16.msra.mxu1 %v8822_v3 }
 0x8a7   : > { %5185 = vmatprep.subr.bf16.mxu0 %v8521_v2  ;;  %5226 = vmatprep.subr.bf16.mxu1 %v8823_v13 }
 0x8aa   : > { %5186 = vmatpush1.bf16.msra.mxu0 %v8529_v46  ;;  %5227 = vmatpush1.bf16.msra.mxu1 %v8532_v17 }
 0x8ab   : > { %5187 = vmatprep.subr.bf16.mxu0 %v8537_v24  ;;  %5228 = vmatprep.subr.bf16.mxu1 %v8540_v14  ;;  %v5264_v24 = vrot.slane %v5255_v22, %v8818_v53  ;;  %v5268_v53 = vrot.slane %v5255_v22, %v7545_v35  ;;  %v5300_v35 = vld [vmem:[#allocation3] sm:$0x3] }
 0x8ae   : > { %5188 = vmatpush1.bf16.msra.mxu0 %v8546_v40  ;;  %5229 = vmatpush1.bf16.msra.mxu1 %v8549_v10 }
 0x8b1   : > { %5206 = vmatmul.mubr.bf16.vlgmr.msra.gmra.mxu0 %v6087_v36  ;;  %5247 = vmatmul.mubr.bf16.vlgmr.msra.gmra.mxu1 %v6087_v36 }
 0x951   : > { %v4965_v7 = vpop.f32.mrf.mxu0  ;;  %v5006_v4 = vpop.f32.mrf.mxu1 }
 0x953   : > { %v4967_v11 = vpop.f32.mrf.mxu0  ;;  %v5008_v16 = vpop.f32.mrf.mxu1 }
 0x955   : > { %v4969_v15 = vpop.f32.mrf.mxu0  ;;  %v5010_v18 = vpop.f32.mrf.mxu1 }
 0x957   : > { %v4970_v21 = vpop.f32.mrf.mxu0  ;;  %v5011_v6 = vpop.f32.mrf.mxu1 }
 0x971   : > { %v5207_v9 = vpop.f32.mrf.mxu0  ;;  %v5248_v19 = vpop.f32.mrf.mxu1 }
 0x972   : > { %v5208_v20 = vadd.f32 %v5207_v9, %v4965_v7  ;;  %v5249_v1 = vadd.f32 %v5248_v19, %v5006_v4 }
 0x973   : > { %v5209_v14 = vpop.f32.mrf.mxu0  ;;  %v5250_v40 = vpop.f32.mrf.mxu1 }
 0x974   : > { %v5277_v10 = vadd.f32 %v5260_v23, %v5208_v20  ;;  %v5210_v2 = vadd.f32 %v5209_v14, %v4967_v11  ;;  %v5251_v62 = vadd.f32 %v5250_v40, %v5008_v16  ;;  %v5279_v27 = vadd.f32 %v5268_v53, %v5249_v1 }
 0x975   : > { %v5211_v46 = vpop.f32.mrf.mxu0  ;;  %v5252_v17 = vpop.f32.mrf.mxu1 }
 0x976   : > { %v6152_v44 = vmul.f32 -1.442695, %v5277_v10  ;;  %v5278_v8 = vadd.f32 %v5264_v24, %v5210_v2  ;;  %v5280_v63 = vadd.f32 %v5272_v12, %v5251_v62 }
 0x977   : > { %v5212_v59 = vpop.f32.mrf.mxu0  ;;  %v5253_v60 = vpop.f32.mrf.mxu1 }
 0x978   : > { %6757 = vpow2.f32 %v6152_v44  ;;  %v6153_v61 = vmul.f32 -1.442695, %v5278_v8  ;;  %v6154_v37 = vmul.f32 -1.442695, %v5280_v63 }
 0x97a   : > { %6759 = vpow2.f32 %v6153_v61 }
 0x97b   : > { %6761 = vpow2.f32 %v6154_v37 }
 0x985   : > { %v6758_v26 = vpop.eup %6757 }
 0x986   : > { %v5284_v29 = vadd.f32 1.0, %v6758_v26 }
 0x987   : > { %v6760_v30 = vpop.eup %6759 }
 0x988   : > { %6763 = vrcp.f32 %v5284_v29  ;;  %v5290_v31 = vadd.f32 1.0, %v6760_v30  ;;  %v6762_v32 = vpop.eup %6761 }
 0x989   : > { %6765 = vtanh.f32 %v5279_v27  ;;  %v5297_v49 = vadd.f32 1.0, %v6762_v32 }
 0x98a   : > { %6767 = vrcp.f32 %v5290_v31 }
 0x98b   : > { %6769 = vrcp.f32 %v5297_v49 }
 0x995   : > { %v6764_v33 = vpop.eup %6763 }
 0x996   : > { %v6766_v28 = vpop.eup %6765 }
 0x997   : > { %v6768_v0 = vpop.eup %6767  ;;  %v5302_v41 = vmul.f32 %v6766_v28, %v6764_v33 }
 0x998   : > { %v5301_v51 = vmul.f32 %v6768_v0, %v5300_v35  ;;  %v6770_v52 = vpop.eup %6769 }
 0x99a   : > { %v5303_v50 = vadd.f32 %v5302_v41, %v5301_v51 }
 0x99c   : > { %6771 = vtanh.f32 %v5303_v50  ;;  %5306 = vst [vmem:[#allocation3] sm:$0x3] %v5303_v50 }
 0x9a9   : > { %v6772_v43 = vpop.eup %6771 }
 0x9aa   : > { %v5305_v54 = vmul.f32 %v6772_v43, %v6770_v52 }
 0x9ac   : > { %v5308_v42 = vpack.c.bf16 %v5305_v54, %v5305_v54  ;;  %5307 = vst [vmem:[#allocation2] sm:$0x3] %v5305_v54 }
 0x9ae   : > { %6155 = vst [vmem:[%s5492_s12 + $0x7] sm:$0x1] %v5308_v42 }
 0x9af   : > { %6896 = shalt.err (!%p6893_p2)
}
 0x9b0   : > { %s6897_s28 = scalar_lea.hbm %s8650_s1, 128  ;;  %s6901_s7 = scalar_lea.hbm %s8735_s4, 256 }
 0x9b1   : > { %p6898_p13 = scmp.ne.s32.totalorder %s8650_s1, %s6897_s28  ;;  %p6902_p9 = scmp.lt.s32.totalorder %s8650_s1, %s8735_s4 }
 0x9b2   : > { %p6903_p7 = scmp.lt.s32.totalorder %s6901_s7, %s6897_s28 }
 0x9b3   : > { %p6899_p1 = pnand %p6898_p13, %p8824_p0 }
 0x9b4   : > { %p6904_p4 = por %p6903_p7, %p6902_p9 }
 0x9b5   : > { %p6900_p11 = pneg %p6899_p1 }
 0x9b7   : > { %p6905_p8 = pnand %p6904_p4, %p6900_p11 }
 0x9b9   : > { %6908 = shalt.err (!%p6905_p8)
}
 0x9ba   : > { %s7013_s14 = smov 16   ;;  %s7014_s12 = smov 1   ;;  %v5314_v25 = vld [vmem:[#allocation2] sm:$0x3] }
 0x9bb   : > { %6177 = dma.vmem_to_hbm [thread:$0]  (%p8824_p0), %s8652_s29, 128, %s8650_s1, %s5317_s20, %s7013_s14, %s7013_s14, %s7014_s12  }
 0x9bc   : > { %s8686_s26 = scalar_lea.hbm %s8736_s5, %s6160_s0  ;;  %5315 = vst [vmem:[%s8655_s10] sm:$0x3] %v5314_v25  ;;  %s5322_s9 = scalar_lea.sflag [#allocation14], %s7217_s2 }
 0x9bd   : > { %s6909_s30 = scalar_lea.vmem %s5360_s27, 32  ;;  %s7015_s16 = smov [#allocation13]  }
 0x9be   : > { %p6910_p3 = scmp.ne.s32.totalorder %s5360_s27, %s6909_s30  ;;  %s6913_s28 = sshll.u32 %s7015_s16, 4  ;;  %s6914_s28 = int_to_ptr.vmem [resolvable:$false] %s6913_s28 }
 0x9bf   : > { %s6915_s29 = scalar_lea.vmem %s6914_s28, 64  ;;  %p6916_p5 = scmp.lt.s32.totalorder %s5360_s27, %s6914_s28 }
 0x9c0   : > { %p6911_p10 = pnand %p6910_p3, %p8824_p0  ;;  %p6917_p12 = scmp.lt.s32.totalorder %s6915_s29, %s6909_s30 }
 0x9c2   : > { %p6912_p6 = pneg %p6911_p10  ;;  %p6918_p2 = por %p6917_p12, %p6916_p5 }
 0x9c4   : > { %p6919_p13 = pnand %p6918_p2, %p6912_p6 }
 0x9c6   : > { %6922 = shalt.err (!%p6919_p13)
}
 0x9c7   : > { %s6923_s21 = scalar_lea.hbm %s8686_s26, 32  ;;  %s6927_s0 = scalar_lea.hbm %s8736_s5, 64 }
 0x9c8   : > { %p6924_p1 = scmp.ne.s32.totalorder %s8686_s26, %s6923_s21  ;;  %p6928_p7 = scmp.lt.s32.totalorder %s8686_s26, %s8736_s5 }
 0x9c9   : > { %p6929_p4 = scmp.lt.s32.totalorder %s6927_s0, %s6923_s21 }
 0x9ca   : > { %p6925_p11 = pnand %p6924_p1, %p8824_p0 }
 0x9cb   : > { %p6930_p8 = por %p6929_p4, %p6928_p7 }
 0x9cc   : > { %p6926_p9 = pneg %p6925_p11 }
 0x9ce   : > { %p6931_p3 = pnand %p6930_p8, %p6926_p9 }
 0x9d0   : > { %6934 = shalt.err (!%p6931_p3)
}
 0x9d1   : > { %6178 = dma.vmem_to_hbm [thread:$0]  (%p8824_p0), %s5360_s27, 32, %s8686_s26, %s5322_s9  }
 0x9d2 PF: > { %s5371_s11 = sand.u32 1, %s6981_s18   ;;  %p8825_p10 = scmp.ne.s32.totalorder %s8774_s8, 0 }
 0x9d3   : > { %p8826_p6 = scmp.ge.s32.totalorder %s7001_s23, 2  ;;  %s5372_s25 = scalar_lea.sflag [#allocation6], %s5371_s11 }
 0x9d5   : > { %p6195_p5 = pnand %p8826_p6, %p8825_p10 }
 0x9d7   : > { %p6196_p12 = pneg %p6195_p5 }
 0x9d9   : > { %6972 = dma.done.wait (%p6196_p12), %s5372_s25, 128  }
 0x9da   : > { %6974 = vsyncadd (%p6196_p12), %s5372_s25, 4294967168  ;;  %s5381_s7 = scalar_lea.sflag [#allocation14], %s5371_s11 }
 0x9db   : > { %6976 = dma.done.wait (%p6196_p12), %s5381_s7, 32  }
 0x9dc   : > { %6978 = vsyncadd (%p6196_p12), %s5381_s7, 4294967264  ;;  %s31_s23 = sadd.s32 1, %s7001_s23   ;;  %s8827_s6 = sld [smem:[#allocation20_spill]] }
 0x9dd   : > { %p28_p2 = scmp.ge.s32.totalorder %s31_s23, 4   ;;  %s8828_s20 = sld [smem:[#allocation22_spill]] }
 0x9de   : > { %s8829_s27 = sld [smem:[#allocation21_spill]]  ;;  %s8830_s18 = smov %s6985_s19 }
 0x9df   : > { %s8832_s21 = smov %s6997_s22 }
 0x9e0   :  { %30 = sbr.rel (!%p28_p2) target bundleno = 16 (0x10), region = 159 }
 0x9e2   : > { %s8831_s19 = smov %s8827_s6 }
 0x9e4   : > { %s8833_s22 = smov %s8829_s27 }
 0x9e5   :  { %5386 = vsyncpa [#allocation5], 1 }
 0x9e6   :  { %5388 = vsyncpa [#allocation5 + $0x1], 1 }
 0x9e7   :  { %5389 = vsyncpa [#allocation8], 1 }
 0x9e8   :  { %5391 = vsyncpa [#allocation8 + $0x1], 1 }
 0x9e9   :  { %5392 = vsyncpa [#allocation11], 1 }
 0x9ea   :  { %5394 = vsyncpa [#allocation11 + $0x1], 1 }
 0x9eb   :  { %5395 = vsyncpa [#allocation6], 1 }
 0x9ec   :  { %5397 = vsyncpa [#allocation6 + $0x1], 1 }
 0x9ed   :  { %5398 = vsyncpa [#allocation14], 1 }
 0x9ee   :  { %5400 = vsyncpa [#allocation14 + $0x1], 1 }

</bundles_post_ra>
